<compile_context>
chip_gen: v7x
topology: tpu7x:2x2x1
jax: 0.10.0
libtpu: 0.0.40
codegen_flags: <defaults>
</compile_context>

<pallas_src>
import functools

import jax
import jax.numpy as jnp
from jax.experimental import pallas as pl
from jax.experimental.pallas import tpu as pltpu

LN_EPS = 1e-5  # nn.LayerNorm default


def _layernorm(x, g, b):
    x = x.astype(jnp.float32)
    mu = jnp.mean(x, axis=-1, keepdims=True)
    var = jnp.mean(jnp.square(x - mu), axis=-1, keepdims=True)
    return (x - mu) * jax.lax.rsqrt(var + LN_EPS) * g + b


# ---------------------------------------------------------------------------
# Fused transformer kernel: all layers (+ ln_post, + optional cls_head) in one
# pallas_call.  Grid axis = layer index; activation resident in acc_ref.
# ---------------------------------------------------------------------------
def _encoder_stack_kernel(x_hbm, cls_w, cls_b, lnp_g, lnp_b,
                          vecs, b_qkv, b_fc, w_qkv, w_o, w_fc, w_pr,
                          o_ref, acc_ref, dma_sem, *, n_heads, emit_cls):
    l = pl.program_id(0)
    B, S, D = acc_ref.shape
    N = B * S
    H = n_heads
    dh = D // H
    scale = 1.0 / (dh ** 0.5)

    # Bring the input into the resident activation scratch once (x is not a
    # pipelined block -> no extra whole-batch slab held across layers).
    @pl.when(l == 0)
    def _():
        cp = pltpu.make_async_copy(x_hbm, acc_ref, dma_sem)
        cp.start()
        cp.wait()

    x = acc_ref[...].reshape(N, D)                                # (N, D) f32

    # Packed per-layer small vectors: one DMA per layer.
    vrow = vecs[0]                                                # (8, D) f32
    ln1_g, ln1_b = vrow[0:1], vrow[1:2]
    ln2_g, ln2_b = vrow[2:3], vrow[3:4]
    b_o, b_pr = vrow[4:5], vrow[5:6]
    bqkv = b_qkv[0]                                               # (3H, dh)

    # --- multi-head self attention (pre-LN) ---------------------------------
    xn = _layernorm(x, ln1_g, ln1_b).astype(jnp.bfloat16)         # (N, D) bf16
    attn = jnp.zeros((N, D), jnp.float32)
    for h in range(H):                     # static loop; all slices aligned
        def proj(j, h=h):
            idx = j * H + h
            return (jnp.dot(xn, w_qkv[0, idx],
                            preferred_element_type=jnp.float32)
                    + bqkv[idx:idx + 1]
                    ).astype(jnp.bfloat16).reshape(B, S, dh)
        q, k, v = proj(0), proj(1), proj(2)                       # (B,S,dh)
        s = jnp.einsum('bqd,bkd->bqk', q, k,
                       preferred_element_type=jnp.float32) * scale
        s = s - jnp.max(s, axis=-1, keepdims=True)
        p = jnp.exp(s)
        p = p * pl.reciprocal(jnp.sum(p, axis=-1, keepdims=True), approx=True)
        ctx = jnp.einsum('bqk,bkd->bqd', p.astype(jnp.bfloat16), v,
                         preferred_element_type=jnp.float32)      # (B,S,dh)
        # Fold the head concat into the output projection (aligned accumulate).
        attn = attn + jnp.dot(ctx.reshape(N, dh).astype(jnp.bfloat16),
                              w_o[0, h], preferred_element_type=jnp.float32)
    x = x + attn + b_o

    # --- MLP: Linear(D,4D) -> QuickGELU -> Linear(4D,D) (pre-LN) ------------
    xn2 = _layernorm(x, ln2_g, ln2_b).astype(jnp.bfloat16)
    hmid = (jnp.dot(xn2, w_fc[0], preferred_element_type=jnp.float32)
            + b_fc[0])
    # QuickGELU in f32 (safe on v5e).
    # TODO(synk): compute in bf16 on v6e/v7x to halve the (N,4D) live footprint.
    hmid = hmid * jax.nn.sigmoid(1.702 * hmid)
    y = (jnp.dot(hmid.astype(jnp.bfloat16), w_pr[0],
                 preferred_element_type=jnp.float32) + b_pr)
    x = x + y
    acc_ref[...] = x.reshape(B, S, D)

    @pl.when(l == pl.num_programs(0) - 1)
    def _():
        if emit_cls:
            # Pass 2: only the ln_post'ed CLS token -> fused cls_head matmul,
            # lane-padded (Bm, 128) logits output (dense vst).
            cls_tok = x.reshape(B, S, D)[:, 0:1, :].reshape(B, D)
            cls_tok = _layernorm(cls_tok, lnp_g[...], lnp_b[...])
            logits = (jnp.dot(cls_tok.astype(jnp.bfloat16), cls_w[...],
                              preferred_element_type=jnp.float32) + cls_b[...])
            o_ref[...] = logits.astype(o_ref.dtype)
        else:
            out = _layernorm(x, lnp_g[...], lnp_b[...])           # fused ln_post
            o_ref[...] = out.reshape(B, S, D).astype(o_ref.dtype)


# ---------------------------------------------------------------------------
# Pallas call wrapper
# ---------------------------------------------------------------------------
_PER_LAYER = ("vecs", "b_qkv", "b_fc", "w_qkv", "w_o", "w_fc", "w_pr")


def transformer_encode(params, x, *, n_heads, emit_cls=False):
    """All ResidualAttentionBlocks (+ln_post, optionally +cls_head) in one call."""
    B, S, D = x.shape
    H = n_heads
    dh = D // H
    HD = 4 * D
    L = params["w_qkv"].shape[0]

    if emit_cls:
        out_shape = jax.ShapeDtypeStruct((B, 128), jnp.float32)
        out_spec = pl.BlockSpec((B, 128), lambda l: (0, 0))
    else:
        out_shape = jax.ShapeDtypeStruct((B, S, D), x.dtype)
        out_spec = pl.BlockSpec((B, S, D), lambda l: (0, 0, 0))

    in_specs = [
        pl.BlockSpec(memory_space=pl.ANY),                        # x (HBM, 1 DMA)
        pl.BlockSpec((D, 128), lambda l: (0, 0)),                 # cls_w (padded, bf16)
        pl.BlockSpec((1, 128), lambda l: (0, 0)),                 # cls_b (padded)
        pl.BlockSpec((1, D), lambda l: (0, 0)),                   # ln_post_g
        pl.BlockSpec((1, D), lambda l: (0, 0)),                   # ln_post_b
        pl.BlockSpec((1, 8, D), lambda l: (l, 0, 0)),             # packed small vecs
        pl.BlockSpec((1, 3 * H, dh), lambda l: (l, 0, 0)),        # qkv biases
        pl.BlockSpec((1, 1, HD), lambda l: (l, 0, 0)),            # b_fc
        pl.BlockSpec((1, 3 * H, D, dh), lambda l: (l, 0, 0, 0)),  # w_qkv (per head)
        pl.BlockSpec((1, H, dh, D), lambda l: (l, 0, 0, 0)),      # w_o   (per head)
        pl.BlockSpec((1, D, HD), lambda l: (l, 0, 0)),            # w_fc
        pl.BlockSpec((1, HD, D), lambda l: (l, 0, 0)),            # w_pr
    ]

    # Explicit scoped-VMEM budget: 2x double-buffered bf16 layer weights +
    # resident activation + output block + headroom for the (N,4D) MLP slab.
    n_tok = B * S
    layer_w_bytes = (3 * D * D + D * D + 2 * D * HD) * 2          # bf16
    layer_v_bytes = (8 * D + 3 * D + HD) * 4
    act_bytes = n_tok * D * 4
    vmem_limit = (2 * (layer_w_bytes + layer_v_bytes) + 6 * act_bytes
                  + 16 * n_tok * HD + (2 << 20))
    vmem_limit = int(min(max(vmem_limit, 32 << 20), 128 << 20))

    return pl.pallas_call(
        functools.partial(_encoder_stack_kernel, n_heads=n_heads,
                          emit_cls=emit_cls),
        grid_spec=pltpu.PrefetchScalarGridSpec(
            num_scalar_prefetch=0,
            grid=(L,),
            in_specs=in_specs,
            out_specs=out_spec,
            scratch_shapes=[pltpu.VMEM((B, S, D), jnp.float32),
                            pltpu.SemaphoreType.DMA]),
        out_shape=out_shape,
        compiler_params=pltpu.CompilerParams(
            dimension_semantics=("arbitrary",),   # layers are sequential
            vmem_limit_bytes=vmem_limit),
    )(x, params["cls_w_pad"], params["cls_b_pad"],
      params["ln_post_g"], params["ln_post_b"],
      *[params[k] for k in _PER_LAYER])


# ---------------------------------------------------------------------------
# Parameters (deterministic synthetic init, torch-equivalent shapes)
#  - per-layer tensors stacked on a leading layer axis, matmul weights bf16
#  - q/k/v/o weights stored per head (leading head axis -> no lane slicing)
#  - small per-layer vectors packed into one (L, 8, D) slab
# ---------------------------------------------------------------------------
def init_params(key, n_categories, d_model, n_heads, n_layers):
    D, H, L = d_model, n_heads, n_layers
    dh = D // H
    HD = 4 * D
    keys = iter(jax.random.split(key, 12))
    nrm = lambda shape, std=0.02: jax.random.normal(next(keys), shape,
                                                    jnp.float32) * std
    bf16 = lambda a: a.astype(jnp.bfloat16)

    # rows: 0 ln1_g, 1 ln1_b, 2 ln2_g, 3 ln2_b, 4 b_o, 5 b_pr, 6-7 pad
    vecs = jnp.zeros((L, 8, D), jnp.float32)
    vecs = vecs.at[:, 0, :].set(1.0).at[:, 2, :].set(1.0)

    cls_w = nrm((D, 2))                       # Linear(d_model, 2), transposed
    return {
        "pos": nrm((1, n_categories + 1, D)),
        "blank": nrm((1, 1, D)),
        "padding": nrm((1, 1, D)),
        "cls": nrm((1, 1, D)),
        "ln_post_g": jnp.ones((1, D), jnp.float32),
        "ln_post_b": jnp.zeros((1, D), jnp.float32),
        "cls_w_pad": bf16(jnp.pad(cls_w, ((0, 0), (0, 128 - 2)))),
        "cls_b_pad": jnp.zeros((1, 128), jnp.float32),
        # per-layer streamed tensors (leading axis = layer)
        "vecs": vecs,
        "b_qkv": jnp.zeros((L, 3 * H, dh), jnp.float32),   # [q_h..., k_h..., v_h...]
        "b_fc": jnp.zeros((L, 1, HD), jnp.float32),
        "w_qkv": bf16(nrm((L, 3 * H, D, dh))),             # per-head q|k|v proj
        "w_o": bf16(nrm((L, H, dh, D))),                   # per-head out proj rows
        "w_fc": bf16(nrm((L, D, HD))),
        "w_pr": bf16(nrm((L, HD, D))),
    }


# ---------------------------------------------------------------------------
# Encoder.forward (data_loader=None path)
# ---------------------------------------------------------------------------
def encoder_forward(params, embeddings, input_mask, target_mask,
                    fake_embeddings, *, n_heads):
    B, N, D = embeddings.shape

    # padding / blank substitution (elementwise glue)
    emb = jnp.where((~input_mask & ~target_mask)[:, :, None],
                    params["padding"], embeddings)
    emb = jnp.where(target_mask[:, :, None], params["blank"], emb)

    # pass 1: full token output (ln_post fused into the last grid step)
    cls1 = jnp.broadcast_to(params["cls"], (B, 1, D))
    x1 = jnp.concatenate([cls1, emb], axis=1) + params["pos"]
    out1 = transformer_encode(params, x1, n_heads=n_heads)[:, 1:, :]

    # pass 2: only CLS logits are emitted (cls_head fused, lane-padded to 128)
    out_embeddings = jnp.where(target_mask[:, :, None], out1, emb)
    merge = jnp.concatenate([out_embeddings, fake_embeddings], axis=0)
    Bm = merge.shape[0]
    cls2 = jnp.broadcast_to(params["cls"], (Bm, 1, D))
    x2 = jnp.concatenate([cls2, merge], axis=1) + params["pos"]
    # cls_dropout is identity in eval mode; torch .squeeze() kept as batch dim.
    logits = transformer_encode(params, x2, n_heads=n_heads, emit_cls=True)
    out2 = logits[:, :2]
    return out1, out2


if __name__ == "__main__":
    n_categories, d_model, n_heads, n_layers = 7, 128, 4, 2
    B, Bf = 2, 2

    key = jax.random.PRNGKey(0)
    kp, ke, kf, km1, km2 = jax.random.split(key, 5)
    params = init_params(kp, n_categories, d_model, n_heads, n_layers)

    embeddings = jax.random.normal(ke, (B, n_categories, d_model), jnp.float32)
    fake_embeddings = jax.random.normal(kf, (Bf, n_categories, d_model),
                                        jnp.float32)
    input_mask = jax.random.bernoulli(km1, 0.7, (B, n_categories))
    target_mask = jax.random.bernoulli(km2, 0.3, (B, n_categories))

    fwd = jax.jit(functools.partial(encoder_forward, n_heads=n_heads))
    out1, out2 = fwd(params, embeddings, input_mask, target_mask,
                     fake_embeddings)
    jax.block_until_ready((out1, out2))

    assert out1.shape == (B, n_categories, d_model), out1.shape
    assert out2.shape == (B + Bf, 2), out2.shape
    assert bool(jnp.all(jnp.isfinite(out1))) and bool(jnp.all(jnp.isfinite(out2)))
    print("KERNEL_OK")
</pallas_src>

<mosaic_0001>
module attributes {stable_mosaic.version = 11 : i64} {
  func.func @_encoder_stack_kernel(%arg0: i32, %arg1: memref<2x8x128xf32, #tpu.memory_space<any>>, %arg2: memref<128x128xbf16, #tpu.memory_space<vmem>>, %arg3: memref<1x128xf32, #tpu.memory_space<vmem>>, %arg4: memref<1x128xf32, #tpu.memory_space<vmem>>, %arg5: memref<1x128xf32, #tpu.memory_space<vmem>>, %arg6: memref<1x8x128xf32, #tpu.memory_space<vmem>>, %arg7: memref<1x12x32xf32, #tpu.memory_space<vmem>>, %arg8: memref<1x1x512xf32, #tpu.memory_space<vmem>>, %arg9: memref<1x12x128x32xbf16, #tpu.memory_space<vmem>>, %arg10: memref<1x4x32x128xbf16, #tpu.memory_space<vmem>>, %arg11: memref<1x128x512xbf16, #tpu.memory_space<vmem>>, %arg12: memref<1x512x128xbf16, #tpu.memory_space<vmem>>, %arg13: memref<2x8x128xf32, #tpu.memory_space<vmem>>, %arg14: memref<2x8x128xf32, #tpu.memory_space<vmem>>, %arg15: memref<!tpu.dma_semaphore, #tpu.memory_space<semaphore_mem>>) attributes {dimension_semantics = [#tpu.dimension_semantics<arbitrary>], iteration_bounds = array<i64: 2>, scalar_prefetch = 0 : i64, scratch_operands = 2 : i64, tpu.core_type = #tpu.core_type<tc>, window_params = [{}, {pipeline_mode = #tpu.pipeline_mode<synchronous>, transform_indices = @transform_1, window_bounds = array<i64: 128, 128>}, {pipeline_mode = #tpu.pipeline_mode<synchronous>, transform_indices = @transform_2, window_bounds = array<i64: 1, 128>}, {pipeline_mode = #tpu.pipeline_mode<synchronous>, transform_indices = @transform_3, window_bounds = array<i64: 1, 128>}, {pipeline_mode = #tpu.pipeline_mode<synchronous>, transform_indices = @transform_4, window_bounds = array<i64: 1, 128>}, {transform_indices = @transform_5, window_bounds = array<i64: 1, 8, 128>}, {transform_indices = @transform_6, window_bounds = array<i64: 1, 12, 32>}, {transform_indices = @transform_7, window_bounds = array<i64: 1, 1, 512>}, {transform_indices = @transform_8, window_bounds = array<i64: 1, 12, 128, 32>}, {transform_indices = @transform_9, window_bounds = array<i64: 1, 4, 32, 128>}, {transform_indices = @transform_10, window_bounds = array<i64: 1, 128, 512>}, {transform_indices = @transform_11, window_bounds = array<i64: 1, 512, 128>}, {pipeline_mode = #tpu.pipeline_mode<synchronous>, transform_indices = @transform_12, window_bounds = array<i64: 2, 8, 128>}]} {
    %c0_i32 = arith.constant 0 : i32
    %0 = arith.cmpi eq, %arg0, %c0_i32 : i32
    %1 = arith.extui %0 : i1 to i32
    %c0_i32_0 = arith.constant 0 : i32
    %2 = arith.cmpi ne, %1, %c0_i32_0 : i32
    scf.if %2 {
      tpu.enqueue_dma source(%arg1 : memref<2x8x128xf32, #tpu.memory_space<any>>) target(%arg14 : memref<2x8x128xf32, #tpu.memory_space<vmem>>) target_semaphore(%arg15 : memref<!tpu.dma_semaphore, #tpu.memory_space<semaphore_mem>>)
      tpu.wait_dma2 semaphore(%arg15 : memref<!tpu.dma_semaphore, #tpu.memory_space<semaphore_mem>>) src(%arg1 : memref<2x8x128xf32, #tpu.memory_space<any>>) dst(%arg14 : memref<2x8x128xf32, #tpu.memory_space<vmem>>)
    } else {
    }
    %c0 = arith.constant 0 : index
    %c0_1 = arith.constant 0 : index
    %c0_2 = arith.constant 0 : index
    %3 = vector.load %arg14[%c0, %c0_1, %c0_2] : memref<2x8x128xf32, #tpu.memory_space<vmem>>, vector<2x8x128xf32>
    %4 = vector.shape_cast %3 : vector<2x8x128xf32> to vector<16x128xf32>
    %c0_3 = arith.constant 0 : index
    %c0_4 = arith.constant 0 : index
    %c0_5 = arith.constant 0 : index
    %5 = vector.load %arg6[%c0_3, %c0_4, %c0_5] : memref<1x8x128xf32, #tpu.memory_space<vmem>>, vector<1x8x128xf32>
    %6 = vector.shape_cast %5 : vector<1x8x128xf32> to vector<8x128xf32>
    %7 = vector.extract_strided_slice %6 {offsets = [0, 0], sizes = [1, 128], strides = [1, 1]} : vector<8x128xf32> to vector<1x128xf32>
    %8 = vector.extract_strided_slice %6 {offsets = [1, 0], sizes = [1, 128], strides = [1, 1]} : vector<8x128xf32> to vector<1x128xf32>
    %9 = vector.extract_strided_slice %6 {offsets = [2, 0], sizes = [1, 128], strides = [1, 1]} : vector<8x128xf32> to vector<1x128xf32>
    %10 = vector.extract_strided_slice %6 {offsets = [3, 0], sizes = [1, 128], strides = [1, 1]} : vector<8x128xf32> to vector<1x128xf32>
    %11 = vector.extract_strided_slice %6 {offsets = [4, 0], sizes = [1, 128], strides = [1, 1]} : vector<8x128xf32> to vector<1x128xf32>
    %12 = vector.extract_strided_slice %6 {offsets = [5, 0], sizes = [1, 128], strides = [1, 1]} : vector<8x128xf32> to vector<1x128xf32>
    %c0_6 = arith.constant 0 : index
    %c0_7 = arith.constant 0 : index
    %c0_8 = arith.constant 0 : index
    %13 = vector.load %arg7[%c0_6, %c0_7, %c0_8] : memref<1x12x32xf32, #tpu.memory_space<vmem>>, vector<1x12x32xf32>
    %14 = vector.shape_cast %13 : vector<1x12x32xf32> to vector<12x32xf32>
    %cst = arith.constant dense<0.000000e+00> : vector<16xf32>
    %15 = vector.multi_reduction <add>, %4, %cst [1] : vector<16x128xf32> to vector<16xf32>
    %16 = vector.shape_cast %15 : vector<16xf32> to vector<16x1xf32>
    %cst_9 = arith.constant 1.280000e+02 : f32
    %17 = vector.broadcast %cst_9 : f32 to vector<16x1xf32>
    %18 = arith.divf %16, %17 : vector<16x1xf32>
    %19 = vector.broadcast %18 : vector<16x1xf32> to vector<16x128xf32>
    %20 = arith.subf %4, %19 : vector<16x128xf32>
    %21 = arith.mulf %20, %20 : vector<16x128xf32>
    %cst_10 = arith.constant dense<0.000000e+00> : vector<16xf32>
    %22 = vector.multi_reduction <add>, %21, %cst_10 [1] : vector<16x128xf32> to vector<16xf32>
    %23 = vector.shape_cast %22 : vector<16xf32> to vector<16x1xf32>
    %cst_11 = arith.constant 1.280000e+02 : f32
    %24 = vector.broadcast %cst_11 : f32 to vector<16x1xf32>
    %25 = arith.divf %23, %24 : vector<16x1xf32>
    %26 = vector.broadcast %18 : vector<16x1xf32> to vector<16x128xf32>
    %27 = arith.subf %4, %26 : vector<16x128xf32>
    %cst_12 = arith.constant 9.99999974E-6 : f32
    %28 = vector.broadcast %cst_12 : f32 to vector<16x1xf32>
    %29 = arith.addf %25, %28 : vector<16x1xf32>
    %30 = math.rsqrt %29 : vector<16x1xf32>
    %31 = vector.broadcast %30 : vector<16x1xf32> to vector<16x128xf32>
    %32 = arith.mulf %27, %31 : vector<16x128xf32>
    %33 = vector.broadcast %7 : vector<1x128xf32> to vector<16x128xf32>
    %34 = arith.mulf %32, %33 : vector<16x128xf32>
    %35 = vector.broadcast %8 : vector<1x128xf32> to vector<16x128xf32>
    %36 = arith.addf %34, %35 : vector<16x128xf32>
    %37 = arith.truncf %36 : vector<16x128xf32> to vector<16x128xbf16>
    %cst_13 = arith.constant 0.000000e+00 : f32
    %38 = vector.broadcast %cst_13 : f32 to vector<16x128xf32>
    %c0_14 = arith.constant 0 : index
    %c0_15 = arith.constant 0 : index
    %c0_16 = arith.constant 0 : index
    %c0_17 = arith.constant 0 : index
    %39 = vector.load %arg9[%c0_14, %c0_15, %c0_16, %c0_17] : memref<1x12x128x32xbf16, #tpu.memory_space<vmem>>, vector<1x1x128x32xbf16>
    %40 = vector.shape_cast %39 : vector<1x1x128x32xbf16> to vector<128x32xbf16>
    %cst_18 = arith.constant dense<0.000000e+00> : vector<16x32xf32>
    %41 = tpu.matmul %37, %40, %cst_18 {dimension_numbers = #tpu.dot_dimension_numbers<[1], [0], [0], [1], [0, 0, 1, 1], [], []>} : vector<16x128xbf16>, vector<128x32xbf16>, vector<16x32xf32> -> vector<16x32xf32>
    %42 = vector.extract_strided_slice %14 {offsets = [0, 0], sizes = [1, 32], strides = [1, 1]} : vector<12x32xf32> to vector<1x32xf32>
    %43 = vector.broadcast %42 : vector<1x32xf32> to vector<16x32xf32>
    %44 = arith.addf %41, %43 : vector<16x32xf32>
    %45 = arith.truncf %44 : vector<16x32xf32> to vector<16x32xbf16>
    %46 = vector.shape_cast %45 : vector<16x32xbf16> to vector<2x8x32xbf16>
    %c0_19 = arith.constant 0 : index
    %c4 = arith.constant 4 : index
    %c0_20 = arith.constant 0 : index
    %c0_21 = arith.constant 0 : index
    %47 = vector.load %arg9[%c0_19, %c4, %c0_20, %c0_21] : memref<1x12x128x32xbf16, #tpu.memory_space<vmem>>, vector<1x1x128x32xbf16>
    %48 = vector.shape_cast %47 : vector<1x1x128x32xbf16> to vector<128x32xbf16>
    %cst_22 = arith.constant dense<0.000000e+00> : vector<16x32xf32>
    %49 = tpu.matmul %37, %48, %cst_22 {dimension_numbers = #tpu.dot_dimension_numbers<[1], [0], [0], [1], [0, 0, 1, 1], [], []>} : vector<16x128xbf16>, vector<128x32xbf16>, vector<16x32xf32> -> vector<16x32xf32>
    %50 = vector.extract_strided_slice %14 {offsets = [4, 0], sizes = [1, 32], strides = [1, 1]} : vector<12x32xf32> to vector<1x32xf32>
    %51 = vector.broadcast %50 : vector<1x32xf32> to vector<16x32xf32>
    %52 = arith.addf %49, %51 : vector<16x32xf32>
    %53 = arith.truncf %52 : vector<16x32xf32> to vector<16x32xbf16>
    %54 = vector.shape_cast %53 : vector<16x32xbf16> to vector<2x8x32xbf16>
    %c0_23 = arith.constant 0 : index
    %c8 = arith.constant 8 : index
    %c0_24 = arith.constant 0 : index
    %c0_25 = arith.constant 0 : index
    %55 = vector.load %arg9[%c0_23, %c8, %c0_24, %c0_25] : memref<1x12x128x32xbf16, #tpu.memory_space<vmem>>, vector<1x1x128x32xbf16>
    %56 = vector.shape_cast %55 : vector<1x1x128x32xbf16> to vector<128x32xbf16>
    %cst_26 = arith.constant dense<0.000000e+00> : vector<16x32xf32>
    %57 = tpu.matmul %37, %56, %cst_26 {dimension_numbers = #tpu.dot_dimension_numbers<[1], [0], [0], [1], [0, 0, 1, 1], [], []>} : vector<16x128xbf16>, vector<128x32xbf16>, vector<16x32xf32> -> vector<16x32xf32>
    %58 = vector.extract_strided_slice %14 {offsets = [8, 0], sizes = [1, 32], strides = [1, 1]} : vector<12x32xf32> to vector<1x32xf32>
    %59 = vector.broadcast %58 : vector<1x32xf32> to vector<16x32xf32>
    %60 = arith.addf %57, %59 : vector<16x32xf32>
    %61 = arith.truncf %60 : vector<16x32xf32> to vector<16x32xbf16>
    %62 = vector.shape_cast %61 : vector<16x32xbf16> to vector<2x8x32xbf16>
    "tpu.trace_start"() <{level = 10 : i32, message = "bqd,bkd->bqk"}> : () -> ()
    %cst_27 = arith.constant dense<0.000000e+00> : vector<2x8x8xf32>
    %63 = tpu.matmul %46, %54, %cst_27 {dimension_numbers = #tpu.dot_dimension_numbers<[2], [2], [1], [1], [0, 0, 0, 1, 1, 1], [0], [0]>} : vector<2x8x32xbf16>, vector<2x8x32xbf16>, vector<2x8x8xf32> -> vector<2x8x8xf32>
    "tpu.trace_stop"() : () -> ()
    %cst_28 = arith.constant 0.176776692 : f32
    %64 = vector.broadcast %cst_28 : f32 to vector<2x8x8xf32>
    %65 = arith.mulf %63, %64 : vector<2x8x8xf32>
    %cst_29 = arith.constant dense<0xFF800000> : vector<2x8xf32>
    %66 = vector.multi_reduction <maximumf>, %65, %cst_29 [2] : vector<2x8x8xf32> to vector<2x8xf32>
    %67 = vector.shape_cast %66 : vector<2x8xf32> to vector<2x8x1xf32>
    %68 = vector.broadcast %67 : vector<2x8x1xf32> to vector<2x8x8xf32>
    %69 = arith.subf %65, %68 : vector<2x8x8xf32>
    %70 = math.exp %69 : vector<2x8x8xf32>
    %cst_30 = arith.constant dense<0.000000e+00> : vector<2x8xf32>
    %71 = vector.multi_reduction <add>, %70, %cst_30 [2] : vector<2x8x8xf32> to vector<2x8xf32>
    %72 = vector.shape_cast %71 : vector<2x8xf32> to vector<2x8x1xf32>
    %73 = tpu.reciprocal %72 {approx = true} : vector<2x8x1xf32> -> vector<2x8x1xf32>
    %74 = vector.broadcast %73 : vector<2x8x1xf32> to vector<2x8x8xf32>
    %75 = arith.mulf %70, %74 : vector<2x8x8xf32>
    %76 = arith.truncf %75 : vector<2x8x8xf32> to vector<2x8x8xbf16>
    "tpu.trace_start"() <{level = 10 : i32, message = "bqk,bkd->bqd"}> : () -> ()
    %cst_31 = arith.constant dense<0.000000e+00> : vector<2x8x32xf32>
    %77 = tpu.matmul %76, %62, %cst_31 {dimension_numbers = #tpu.dot_dimension_numbers<[2], [1], [1], [2], [0, 0, 0, 1, 1, 2], [0], [0]>} : vector<2x8x8xbf16>, vector<2x8x32xbf16>, vector<2x8x32xf32> -> vector<2x8x32xf32>
    "tpu.trace_stop"() : () -> ()
    %78 = vector.shape_cast %77 : vector<2x8x32xf32> to vector<16x32xf32>
    %79 = arith.truncf %78 : vector<16x32xf32> to vector<16x32xbf16>
    %c0_32 = arith.constant 0 : index
    %c0_33 = arith.constant 0 : index
    %c0_34 = arith.constant 0 : index
    %c0_35 = arith.constant 0 : index
    %80 = vector.load %arg10[%c0_32, %c0_33, %c0_34, %c0_35] : memref<1x4x32x128xbf16, #tpu.memory_space<vmem>>, vector<1x1x32x128xbf16>
    %81 = vector.shape_cast %80 : vector<1x1x32x128xbf16> to vector<32x128xbf16>
    %cst_36 = arith.constant dense<0.000000e+00> : vector<16x128xf32>
    %82 = tpu.matmul %79, %81, %cst_36 {dimension_numbers = #tpu.dot_dimension_numbers<[1], [0], [0], [1], [0, 0, 1, 1], [], []>} : vector<16x32xbf16>, vector<32x128xbf16>, vector<16x128xf32> -> vector<16x128xf32>
    %83 = arith.addf %38, %82 : vector<16x128xf32>
    %c0_37 = arith.constant 0 : index
    %c1 = arith.constant 1 : index
    %c0_38 = arith.constant 0 : index
    %c0_39 = arith.constant 0 : index
    %84 = vector.load %arg9[%c0_37, %c1, %c0_38, %c0_39] : memref<1x12x128x32xbf16, #tpu.memory_space<vmem>>, vector<1x1x128x32xbf16>
    %85 = vector.shape_cast %84 : vector<1x1x128x32xbf16> to vector<128x32xbf16>
    %cst_40 = arith.constant dense<0.000000e+00> : vector<16x32xf32>
    %86 = tpu.matmul %37, %85, %cst_40 {dimension_numbers = #tpu.dot_dimension_numbers<[1], [0], [0], [1], [0, 0, 1, 1], [], []>} : vector<16x128xbf16>, vector<128x32xbf16>, vector<16x32xf32> -> vector<16x32xf32>
    %87 = vector.extract_strided_slice %14 {offsets = [1, 0], sizes = [1, 32], strides = [1, 1]} : vector<12x32xf32> to vector<1x32xf32>
    %88 = vector.broadcast %87 : vector<1x32xf32> to vector<16x32xf32>
    %89 = arith.addf %86, %88 : vector<16x32xf32>
    %90 = arith.truncf %89 : vector<16x32xf32> to vector<16x32xbf16>
    %91 = vector.shape_cast %90 : vector<16x32xbf16> to vector<2x8x32xbf16>
    %c0_41 = arith.constant 0 : index
    %c5 = arith.constant 5 : index
    %c0_42 = arith.constant 0 : index
    %c0_43 = arith.constant 0 : index
    %92 = vector.load %arg9[%c0_41, %c5, %c0_42, %c0_43] : memref<1x12x128x32xbf16, #tpu.memory_space<vmem>>, vector<1x1x128x32xbf16>
    %93 = vector.shape_cast %92 : vector<1x1x128x32xbf16> to vector<128x32xbf16>
    %cst_44 = arith.constant dense<0.000000e+00> : vector<16x32xf32>
    %94 = tpu.matmul %37, %93, %cst_44 {dimension_numbers = #tpu.dot_dimension_numbers<[1], [0], [0], [1], [0, 0, 1, 1], [], []>} : vector<16x128xbf16>, vector<128x32xbf16>, vector<16x32xf32> -> vector<16x32xf32>
    %95 = vector.extract_strided_slice %14 {offsets = [5, 0], sizes = [1, 32], strides = [1, 1]} : vector<12x32xf32> to vector<1x32xf32>
    %96 = vector.broadcast %95 : vector<1x32xf32> to vector<16x32xf32>
    %97 = arith.addf %94, %96 : vector<16x32xf32>
    %98 = arith.truncf %97 : vector<16x32xf32> to vector<16x32xbf16>
    %99 = vector.shape_cast %98 : vector<16x32xbf16> to vector<2x8x32xbf16>
    %c0_45 = arith.constant 0 : index
    %c9 = arith.constant 9 : index
    %c0_46 = arith.constant 0 : index
    %c0_47 = arith.constant 0 : index
    %100 = vector.load %arg9[%c0_45, %c9, %c0_46, %c0_47] : memref<1x12x128x32xbf16, #tpu.memory_space<vmem>>, vector<1x1x128x32xbf16>
    %101 = vector.shape_cast %100 : vector<1x1x128x32xbf16> to vector<128x32xbf16>
    %cst_48 = arith.constant dense<0.000000e+00> : vector<16x32xf32>
    %102 = tpu.matmul %37, %101, %cst_48 {dimension_numbers = #tpu.dot_dimension_numbers<[1], [0], [0], [1], [0, 0, 1, 1], [], []>} : vector<16x128xbf16>, vector<128x32xbf16>, vector<16x32xf32> -> vector<16x32xf32>
    %103 = vector.extract_strided_slice %14 {offsets = [9, 0], sizes = [1, 32], strides = [1, 1]} : vector<12x32xf32> to vector<1x32xf32>
    %104 = vector.broadcast %103 : vector<1x32xf32> to vector<16x32xf32>
    %105 = arith.addf %102, %104 : vector<16x32xf32>
    %106 = arith.truncf %105 : vector<16x32xf32> to vector<16x32xbf16>
    %107 = vector.shape_cast %106 : vector<16x32xbf16> to vector<2x8x32xbf16>
    "tpu.trace_start"() <{level = 10 : i32, message = "bqd,bkd->bqk"}> : () -> ()
    %cst_49 = arith.constant dense<0.000000e+00> : vector<2x8x8xf32>
    %108 = tpu.matmul %91, %99, %cst_49 {dimension_numbers = #tpu.dot_dimension_numbers<[2], [2], [1], [1], [0, 0, 0, 1, 1, 1], [0], [0]>} : vector<2x8x32xbf16>, vector<2x8x32xbf16>, vector<2x8x8xf32> -> vector<2x8x8xf32>
    "tpu.trace_stop"() : () -> ()
    %cst_50 = arith.constant 0.176776692 : f32
    %109 = vector.broadcast %cst_50 : f32 to vector<2x8x8xf32>
    %110 = arith.mulf %108, %109 : vector<2x8x8xf32>
    %cst_51 = arith.constant dense<0xFF800000> : vector<2x8xf32>
    %111 = vector.multi_reduction <maximumf>, %110, %cst_51 [2] : vector<2x8x8xf32> to vector<2x8xf32>
    %112 = vector.shape_cast %111 : vector<2x8xf32> to vector<2x8x1xf32>
    %113 = vector.broadcast %112 : vector<2x8x1xf32> to vector<2x8x8xf32>
    %114 = arith.subf %110, %113 : vector<2x8x8xf32>
    %115 = math.exp %114 : vector<2x8x8xf32>
    %cst_52 = arith.constant dense<0.000000e+00> : vector<2x8xf32>
    %116 = vector.multi_reduction <add>, %115, %cst_52 [2] : vector<2x8x8xf32> to vector<2x8xf32>
    %117 = vector.shape_cast %116 : vector<2x8xf32> to vector<2x8x1xf32>
    %118 = tpu.reciprocal %117 {approx = true} : vector<2x8x1xf32> -> vector<2x8x1xf32>
    %119 = vector.broadcast %118 : vector<2x8x1xf32> to vector<2x8x8xf32>
    %120 = arith.mulf %115, %119 : vector<2x8x8xf32>
    %121 = arith.truncf %120 : vector<2x8x8xf32> to vector<2x8x8xbf16>
    "tpu.trace_start"() <{level = 10 : i32, message = "bqk,bkd->bqd"}> : () -> ()
    %cst_53 = arith.constant dense<0.000000e+00> : vector<2x8x32xf32>
    %122 = tpu.matmul %121, %107, %cst_53 {dimension_numbers = #tpu.dot_dimension_numbers<[2], [1], [1], [2], [0, 0, 0, 1, 1, 2], [0], [0]>} : vector<2x8x8xbf16>, vector<2x8x32xbf16>, vector<2x8x32xf32> -> vector<2x8x32xf32>
    "tpu.trace_stop"() : () -> ()
    %123 = vector.shape_cast %122 : vector<2x8x32xf32> to vector<16x32xf32>
    %124 = arith.truncf %123 : vector<16x32xf32> to vector<16x32xbf16>
    %c0_54 = arith.constant 0 : index
    %c1_55 = arith.constant 1 : index
    %c0_56 = arith.constant 0 : index
    %c0_57 = arith.constant 0 : index
    %125 = vector.load %arg10[%c0_54, %c1_55, %c0_56, %c0_57] : memref<1x4x32x128xbf16, #tpu.memory_space<vmem>>, vector<1x1x32x128xbf16>
    %126 = vector.shape_cast %125 : vector<1x1x32x128xbf16> to vector<32x128xbf16>
    %cst_58 = arith.constant dense<0.000000e+00> : vector<16x128xf32>
    %127 = tpu.matmul %124, %126, %cst_58 {dimension_numbers = #tpu.dot_dimension_numbers<[1], [0], [0], [1], [0, 0, 1, 1], [], []>} : vector<16x32xbf16>, vector<32x128xbf16>, vector<16x128xf32> -> vector<16x128xf32>
    %128 = arith.addf %83, %127 : vector<16x128xf32>
    %c0_59 = arith.constant 0 : index
    %c2 = arith.constant 2 : index
    %c0_60 = arith.constant 0 : index
    %c0_61 = arith.constant 0 : index
    %129 = vector.load %arg9[%c0_59, %c2, %c0_60, %c0_61] : memref<1x12x128x32xbf16, #tpu.memory_space<vmem>>, vector<1x1x128x32xbf16>
    %130 = vector.shape_cast %129 : vector<1x1x128x32xbf16> to vector<128x32xbf16>
    %cst_62 = arith.constant dense<0.000000e+00> : vector<16x32xf32>
    %131 = tpu.matmul %37, %130, %cst_62 {dimension_numbers = #tpu.dot_dimension_numbers<[1], [0], [0], [1], [0, 0, 1, 1], [], []>} : vector<16x128xbf16>, vector<128x32xbf16>, vector<16x32xf32> -> vector<16x32xf32>
    %132 = vector.extract_strided_slice %14 {offsets = [2, 0], sizes = [1, 32], strides = [1, 1]} : vector<12x32xf32> to vector<1x32xf32>
    %133 = vector.broadcast %132 : vector<1x32xf32> to vector<16x32xf32>
    %134 = arith.addf %131, %133 : vector<16x32xf32>
    %135 = arith.truncf %134 : vector<16x32xf32> to vector<16x32xbf16>
    %136 = vector.shape_cast %135 : vector<16x32xbf16> to vector<2x8x32xbf16>
    %c0_63 = arith.constant 0 : index
    %c6 = arith.constant 6 : index
    %c0_64 = arith.constant 0 : index
    %c0_65 = arith.constant 0 : index
    %137 = vector.load %arg9[%c0_63, %c6, %c0_64, %c0_65] : memref<1x12x128x32xbf16, #tpu.memory_space<vmem>>, vector<1x1x128x32xbf16>
    %138 = vector.shape_cast %137 : vector<1x1x128x32xbf16> to vector<128x32xbf16>
    %cst_66 = arith.constant dense<0.000000e+00> : vector<16x32xf32>
    %139 = tpu.matmul %37, %138, %cst_66 {dimension_numbers = #tpu.dot_dimension_numbers<[1], [0], [0], [1], [0, 0, 1, 1], [], []>} : vector<16x128xbf16>, vector<128x32xbf16>, vector<16x32xf32> -> vector<16x32xf32>
    %140 = vector.extract_strided_slice %14 {offsets = [6, 0], sizes = [1, 32], strides = [1, 1]} : vector<12x32xf32> to vector<1x32xf32>
    %141 = vector.broadcast %140 : vector<1x32xf32> to vector<16x32xf32>
    %142 = arith.addf %139, %141 : vector<16x32xf32>
    %143 = arith.truncf %142 : vector<16x32xf32> to vector<16x32xbf16>
    %144 = vector.shape_cast %143 : vector<16x32xbf16> to vector<2x8x32xbf16>
    %c0_67 = arith.constant 0 : index
    %c10 = arith.constant 10 : index
    %c0_68 = arith.constant 0 : index
    %c0_69 = arith.constant 0 : index
    %145 = vector.load %arg9[%c0_67, %c10, %c0_68, %c0_69] : memref<1x12x128x32xbf16, #tpu.memory_space<vmem>>, vector<1x1x128x32xbf16>
    %146 = vector.shape_cast %145 : vector<1x1x128x32xbf16> to vector<128x32xbf16>
    %cst_70 = arith.constant dense<0.000000e+00> : vector<16x32xf32>
    %147 = tpu.matmul %37, %146, %cst_70 {dimension_numbers = #tpu.dot_dimension_numbers<[1], [0], [0], [1], [0, 0, 1, 1], [], []>} : vector<16x128xbf16>, vector<128x32xbf16>, vector<16x32xf32> -> vector<16x32xf32>
    %148 = vector.extract_strided_slice %14 {offsets = [10, 0], sizes = [1, 32], strides = [1, 1]} : vector<12x32xf32> to vector<1x32xf32>
    %149 = vector.broadcast %148 : vector<1x32xf32> to vector<16x32xf32>
    %150 = arith.addf %147, %149 : vector<16x32xf32>
    %151 = arith.truncf %150 : vector<16x32xf32> to vector<16x32xbf16>
    %152 = vector.shape_cast %151 : vector<16x32xbf16> to vector<2x8x32xbf16>
    "tpu.trace_start"() <{level = 10 : i32, message = "bqd,bkd->bqk"}> : () -> ()
    %cst_71 = arith.constant dense<0.000000e+00> : vector<2x8x8xf32>
    %153 = tpu.matmul %136, %144, %cst_71 {dimension_numbers = #tpu.dot_dimension_numbers<[2], [2], [1], [1], [0, 0, 0, 1, 1, 1], [0], [0]>} : vector<2x8x32xbf16>, vector<2x8x32xbf16>, vector<2x8x8xf32> -> vector<2x8x8xf32>
    "tpu.trace_stop"() : () -> ()
    %cst_72 = arith.constant 0.176776692 : f32
    %154 = vector.broadcast %cst_72 : f32 to vector<2x8x8xf32>
    %155 = arith.mulf %153, %154 : vector<2x8x8xf32>
    %cst_73 = arith.constant dense<0xFF800000> : vector<2x8xf32>
    %156 = vector.multi_reduction <maximumf>, %155, %cst_73 [2] : vector<2x8x8xf32> to vector<2x8xf32>
    %157 = vector.shape_cast %156 : vector<2x8xf32> to vector<2x8x1xf32>
    %158 = vector.broadcast %157 : vector<2x8x1xf32> to vector<2x8x8xf32>
    %159 = arith.subf %155, %158 : vector<2x8x8xf32>
    %160 = math.exp %159 : vector<2x8x8xf32>
    %cst_74 = arith.constant dense<0.000000e+00> : vector<2x8xf32>
    %161 = vector.multi_reduction <add>, %160, %cst_74 [2] : vector<2x8x8xf32> to vector<2x8xf32>
    %162 = vector.shape_cast %161 : vector<2x8xf32> to vector<2x8x1xf32>
    %163 = tpu.reciprocal %162 {approx = true} : vector<2x8x1xf32> -> vector<2x8x1xf32>
    %164 = vector.broadcast %163 : vector<2x8x1xf32> to vector<2x8x8xf32>
    %165 = arith.mulf %160, %164 : vector<2x8x8xf32>
    %166 = arith.truncf %165 : vector<2x8x8xf32> to vector<2x8x8xbf16>
    "tpu.trace_start"() <{level = 10 : i32, message = "bqk,bkd->bqd"}> : () -> ()
    %cst_75 = arith.constant dense<0.000000e+00> : vector<2x8x32xf32>
    %167 = tpu.matmul %166, %152, %cst_75 {dimension_numbers = #tpu.dot_dimension_numbers<[2], [1], [1], [2], [0, 0, 0, 1, 1, 2], [0], [0]>} : vector<2x8x8xbf16>, vector<2x8x32xbf16>, vector<2x8x32xf32> -> vector<2x8x32xf32>
    "tpu.trace_stop"() : () -> ()
    %168 = vector.shape_cast %167 : vector<2x8x32xf32> to vector<16x32xf32>
    %169 = arith.truncf %168 : vector<16x32xf32> to vector<16x32xbf16>
    %c0_76 = arith.constant 0 : index
    %c2_77 = arith.constant 2 : index
    %c0_78 = arith.constant 0 : index
    %c0_79 = arith.constant 0 : index
    %170 = vector.load %arg10[%c0_76, %c2_77, %c0_78, %c0_79] : memref<1x4x32x128xbf16, #tpu.memory_space<vmem>>, vector<1x1x32x128xbf16>
    %171 = vector.shape_cast %170 : vector<1x1x32x128xbf16> to vector<32x128xbf16>
    %cst_80 = arith.constant dense<0.000000e+00> : vector<16x128xf32>
    %172 = tpu.matmul %169, %171, %cst_80 {dimension_numbers = #tpu.dot_dimension_numbers<[1], [0], [0], [1], [0, 0, 1, 1], [], []>} : vector<16x32xbf16>, vector<32x128xbf16>, vector<16x128xf32> -> vector<16x128xf32>
    %173 = arith.addf %128, %172 : vector<16x128xf32>
    %c0_81 = arith.constant 0 : index
    %c3 = arith.constant 3 : index
    %c0_82 = arith.constant 0 : index
    %c0_83 = arith.constant 0 : index
    %174 = vector.load %arg9[%c0_81, %c3, %c0_82, %c0_83] : memref<1x12x128x32xbf16, #tpu.memory_space<vmem>>, vector<1x1x128x32xbf16>
    %175 = vector.shape_cast %174 : vector<1x1x128x32xbf16> to vector<128x32xbf16>
    %cst_84 = arith.constant dense<0.000000e+00> : vector<16x32xf32>
    %176 = tpu.matmul %37, %175, %cst_84 {dimension_numbers = #tpu.dot_dimension_numbers<[1], [0], [0], [1], [0, 0, 1, 1], [], []>} : vector<16x128xbf16>, vector<128x32xbf16>, vector<16x32xf32> -> vector<16x32xf32>
    %177 = vector.extract_strided_slice %14 {offsets = [3, 0], sizes = [1, 32], strides = [1, 1]} : vector<12x32xf32> to vector<1x32xf32>
    %178 = vector.broadcast %177 : vector<1x32xf32> to vector<16x32xf32>
    %179 = arith.addf %176, %178 : vector<16x32xf32>
    %180 = arith.truncf %179 : vector<16x32xf32> to vector<16x32xbf16>
    %181 = vector.shape_cast %180 : vector<16x32xbf16> to vector<2x8x32xbf16>
    %c0_85 = arith.constant 0 : index
    %c7 = arith.constant 7 : index
    %c0_86 = arith.constant 0 : index
    %c0_87 = arith.constant 0 : index
    %182 = vector.load %arg9[%c0_85, %c7, %c0_86, %c0_87] : memref<1x12x128x32xbf16, #tpu.memory_space<vmem>>, vector<1x1x128x32xbf16>
    %183 = vector.shape_cast %182 : vector<1x1x128x32xbf16> to vector<128x32xbf16>
    %cst_88 = arith.constant dense<0.000000e+00> : vector<16x32xf32>
    %184 = tpu.matmul %37, %183, %cst_88 {dimension_numbers = #tpu.dot_dimension_numbers<[1], [0], [0], [1], [0, 0, 1, 1], [], []>} : vector<16x128xbf16>, vector<128x32xbf16>, vector<16x32xf32> -> vector<16x32xf32>
    %185 = vector.extract_strided_slice %14 {offsets = [7, 0], sizes = [1, 32], strides = [1, 1]} : vector<12x32xf32> to vector<1x32xf32>
    %186 = vector.broadcast %185 : vector<1x32xf32> to vector<16x32xf32>
    %187 = arith.addf %184, %186 : vector<16x32xf32>
    %188 = arith.truncf %187 : vector<16x32xf32> to vector<16x32xbf16>
    %189 = vector.shape_cast %188 : vector<16x32xbf16> to vector<2x8x32xbf16>
    %c0_89 = arith.constant 0 : index
    %c11 = arith.constant 11 : index
    %c0_90 = arith.constant 0 : index
    %c0_91 = arith.constant 0 : index
    %190 = vector.load %arg9[%c0_89, %c11, %c0_90, %c0_91] : memref<1x12x128x32xbf16, #tpu.memory_space<vmem>>, vector<1x1x128x32xbf16>
    %191 = vector.shape_cast %190 : vector<1x1x128x32xbf16> to vector<128x32xbf16>
    %cst_92 = arith.constant dense<0.000000e+00> : vector<16x32xf32>
    %192 = tpu.matmul %37, %191, %cst_92 {dimension_numbers = #tpu.dot_dimension_numbers<[1], [0], [0], [1], [0, 0, 1, 1], [], []>} : vector<16x128xbf16>, vector<128x32xbf16>, vector<16x32xf32> -> vector<16x32xf32>
    %193 = vector.extract_strided_slice %14 {offsets = [11, 0], sizes = [1, 32], strides = [1, 1]} : vector<12x32xf32> to vector<1x32xf32>
    %194 = vector.broadcast %193 : vector<1x32xf32> to vector<16x32xf32>
    %195 = arith.addf %192, %194 : vector<16x32xf32>
    %196 = arith.truncf %195 : vector<16x32xf32> to vector<16x32xbf16>
    %197 = vector.shape_cast %196 : vector<16x32xbf16> to vector<2x8x32xbf16>
    "tpu.trace_start"() <{level = 10 : i32, message = "bqd,bkd->bqk"}> : () -> ()
    %cst_93 = arith.constant dense<0.000000e+00> : vector<2x8x8xf32>
    %198 = tpu.matmul %181, %189, %cst_93 {dimension_numbers = #tpu.dot_dimension_numbers<[2], [2], [1], [1], [0, 0, 0, 1, 1, 1], [0], [0]>} : vector<2x8x32xbf16>, vector<2x8x32xbf16>, vector<2x8x8xf32> -> vector<2x8x8xf32>
    "tpu.trace_stop"() : () -> ()
    %cst_94 = arith.constant 0.176776692 : f32
    %199 = vector.broadcast %cst_94 : f32 to vector<2x8x8xf32>
    %200 = arith.mulf %198, %199 : vector<2x8x8xf32>
    %cst_95 = arith.constant dense<0xFF800000> : vector<2x8xf32>
    %201 = vector.multi_reduction <maximumf>, %200, %cst_95 [2] : vector<2x8x8xf32> to vector<2x8xf32>
    %202 = vector.shape_cast %201 : vector<2x8xf32> to vector<2x8x1xf32>
    %203 = vector.broadcast %202 : vector<2x8x1xf32> to vector<2x8x8xf32>
    %204 = arith.subf %200, %203 : vector<2x8x8xf32>
    %205 = math.exp %204 : vector<2x8x8xf32>
    %cst_96 = arith.constant dense<0.000000e+00> : vector<2x8xf32>
    %206 = vector.multi_reduction <add>, %205, %cst_96 [2] : vector<2x8x8xf32> to vector<2x8xf32>
    %207 = vector.shape_cast %206 : vector<2x8xf32> to vector<2x8x1xf32>
    %208 = tpu.reciprocal %207 {approx = true} : vector<2x8x1xf32> -> vector<2x8x1xf32>
    %209 = vector.broadcast %208 : vector<2x8x1xf32> to vector<2x8x8xf32>
    %210 = arith.mulf %205, %209 : vector<2x8x8xf32>
    %211 = arith.truncf %210 : vector<2x8x8xf32> to vector<2x8x8xbf16>
    "tpu.trace_start"() <{level = 10 : i32, message = "bqk,bkd->bqd"}> : () -> ()
    %cst_97 = arith.constant dense<0.000000e+00> : vector<2x8x32xf32>
    %212 = tpu.matmul %211, %197, %cst_97 {dimension_numbers = #tpu.dot_dimension_numbers<[2], [1], [1], [2], [0, 0, 0, 1, 1, 2], [0], [0]>} : vector<2x8x8xbf16>, vector<2x8x32xbf16>, vector<2x8x32xf32> -> vector<2x8x32xf32>
    "tpu.trace_stop"() : () -> ()
    %213 = vector.shape_cast %212 : vector<2x8x32xf32> to vector<16x32xf32>
    %214 = arith.truncf %213 : vector<16x32xf32> to vector<16x32xbf16>
    %c0_98 = arith.constant 0 : index
    %c3_99 = arith.constant 3 : index
    %c0_100 = arith.constant 0 : index
    %c0_101 = arith.constant 0 : index
    %215 = vector.load %arg10[%c0_98, %c3_99, %c0_100, %c0_101] : memref<1x4x32x128xbf16, #tpu.memory_space<vmem>>, vector<1x1x32x128xbf16>
    %216 = vector.shape_cast %215 : vector<1x1x32x128xbf16> to vector<32x128xbf16>
    %cst_102 = arith.constant dense<0.000000e+00> : vector<16x128xf32>
    %217 = tpu.matmul %214, %216, %cst_102 {dimension_numbers = #tpu.dot_dimension_numbers<[1], [0], [0], [1], [0, 0, 1, 1], [], []>} : vector<16x32xbf16>, vector<32x128xbf16>, vector<16x128xf32> -> vector<16x128xf32>
    %218 = arith.addf %173, %217 : vector<16x128xf32>
    %219 = arith.addf %4, %218 : vector<16x128xf32>
    %220 = vector.broadcast %11 : vector<1x128xf32> to vector<16x128xf32>
    %221 = arith.addf %219, %220 : vector<16x128xf32>
    %cst_103 = arith.constant dense<0.000000e+00> : vector<16xf32>
    %222 = vector.multi_reduction <add>, %221, %cst_103 [1] : vector<16x128xf32> to vector<16xf32>
    %223 = vector.shape_cast %222 : vector<16xf32> to vector<16x1xf32>
    %cst_104 = arith.constant 1.280000e+02 : f32
    %224 = vector.broadcast %cst_104 : f32 to vector<16x1xf32>
    %225 = arith.divf %223, %224 : vector<16x1xf32>
    %226 = vector.broadcast %225 : vector<16x1xf32> to vector<16x128xf32>
    %227 = arith.subf %221, %226 : vector<16x128xf32>
    %228 = arith.mulf %227, %227 : vector<16x128xf32>
    %cst_105 = arith.constant dense<0.000000e+00> : vector<16xf32>
    %229 = vector.multi_reduction <add>, %228, %cst_105 [1] : vector<16x128xf32> to vector<16xf32>
    %230 = vector.shape_cast %229 : vector<16xf32> to vector<16x1xf32>
    %cst_106 = arith.constant 1.280000e+02 : f32
    %231 = vector.broadcast %cst_106 : f32 to vector<16x1xf32>
    %232 = arith.divf %230, %231 : vector<16x1xf32>
    %233 = vector.broadcast %225 : vector<16x1xf32> to vector<16x128xf32>
    %234 = arith.subf %221, %233 : vector<16x128xf32>
    %cst_107 = arith.constant 9.99999974E-6 : f32
    %235 = vector.broadcast %cst_107 : f32 to vector<16x1xf32>
    %236 = arith.addf %232, %235 : vector<16x1xf32>
    %237 = math.rsqrt %236 : vector<16x1xf32>
    %238 = vector.broadcast %237 : vector<16x1xf32> to vector<16x128xf32>
    %239 = arith.mulf %234, %238 : vector<16x128xf32>
    %240 = vector.broadcast %9 : vector<1x128xf32> to vector<16x128xf32>
    %241 = arith.mulf %239, %240 : vector<16x128xf32>
    %242 = vector.broadcast %10 : vector<1x128xf32> to vector<16x128xf32>
    %243 = arith.addf %241, %242 : vector<16x128xf32>
    %244 = arith.truncf %243 : vector<16x128xf32> to vector<16x128xbf16>
    %c0_108 = arith.constant 0 : index
    %c0_109 = arith.constant 0 : index
    %c0_110 = arith.constant 0 : index
    %245 = vector.load %arg11[%c0_108, %c0_109, %c0_110] : memref<1x128x512xbf16, #tpu.memory_space<vmem>>, vector<1x128x512xbf16>
    %246 = vector.shape_cast %245 : vector<1x128x512xbf16> to vector<128x512xbf16>
    %cst_111 = arith.constant dense<0.000000e+00> : vector<16x512xf32>
    %247 = tpu.matmul %244, %246, %cst_111 {dimension_numbers = #tpu.dot_dimension_numbers<[1], [0], [0], [1], [0, 0, 1, 1], [], []>} : vector<16x128xbf16>, vector<128x512xbf16>, vector<16x512xf32> -> vector<16x512xf32>
    %c0_112 = arith.constant 0 : index
    %c0_113 = arith.constant 0 : index
    %c0_114 = arith.constant 0 : index
    %248 = vector.load %arg8[%c0_112, %c0_113, %c0_114] : memref<1x1x512xf32, #tpu.memory_space<vmem>>, vector<1x1x512xf32>
    %249 = vector.shape_cast %248 : vector<1x1x512xf32> to vector<1x512xf32>
    %250 = vector.broadcast %249 : vector<1x512xf32> to vector<16x512xf32>
    %251 = arith.addf %247, %250 : vector<16x512xf32>
    %cst_115 = arith.constant 1.702000e+00 : f32
    %252 = vector.broadcast %cst_115 : f32 to vector<16x512xf32>
    %253 = arith.mulf %252, %251 : vector<16x512xf32>
    %254 = arith.negf %253 : vector<16x512xf32>
    %255 = math.exp %254 : vector<16x512xf32>
    %cst_116 = arith.constant 1.000000e+00 : f32
    %256 = vector.broadcast %cst_116 : f32 to vector<16x512xf32>
    %257 = arith.addf %256, %255 : vector<16x512xf32>
    %258 = arith.divf %256, %257 : vector<16x512xf32>
    %259 = arith.mulf %251, %258 : vector<16x512xf32>
    %260 = arith.truncf %259 : vector<16x512xf32> to vector<16x512xbf16>
    %c0_117 = arith.constant 0 : index
    %c0_118 = arith.constant 0 : index
    %c0_119 = arith.constant 0 : index
    %261 = vector.load %arg12[%c0_117, %c0_118, %c0_119] : memref<1x512x128xbf16, #tpu.memory_space<vmem>>, vector<1x512x128xbf16>
    %262 = vector.shape_cast %261 : vector<1x512x128xbf16> to vector<512x128xbf16>
    %cst_120 = arith.constant dense<0.000000e+00> : vector<16x128xf32>
    %263 = tpu.matmul %260, %262, %cst_120 {dimension_numbers = #tpu.dot_dimension_numbers<[1], [0], [0], [1], [0, 0, 1, 1], [], []>} : vector<16x512xbf16>, vector<512x128xbf16>, vector<16x128xf32> -> vector<16x128xf32>
    %264 = vector.broadcast %12 : vector<1x128xf32> to vector<16x128xf32>
    %265 = arith.addf %263, %264 : vector<16x128xf32>
    %266 = arith.addf %221, %265 : vector<16x128xf32>
    %267 = vector.shape_cast %266 : vector<16x128xf32> to vector<2x8x128xf32>
    %c0_121 = arith.constant 0 : index
    %c0_122 = arith.constant 0 : index
    %c0_123 = arith.constant 0 : index
    %268 = vector.load %arg14[%c0_121, %c0_122, %c0_123] : memref<2x8x128xf32, #tpu.memory_space<vmem>>, vector<2x8x128xf32>
    tpu.vector_store %arg14[%c0_121, %c0_122, %c0_123], %267 {strides = array<i32>} : memref<2x8x128xf32, #tpu.memory_space<vmem>>, vector<2x8x128xf32>,
    %c1_i32 = arith.constant 1 : i32
    %269 = arith.cmpi eq, %arg0, %c1_i32 : i32
    %270 = arith.extui %269 : i1 to i32
    %c0_i32_124 = arith.constant 0 : i32
    %271 = arith.cmpi ne, %270, %c0_i32_124 : i32
    scf.if %271 {
      %c0_125 = arith.constant 0 : index
      %c0_126 = arith.constant 0 : index
      %272 = vector.load %arg4[%c0_125, %c0_126] : memref<1x128xf32, #tpu.memory_space<vmem>>, vector<1x128xf32>
      %c0_127 = arith.constant 0 : index
      %c0_128 = arith.constant 0 : index
      %273 = vector.load %arg5[%c0_127, %c0_128] : memref<1x128xf32, #tpu.memory_space<vmem>>, vector<1x128xf32>
      %cst_129 = arith.constant dense<0.000000e+00> : vector<16xf32>
      %274 = vector.multi_reduction <add>, %266, %cst_129 [1] : vector<16x128xf32> to vector<16xf32>
      %275 = vector.shape_cast %274 : vector<16xf32> to vector<16x1xf32>
      %cst_130 = arith.constant 1.280000e+02 : f32
      %276 = vector.broadcast %cst_130 : f32 to vector<16x1xf32>
      %277 = arith.divf %275, %276 : vector<16x1xf32>
      %278 = vector.broadcast %277 : vector<16x1xf32> to vector<16x128xf32>
      %279 = arith.subf %266, %278 : vector<16x128xf32>
      %280 = arith.mulf %279, %279 : vector<16x128xf32>
      %cst_131 = arith.constant dense<0.000000e+00> : vector<16xf32>
      %281 = vector.multi_reduction <add>, %280, %cst_131 [1] : vector<16x128xf32> to vector<16xf32>
      %282 = vector.shape_cast %281 : vector<16xf32> to vector<16x1xf32>
      %cst_132 = arith.constant 1.280000e+02 : f32
      %283 = vector.broadcast %cst_132 : f32 to vector<16x1xf32>
      %284 = arith.divf %282, %283 : vector<16x1xf32>
      %285 = vector.broadcast %277 : vector<16x1xf32> to vector<16x128xf32>
      %286 = arith.subf %266, %285 : vector<16x128xf32>
      %cst_133 = arith.constant 9.99999974E-6 : f32
      %287 = vector.broadcast %cst_133 : f32 to vector<16x1xf32>
      %288 = arith.addf %284, %287 : vector<16x1xf32>
      %289 = math.rsqrt %288 : vector<16x1xf32>
      %290 = vector.broadcast %289 : vector<16x1xf32> to vector<16x128xf32>
      %291 = arith.mulf %286, %290 : vector<16x128xf32>
      %292 = vector.broadcast %272 : vector<1x128xf32> to vector<16x128xf32>
      %293 = arith.mulf %291, %292 : vector<16x128xf32>
      %294 = vector.broadcast %273 : vector<1x128xf32> to vector<16x128xf32>
      %295 = arith.addf %293, %294 : vector<16x128xf32>
      %296 = vector.shape_cast %295 : vector<16x128xf32> to vector<2x8x128xf32>
      %c0_134 = arith.constant 0 : index
      %c0_135 = arith.constant 0 : index
      %c0_136 = arith.constant 0 : index
      %297 = vector.load %arg13[%c0_134, %c0_135, %c0_136] : memref<2x8x128xf32, #tpu.memory_space<vmem>>, vector<2x8x128xf32>
      tpu.vector_store %arg13[%c0_134, %c0_135, %c0_136], %296 {strides = array<i32>} : memref<2x8x128xf32, #tpu.memory_space<vmem>>, vector<2x8x128xf32>,
    } else {
    }
    return
  }
  func.func @transform_1(%arg0: i32) -> (i32, i32) {
    %c0_i32 = arith.constant 0 : i32
    %c0_i32_0 = arith.constant 0 : i32
    %c0_i32_1 = arith.constant 0 : i32
    return %c0_i32, %c0_i32_0 : i32, i32
  }
  func.func @transform_2(%arg0: i32) -> (i32, i32) {
    %c0_i32 = arith.constant 0 : i32
    %c0_i32_0 = arith.constant 0 : i32
    %c0_i32_1 = arith.constant 0 : i32
    return %c0_i32, %c0_i32_0 : i32, i32
  }
  func.func @transform_3(%arg0: i32) -> (i32, i32) {
    %c0_i32 = arith.constant 0 : i32
    %c0_i32_0 = arith.constant 0 : i32
    %c0_i32_1 = arith.constant 0 : i32
    return %c0_i32, %c0_i32_0 : i32, i32
  }
  func.func @transform_4(%arg0: i32) -> (i32, i32) {
    %c0_i32 = arith.constant 0 : i32
    %c0_i32_0 = arith.constant 0 : i32
    %c0_i32_1 = arith.constant 0 : i32
    return %c0_i32, %c0_i32_0 : i32, i32
  }
  func.func @transform_5(%arg0: i32) -> (i32, i32, i32) {
    %c0_i32 = arith.constant 0 : i32
    %c0_i32_0 = arith.constant 0 : i32
    %c0_i32_1 = arith.constant 0 : i32
    return %arg0, %c0_i32, %c0_i32_0 : i32, i32, i32
  }
  func.func @transform_6(%arg0: i32) -> (i32, i32, i32) {
    %c0_i32 = arith.constant 0 : i32
    %c0_i32_0 = arith.constant 0 : i32
    %c0_i32_1 = arith.constant 0 : i32
    return %arg0, %c0_i32, %c0_i32_0 : i32, i32, i32
  }
  func.func @transform_7(%arg0: i32) -> (i32, i32, i32) {
    %c0_i32 = arith.constant 0 : i32
    %c0_i32_0 = arith.constant 0 : i32
    %c0_i32_1 = arith.constant 0 : i32
    return %arg0, %c0_i32, %c0_i32_0 : i32, i32, i32
  }
  func.func @transform_8(%arg0: i32) -> (i32, i32, i32, i32) {
    %c0_i32 = arith.constant 0 : i32
    %c0_i32_0 = arith.constant 0 : i32
    %c0_i32_1 = arith.constant 0 : i32
    %c0_i32_2 = arith.constant 0 : i32
    return %arg0, %c0_i32, %c0_i32_0, %c0_i32_1 : i32, i32, i32, i32
  }
  func.func @transform_9(%arg0: i32) -> (i32, i32, i32, i32) {
    %c0_i32 = arith.constant 0 : i32
    %c0_i32_0 = arith.constant 0 : i32
    %c0_i32_1 = arith.constant 0 : i32
    %c0_i32_2 = arith.constant 0 : i32
    return %arg0, %c0_i32, %c0_i32_0, %c0_i32_1 : i32, i32, i32, i32
  }
  func.func @transform_10(%arg0: i32) -> (i32, i32, i32) {
    %c0_i32 = arith.constant 0 : i32
    %c0_i32_0 = arith.constant 0 : i32
    %c0_i32_1 = arith.constant 0 : i32
    return %arg0, %c0_i32, %c0_i32_0 : i32, i32, i32
  }
  func.func @transform_11(%arg0: i32) -> (i32, i32, i32) {
    %c0_i32 = arith.constant 0 : i32
    %c0_i32_0 = arith.constant 0 : i32
    %c0_i32_1 = arith.constant 0 : i32
    return %arg0, %c0_i32, %c0_i32_0 : i32, i32, i32
  }
  func.func @transform_12(%arg0: i32) -> (i32, i32, i32) {
    %c0_i32 = arith.constant 0 : i32
    %c0_i32_0 = arith.constant 0 : i32
    %c0_i32_1 = arith.constant 0 : i32
    %c0_i32_2 = arith.constant 0 : i32
    return %c0_i32, %c0_i32_0, %c0_i32_1 : i32, i32, i32
  }
}

module attributes {stable_mosaic.version = 11 : i64} {
  func.func @_encoder_stack_kernel(%arg0: i32, %arg1: memref<4x8x128xf32, #tpu.memory_space<any>>, %arg2: memref<128x128xbf16, #tpu.memory_space<vmem>>, %arg3: memref<1x128xf32, #tpu.memory_space<vmem>>, %arg4: memref<1x128xf32, #tpu.memory_space<vmem>>, %arg5: memref<1x128xf32, #tpu.memory_space<vmem>>, %arg6: memref<1x8x128xf32, #tpu.memory_space<vmem>>, %arg7: memref<1x12x32xf32, #tpu.memory_space<vmem>>, %arg8: memref<1x1x512xf32, #tpu.memory_space<vmem>>, %arg9: memref<1x12x128x32xbf16, #tpu.memory_space<vmem>>, %arg10: memref<1x4x32x128xbf16, #tpu.memory_space<vmem>>, %arg11: memref<1x128x512xbf16, #tpu.memory_space<vmem>>, %arg12: memref<1x512x128xbf16, #tpu.memory_space<vmem>>, %arg13: memref<4x128xf32, #tpu.memory_space<vmem>>, %arg14: memref<4x8x128xf32, #tpu.memory_space<vmem>>, %arg15: memref<!tpu.dma_semaphore, #tpu.memory_space<semaphore_mem>>) attributes {dimension_semantics = [#tpu.dimension_semantics<arbitrary>], iteration_bounds = array<i64: 2>, scalar_prefetch = 0 : i64, scratch_operands = 2 : i64, tpu.core_type = #tpu.core_type<tc>, window_params = [{}, {pipeline_mode = #tpu.pipeline_mode<synchronous>, transform_indices = @transform_1, window_bounds = array<i64: 128, 128>}, {pipeline_mode = #tpu.pipeline_mode<synchronous>, transform_indices = @transform_2, window_bounds = array<i64: 1, 128>}, {pipeline_mode = #tpu.pipeline_mode<synchronous>, transform_indices = @transform_3, window_bounds = array<i64: 1, 128>}, {pipeline_mode = #tpu.pipeline_mode<synchronous>, transform_indices = @transform_4, window_bounds = array<i64: 1, 128>}, {transform_indices = @transform_5, window_bounds = array<i64: 1, 8, 128>}, {transform_indices = @transform_6, window_bounds = array<i64: 1, 12, 32>}, {transform_indices = @transform_7, window_bounds = array<i64: 1, 1, 512>}, {transform_indices = @transform_8, window_bounds = array<i64: 1, 12, 128, 32>}, {transform_indices = @transform_9, window_bounds = array<i64: 1, 4, 32, 128>}, {transform_indices = @transform_10, window_bounds = array<i64: 1, 128, 512>}, {transform_indices = @transform_11, window_bounds = array<i64: 1, 512, 128>}, {pipeline_mode = #tpu.pipeline_mode<synchronous>, transform_indices = @transform_12, window_bounds = array<i64: 4, 128>}]} {
    %c0_i32 = arith.constant 0 : i32
    %0 = arith.cmpi eq, %arg0, %c0_i32 : i32
    %1 = arith.extui %0 : i1 to i32
    %c0_i32_0 = arith.constant 0 : i32
    %2 = arith.cmpi ne, %1, %c0_i32_0 : i32
    scf.if %2 {
      tpu.enqueue_dma source(%arg1 : memref<4x8x128xf32, #tpu.memory_space<any>>) target(%arg14 : memref<4x8x128xf32, #tpu.memory_space<vmem>>) target_semaphore(%arg15 : memref<!tpu.dma_semaphore, #tpu.memory_space<semaphore_mem>>)
      tpu.wait_dma2 semaphore(%arg15 : memref<!tpu.dma_semaphore, #tpu.memory_space<semaphore_mem>>) src(%arg1 : memref<4x8x128xf32, #tpu.memory_space<any>>) dst(%arg14 : memref<4x8x128xf32, #tpu.memory_space<vmem>>)
    } else {
    }
    %c0 = arith.constant 0 : index
    %c0_1 = arith.constant 0 : index
    %c0_2 = arith.constant 0 : index
    %3 = vector.load %arg14[%c0, %c0_1, %c0_2] : memref<4x8x128xf32, #tpu.memory_space<vmem>>, vector<4x8x128xf32>
    %4 = vector.shape_cast %3 : vector<4x8x128xf32> to vector<32x128xf32>
    %c0_3 = arith.constant 0 : index
    %c0_4 = arith.constant 0 : index
    %c0_5 = arith.constant 0 : index
    %5 = vector.load %arg6[%c0_3, %c0_4, %c0_5] : memref<1x8x128xf32, #tpu.memory_space<vmem>>, vector<1x8x128xf32>
    %6 = vector.shape_cast %5 : vector<1x8x128xf32> to vector<8x128xf32>
    %7 = vector.extract_strided_slice %6 {offsets = [0, 0], sizes = [1, 128], strides = [1, 1]} : vector<8x128xf32> to vector<1x128xf32>
    %8 = vector.extract_strided_slice %6 {offsets = [1, 0], sizes = [1, 128], strides = [1, 1]} : vector<8x128xf32> to vector<1x128xf32>
    %9 = vector.extract_strided_slice %6 {offsets = [2, 0], sizes = [1, 128], strides = [1, 1]} : vector<8x128xf32> to vector<1x128xf32>
    %10 = vector.extract_strided_slice %6 {offsets = [3, 0], sizes = [1, 128], strides = [1, 1]} : vector<8x128xf32> to vector<1x128xf32>
    %11 = vector.extract_strided_slice %6 {offsets = [4, 0], sizes = [1, 128], strides = [1, 1]} : vector<8x128xf32> to vector<1x128xf32>
    %12 = vector.extract_strided_slice %6 {offsets = [5, 0], sizes = [1, 128], strides = [1, 1]} : vector<8x128xf32> to vector<1x128xf32>
    %c0_6 = arith.constant 0 : index
    %c0_7 = arith.constant 0 : index
    %c0_8 = arith.constant 0 : index
    %13 = vector.load %arg7[%c0_6, %c0_7, %c0_8] : memref<1x12x32xf32, #tpu.memory_space<vmem>>, vector<1x12x32xf32>
    %14 = vector.shape_cast %13 : vector<1x12x32xf32> to vector<12x32xf32>
    %cst = arith.constant dense<0.000000e+00> : vector<32xf32>
    %15 = vector.multi_reduction <add>, %4, %cst [1] : vector<32x128xf32> to vector<32xf32>
    %16 = vector.shape_cast %15 : vector<32xf32> to vector<32x1xf32>
    %cst_9 = arith.constant 1.280000e+02 : f32
    %17 = vector.broadcast %cst_9 : f32 to vector<32x1xf32>
    %18 = arith.divf %16, %17 : vector<32x1xf32>
    %19 = vector.broadcast %18 : vector<32x1xf32> to vector<32x128xf32>
    %20 = arith.subf %4, %19 : vector<32x128xf32>
    %21 = arith.mulf %20, %20 : vector<32x128xf32>
    %cst_10 = arith.constant dense<0.000000e+00> : vector<32xf32>
    %22 = vector.multi_reduction <add>, %21, %cst_10 [1] : vector<32x128xf32> to vector<32xf32>
    %23 = vector.shape_cast %22 : vector<32xf32> to vector<32x1xf32>
    %cst_11 = arith.constant 1.280000e+02 : f32
    %24 = vector.broadcast %cst_11 : f32 to vector<32x1xf32>
    %25 = arith.divf %23, %24 : vector<32x1xf32>
    %26 = vector.broadcast %18 : vector<32x1xf32> to vector<32x128xf32>
    %27 = arith.subf %4, %26 : vector<32x128xf32>
    %cst_12 = arith.constant 9.99999974E-6 : f32
    %28 = vector.broadcast %cst_12 : f32 to vector<32x1xf32>
    %29 = arith.addf %25, %28 : vector<32x1xf32>
    %30 = math.rsqrt %29 : vector<32x1xf32>
    %31 = vector.broadcast %30 : vector<32x1xf32> to vector<32x128xf32>
    %32 = arith.mulf %27, %31 : vector<32x128xf32>
    %33 = vector.broadcast %7 : vector<1x128xf32> to vector<32x128xf32>
    %34 = arith.mulf %32, %33 : vector<32x128xf32>
    %35 = vector.broadcast %8 : vector<1x128xf32> to vector<32x128xf32>
    %36 = arith.addf %34, %35 : vector<32x128xf32>
    %37 = arith.truncf %36 : vector<32x128xf32> to vector<32x128xbf16>
    %cst_13 = arith.constant 0.000000e+00 : f32
    %38 = vector.broadcast %cst_13 : f32 to vector<32x128xf32>
    %c0_14 = arith.constant 0 : index
    %c0_15 = arith.constant 0 : index
    %c0_16 = arith.constant 0 : index
    %c0_17 = arith.constant 0 : index
    %39 = vector.load %arg9[%c0_14, %c0_15, %c0_16, %c0_17] : memref<1x12x128x32xbf16, #tpu.memory_space<vmem>>, vector<1x1x128x32xbf16>
    %40 = vector.shape_cast %39 : vector<1x1x128x32xbf16> to vector<128x32xbf16>
    %cst_18 = arith.constant dense<0.000000e+00> : vector<32x32xf32>
    %41 = tpu.matmul %37, %40, %cst_18 {dimension_numbers = #tpu.dot_dimension_numbers<[1], [0], [0], [1], [0, 0, 1, 1], [], []>} : vector<32x128xbf16>, vector<128x32xbf16>, vector<32x32xf32> -> vector<32x32xf32>
    %42 = vector.extract_strided_slice %14 {offsets = [0, 0], sizes = [1, 32], strides = [1, 1]} : vector<12x32xf32> to vector<1x32xf32>
    %43 = vector.broadcast %42 : vector<1x32xf32> to vector<32x32xf32>
    %44 = arith.addf %41, %43 : vector<32x32xf32>
    %45 = arith.truncf %44 : vector<32x32xf32> to vector<32x32xbf16>
    %46 = vector.shape_cast %45 : vector<32x32xbf16> to vector<4x8x32xbf16>
    %c0_19 = arith.constant 0 : index
    %c4 = arith.constant 4 : index
    %c0_20 = arith.constant 0 : index
    %c0_21 = arith.constant 0 : index
    %47 = vector.load %arg9[%c0_19, %c4, %c0_20, %c0_21] : memref<1x12x128x32xbf16, #tpu.memory_space<vmem>>, vector<1x1x128x32xbf16>
    %48 = vector.shape_cast %47 : vector<1x1x128x32xbf16> to vector<128x32xbf16>
    %cst_22 = arith.constant dense<0.000000e+00> : vector<32x32xf32>
    %49 = tpu.matmul %37, %48, %cst_22 {dimension_numbers = #tpu.dot_dimension_numbers<[1], [0], [0], [1], [0, 0, 1, 1], [], []>} : vector<32x128xbf16>, vector<128x32xbf16>, vector<32x32xf32> -> vector<32x32xf32>
    %50 = vector.extract_strided_slice %14 {offsets = [4, 0], sizes = [1, 32], strides = [1, 1]} : vector<12x32xf32> to vector<1x32xf32>
    %51 = vector.broadcast %50 : vector<1x32xf32> to vector<32x32xf32>
    %52 = arith.addf %49, %51 : vector<32x32xf32>
    %53 = arith.truncf %52 : vector<32x32xf32> to vector<32x32xbf16>
    %54 = vector.shape_cast %53 : vector<32x32xbf16> to vector<4x8x32xbf16>
    %c0_23 = arith.constant 0 : index
    %c8 = arith.constant 8 : index
    %c0_24 = arith.constant 0 : index
    %c0_25 = arith.constant 0 : index
    %55 = vector.load %arg9[%c0_23, %c8, %c0_24, %c0_25] : memref<1x12x128x32xbf16, #tpu.memory_space<vmem>>, vector<1x1x128x32xbf16>
    %56 = vector.shape_cast %55 : vector<1x1x128x32xbf16> to vector<128x32xbf16>
    %cst_26 = arith.constant dense<0.000000e+00> : vector<32x32xf32>
    %57 = tpu.matmul %37, %56, %cst_26 {dimension_numbers = #tpu.dot_dimension_numbers<[1], [0], [0], [1], [0, 0, 1, 1], [], []>} : vector<32x128xbf16>, vector<128x32xbf16>, vector<32x32xf32> -> vector<32x32xf32>
    %58 = vector.extract_strided_slice %14 {offsets = [8, 0], sizes = [1, 32], strides = [1, 1]} : vector<12x32xf32> to vector<1x32xf32>
    %59 = vector.broadcast %58 : vector<1x32xf32> to vector<32x32xf32>
    %60 = arith.addf %57, %59 : vector<32x32xf32>
    %61 = arith.truncf %60 : vector<32x32xf32> to vector<32x32xbf16>
    %62 = vector.shape_cast %61 : vector<32x32xbf16> to vector<4x8x32xbf16>
    "tpu.trace_start"() <{level = 10 : i32, message = "bqd,bkd->bqk"}> : () -> ()
    %cst_27 = arith.constant dense<0.000000e+00> : vector<4x8x8xf32>
    %63 = tpu.matmul %46, %54, %cst_27 {dimension_numbers = #tpu.dot_dimension_numbers<[2], [2], [1], [1], [0, 0, 0, 1, 1, 1], [0], [0]>} : vector<4x8x32xbf16>, vector<4x8x32xbf16>, vector<4x8x8xf32> -> vector<4x8x8xf32>
    "tpu.trace_stop"() : () -> ()
    %cst_28 = arith.constant 0.176776692 : f32
    %64 = vector.broadcast %cst_28 : f32 to vector<4x8x8xf32>
    %65 = arith.mulf %63, %64 : vector<4x8x8xf32>
    %cst_29 = arith.constant dense<0xFF800000> : vector<4x8xf32>
    %66 = vector.multi_reduction <maximumf>, %65, %cst_29 [2] : vector<4x8x8xf32> to vector<4x8xf32>
    %67 = vector.shape_cast %66 : vector<4x8xf32> to vector<4x8x1xf32>
    %68 = vector.broadcast %67 : vector<4x8x1xf32> to vector<4x8x8xf32>
    %69 = arith.subf %65, %68 : vector<4x8x8xf32>
    %70 = math.exp %69 : vector<4x8x8xf32>
    %cst_30 = arith.constant dense<0.000000e+00> : vector<4x8xf32>
    %71 = vector.multi_reduction <add>, %70, %cst_30 [2] : vector<4x8x8xf32> to vector<4x8xf32>
    %72 = vector.shape_cast %71 : vector<4x8xf32> to vector<4x8x1xf32>
    %73 = tpu.reciprocal %72 {approx = true} : vector<4x8x1xf32> -> vector<4x8x1xf32>
    %74 = vector.broadcast %73 : vector<4x8x1xf32> to vector<4x8x8xf32>
    %75 = arith.mulf %70, %74 : vector<4x8x8xf32>
    %76 = arith.truncf %75 : vector<4x8x8xf32> to vector<4x8x8xbf16>
    "tpu.trace_start"() <{level = 10 : i32, message = "bqk,bkd->bqd"}> : () -> ()
    %cst_31 = arith.constant dense<0.000000e+00> : vector<4x8x32xf32>
    %77 = tpu.matmul %76, %62, %cst_31 {dimension_numbers = #tpu.dot_dimension_numbers<[2], [1], [1], [2], [0, 0, 0, 1, 1, 2], [0], [0]>} : vector<4x8x8xbf16>, vector<4x8x32xbf16>, vector<4x8x32xf32> -> vector<4x8x32xf32>
    "tpu.trace_stop"() : () -> ()
    %78 = vector.shape_cast %77 : vector<4x8x32xf32> to vector<32x32xf32>
    %79 = arith.truncf %78 : vector<32x32xf32> to vector<32x32xbf16>
    %c0_32 = arith.constant 0 : index
    %c0_33 = arith.constant 0 : index
    %c0_34 = arith.constant 0 : index
    %c0_35 = arith.constant 0 : index
    %80 = vector.load %arg10[%c0_32, %c0_33, %c0_34, %c0_35] : memref<1x4x32x128xbf16, #tpu.memory_space<vmem>>, vector<1x1x32x128xbf16>
    %81 = vector.shape_cast %80 : vector<1x1x32x128xbf16> to vector<32x128xbf16>
    %cst_36 = arith.constant dense<0.000000e+00> : vector<32x128xf32>
    %82 = tpu.matmul %79, %81, %cst_36 {dimension_numbers = #tpu.dot_dimension_numbers<[1], [0], [0], [1], [0, 0, 1, 1], [], []>} : vector<32x32xbf16>, vector<32x128xbf16>, vector<32x128xf32> -> vector<32x128xf32>
    %83 = arith.addf %38, %82 : vector<32x128xf32>
    %c0_37 = arith.constant 0 : index
    %c1 = arith.constant 1 : index
    %c0_38 = arith.constant 0 : index
    %c0_39 = arith.constant 0 : index
    %84 = vector.load %arg9[%c0_37, %c1, %c0_38, %c0_39] : memref<1x12x128x32xbf16, #tpu.memory_space<vmem>>, vector<1x1x128x32xbf16>
    %85 = vector.shape_cast %84 : vector<1x1x128x32xbf16> to vector<128x32xbf16>
    %cst_40 = arith.constant dense<0.000000e+00> : vector<32x32xf32>
    %86 = tpu.matmul %37, %85, %cst_40 {dimension_numbers = #tpu.dot_dimension_numbers<[1], [0], [0], [1], [0, 0, 1, 1], [], []>} : vector<32x128xbf16>, vector<128x32xbf16>, vector<32x32xf32> -> vector<32x32xf32>
    %87 = vector.extract_strided_slice %14 {offsets = [1, 0], sizes = [1, 32], strides = [1, 1]} : vector<12x32xf32> to vector<1x32xf32>
    %88 = vector.broadcast %87 : vector<1x32xf32> to vector<32x32xf32>
    %89 = arith.addf %86, %88 : vector<32x32xf32>
    %90 = arith.truncf %89 : vector<32x32xf32> to vector<32x32xbf16>
    %91 = vector.shape_cast %90 : vector<32x32xbf16> to vector<4x8x32xbf16>
    %c0_41 = arith.constant 0 : index
    %c5 = arith.constant 5 : index
    %c0_42 = arith.constant 0 : index
    %c0_43 = arith.constant 0 : index
    %92 = vector.load %arg9[%c0_41, %c5, %c0_42, %c0_43] : memref<1x12x128x32xbf16, #tpu.memory_space<vmem>>, vector<1x1x128x32xbf16>
    %93 = vector.shape_cast %92 : vector<1x1x128x32xbf16> to vector<128x32xbf16>
    %cst_44 = arith.constant dense<0.000000e+00> : vector<32x32xf32>
    %94 = tpu.matmul %37, %93, %cst_44 {dimension_numbers = #tpu.dot_dimension_numbers<[1], [0], [0], [1], [0, 0, 1, 1], [], []>} : vector<32x128xbf16>, vector<128x32xbf16>, vector<32x32xf32> -> vector<32x32xf32>
    %95 = vector.extract_strided_slice %14 {offsets = [5, 0], sizes = [1, 32], strides = [1, 1]} : vector<12x32xf32> to vector<1x32xf32>
    %96 = vector.broadcast %95 : vector<1x32xf32> to vector<32x32xf32>
    %97 = arith.addf %94, %96 : vector<32x32xf32>
    %98 = arith.truncf %97 : vector<32x32xf32> to vector<32x32xbf16>
    %99 = vector.shape_cast %98 : vector<32x32xbf16> to vector<4x8x32xbf16>
    %c0_45 = arith.constant 0 : index
    %c9 = arith.constant 9 : index
    %c0_46 = arith.constant 0 : index
    %c0_47 = arith.constant 0 : index
    %100 = vector.load %arg9[%c0_45, %c9, %c0_46, %c0_47] : memref<1x12x128x32xbf16, #tpu.memory_space<vmem>>, vector<1x1x128x32xbf16>
    %101 = vector.shape_cast %100 : vector<1x1x128x32xbf16> to vector<128x32xbf16>
    %cst_48 = arith.constant dense<0.000000e+00> : vector<32x32xf32>
    %102 = tpu.matmul %37, %101, %cst_48 {dimension_numbers = #tpu.dot_dimension_numbers<[1], [0], [0], [1], [0, 0, 1, 1], [], []>} : vector<32x128xbf16>, vector<128x32xbf16>, vector<32x32xf32> -> vector<32x32xf32>
    %103 = vector.extract_strided_slice %14 {offsets = [9, 0], sizes = [1, 32], strides = [1, 1]} : vector<12x32xf32> to vector<1x32xf32>
    %104 = vector.broadcast %103 : vector<1x32xf32> to vector<32x32xf32>
    %105 = arith.addf %102, %104 : vector<32x32xf32>
    %106 = arith.truncf %105 : vector<32x32xf32> to vector<32x32xbf16>
    %107 = vector.shape_cast %106 : vector<32x32xbf16> to vector<4x8x32xbf16>
    "tpu.trace_start"() <{level = 10 : i32, message = "bqd,bkd->bqk"}> : () -> ()
    %cst_49 = arith.constant dense<0.000000e+00> : vector<4x8x8xf32>
    %108 = tpu.matmul %91, %99, %cst_49 {dimension_numbers = #tpu.dot_dimension_numbers<[2], [2], [1], [1], [0, 0, 0, 1, 1, 1], [0], [0]>} : vector<4x8x32xbf16>, vector<4x8x32xbf16>, vector<4x8x8xf32> -> vector<4x8x8xf32>
    "tpu.trace_stop"() : () -> ()
    %cst_50 = arith.constant 0.176776692 : f32
    %109 = vector.broadcast %cst_50 : f32 to vector<4x8x8xf32>
    %110 = arith.mulf %108, %109 : vector<4x8x8xf32>
    %cst_51 = arith.constant dense<0xFF800000> : vector<4x8xf32>
    %111 = vector.multi_reduction <maximumf>, %110, %cst_51 [2] : vector<4x8x8xf32> to vector<4x8xf32>
    %112 = vector.shape_cast %111 : vector<4x8xf32> to vector<4x8x1xf32>
    %113 = vector.broadcast %112 : vector<4x8x1xf32> to vector<4x8x8xf32>
    %114 = arith.subf %110, %113 : vector<4x8x8xf32>
    %115 = math.exp %114 : vector<4x8x8xf32>
    %cst_52 = arith.constant dense<0.000000e+00> : vector<4x8xf32>
    %116 = vector.multi_reduction <add>, %115, %cst_52 [2] : vector<4x8x8xf32> to vector<4x8xf32>
    %117 = vector.shape_cast %116 : vector<4x8xf32> to vector<4x8x1xf32>
    %118 = tpu.reciprocal %117 {approx = true} : vector<4x8x1xf32> -> vector<4x8x1xf32>
    %119 = vector.broadcast %118 : vector<4x8x1xf32> to vector<4x8x8xf32>
    %120 = arith.mulf %115, %119 : vector<4x8x8xf32>
    %121 = arith.truncf %120 : vector<4x8x8xf32> to vector<4x8x8xbf16>
    "tpu.trace_start"() <{level = 10 : i32, message = "bqk,bkd->bqd"}> : () -> ()
    %cst_53 = arith.constant dense<0.000000e+00> : vector<4x8x32xf32>
    %122 = tpu.matmul %121, %107, %cst_53 {dimension_numbers = #tpu.dot_dimension_numbers<[2], [1], [1], [2], [0, 0, 0, 1, 1, 2], [0], [0]>} : vector<4x8x8xbf16>, vector<4x8x32xbf16>, vector<4x8x32xf32> -> vector<4x8x32xf32>
    "tpu.trace_stop"() : () -> ()
    %123 = vector.shape_cast %122 : vector<4x8x32xf32> to vector<32x32xf32>
    %124 = arith.truncf %123 : vector<32x32xf32> to vector<32x32xbf16>
    %c0_54 = arith.constant 0 : index
    %c1_55 = arith.constant 1 : index
    %c0_56 = arith.constant 0 : index
    %c0_57 = arith.constant 0 : index
    %125 = vector.load %arg10[%c0_54, %c1_55, %c0_56, %c0_57] : memref<1x4x32x128xbf16, #tpu.memory_space<vmem>>, vector<1x1x32x128xbf16>
    %126 = vector.shape_cast %125 : vector<1x1x32x128xbf16> to vector<32x128xbf16>
    %cst_58 = arith.constant dense<0.000000e+00> : vector<32x128xf32>
    %127 = tpu.matmul %124, %126, %cst_58 {dimension_numbers = #tpu.dot_dimension_numbers<[1], [0], [0], [1], [0, 0, 1, 1], [], []>} : vector<32x32xbf16>, vector<32x128xbf16>, vector<32x128xf32> -> vector<32x128xf32>
    %128 = arith.addf %83, %127 : vector<32x128xf32>
    %c0_59 = arith.constant 0 : index
    %c2 = arith.constant 2 : index
    %c0_60 = arith.constant 0 : index
    %c0_61 = arith.constant 0 : index
    %129 = vector.load %arg9[%c0_59, %c2, %c0_60, %c0_61] : memref<1x12x128x32xbf16, #tpu.memory_space<vmem>>, vector<1x1x128x32xbf16>
    %130 = vector.shape_cast %129 : vector<1x1x128x32xbf16> to vector<128x32xbf16>
    %cst_62 = arith.constant dense<0.000000e+00> : vector<32x32xf32>
    %131 = tpu.matmul %37, %130, %cst_62 {dimension_numbers = #tpu.dot_dimension_numbers<[1], [0], [0], [1], [0, 0, 1, 1], [], []>} : vector<32x128xbf16>, vector<128x32xbf16>, vector<32x32xf32> -> vector<32x32xf32>
    %132 = vector.extract_strided_slice %14 {offsets = [2, 0], sizes = [1, 32], strides = [1, 1]} : vector<12x32xf32> to vector<1x32xf32>
    %133 = vector.broadcast %132 : vector<1x32xf32> to vector<32x32xf32>
    %134 = arith.addf %131, %133 : vector<32x32xf32>
    %135 = arith.truncf %134 : vector<32x32xf32> to vector<32x32xbf16>
    %136 = vector.shape_cast %135 : vector<32x32xbf16> to vector<4x8x32xbf16>
    %c0_63 = arith.constant 0 : index
    %c6 = arith.constant 6 : index
    %c0_64 = arith.constant 0 : index
    %c0_65 = arith.constant 0 : index
    %137 = vector.load %arg9[%c0_63, %c6, %c0_64, %c0_65] : memref<1x12x128x32xbf16, #tpu.memory_space<vmem>>, vector<1x1x128x32xbf16>
    %138 = vector.shape_cast %137 : vector<1x1x128x32xbf16> to vector<128x32xbf16>
    %cst_66 = arith.constant dense<0.000000e+00> : vector<32x32xf32>
    %139 = tpu.matmul %37, %138, %cst_66 {dimension_numbers = #tpu.dot_dimension_numbers<[1], [0], [0], [1], [0, 0, 1, 1], [], []>} : vector<32x128xbf16>, vector<128x32xbf16>, vector<32x32xf32> -> vector<32x32xf32>
    %140 = vector.extract_strided_slice %14 {offsets = [6, 0], sizes = [1, 32], strides = [1, 1]} : vector<12x32xf32> to vector<1x32xf32>
    %141 = vector.broadcast %140 : vector<1x32xf32> to vector<32x32xf32>
    %142 = arith.addf %139, %141 : vector<32x32xf32>
    %143 = arith.truncf %142 : vector<32x32xf32> to vector<32x32xbf16>
    %144 = vector.shape_cast %143 : vector<32x32xbf16> to vector<4x8x32xbf16>
    %c0_67 = arith.constant 0 : index
    %c10 = arith.constant 10 : index
    %c0_68 = arith.constant 0 : index
    %c0_69 = arith.constant 0 : index
    %145 = vector.load %arg9[%c0_67, %c10, %c0_68, %c0_69] : memref<1x12x128x32xbf16, #tpu.memory_space<vmem>>, vector<1x1x128x32xbf16>
    %146 = vector.shape_cast %145 : vector<1x1x128x32xbf16> to vector<128x32xbf16>
    %cst_70 = arith.constant dense<0.000000e+00> : vector<32x32xf32>
    %147 = tpu.matmul %37, %146, %cst_70 {dimension_numbers = #tpu.dot_dimension_numbers<[1], [0], [0], [1], [0, 0, 1, 1], [], []>} : vector<32x128xbf16>, vector<128x32xbf16>, vector<32x32xf32> -> vector<32x32xf32>
    %148 = vector.extract_strided_slice %14 {offsets = [10, 0], sizes = [1, 32], strides = [1, 1]} : vector<12x32xf32> to vector<1x32xf32>
    %149 = vector.broadcast %148 : vector<1x32xf32> to vector<32x32xf32>
    %150 = arith.addf %147, %149 : vector<32x32xf32>
    %151 = arith.truncf %150 : vector<32x32xf32> to vector<32x32xbf16>
    %152 = vector.shape_cast %151 : vector<32x32xbf16> to vector<4x8x32xbf16>
    "tpu.trace_start"() <{level = 10 : i32, message = "bqd,bkd->bqk"}> : () -> ()
    %cst_71 = arith.constant dense<0.000000e+00> : vector<4x8x8xf32>
    %153 = tpu.matmul %136, %144, %cst_71 {dimension_numbers = #tpu.dot_dimension_numbers<[2], [2], [1], [1], [0, 0, 0, 1, 1, 1], [0], [0]>} : vector<4x8x32xbf16>, vector<4x8x32xbf16>, vector<4x8x8xf32> -> vector<4x8x8xf32>
    "tpu.trace_stop"() : () -> ()
    %cst_72 = arith.constant 0.176776692 : f32
    %154 = vector.broadcast %cst_72 : f32 to vector<4x8x8xf32>
    %155 = arith.mulf %153, %154 : vector<4x8x8xf32>
    %cst_73 = arith.constant dense<0xFF800000> : vector<4x8xf32>
    %156 = vector.multi_reduction <maximumf>, %155, %cst_73 [2] : vector<4x8x8xf32> to vector<4x8xf32>
    %157 = vector.shape_cast %156 : vector<4x8xf32> to vector<4x8x1xf32>
    %158 = vector.broadcast %157 : vector<4x8x1xf32> to vector<4x8x8xf32>
    %159 = arith.subf %155, %158 : vector<4x8x8xf32>
    %160 = math.exp %159 : vector<4x8x8xf32>
    %cst_74 = arith.constant dense<0.000000e+00> : vector<4x8xf32>
    %161 = vector.multi_reduction <add>, %160, %cst_74 [2] : vector<4x8x8xf32> to vector<4x8xf32>
    %162 = vector.shape_cast %161 : vector<4x8xf32> to vector<4x8x1xf32>
    %163 = tpu.reciprocal %162 {approx = true} : vector<4x8x1xf32> -> vector<4x8x1xf32>
    %164 = vector.broadcast %163 : vector<4x8x1xf32> to vector<4x8x8xf32>
    %165 = arith.mulf %160, %164 : vector<4x8x8xf32>
    %166 = arith.truncf %165 : vector<4x8x8xf32> to vector<4x8x8xbf16>
    "tpu.trace_start"() <{level = 10 : i32, message = "bqk,bkd->bqd"}> : () -> ()
    %cst_75 = arith.constant dense<0.000000e+00> : vector<4x8x32xf32>
    %167 = tpu.matmul %166, %152, %cst_75 {dimension_numbers = #tpu.dot_dimension_numbers<[2], [1], [1], [2], [0, 0, 0, 1, 1, 2], [0], [0]>} : vector<4x8x8xbf16>, vector<4x8x32xbf16>, vector<4x8x32xf32> -> vector<4x8x32xf32>
    "tpu.trace_stop"() : () -> ()
    %168 = vector.shape_cast %167 : vector<4x8x32xf32> to vector<32x32xf32>
    %169 = arith.truncf %168 : vector<32x32xf32> to vector<32x32xbf16>
    %c0_76 = arith.constant 0 : index
    %c2_77 = arith.constant 2 : index
    %c0_78 = arith.constant 0 : index
    %c0_79 = arith.constant 0 : index
    %170 = vector.load %arg10[%c0_76, %c2_77, %c0_78, %c0_79] : memref<1x4x32x128xbf16, #tpu.memory_space<vmem>>, vector<1x1x32x128xbf16>
    %171 = vector.shape_cast %170 : vector<1x1x32x128xbf16> to vector<32x128xbf16>
    %cst_80 = arith.constant dense<0.000000e+00> : vector<32x128xf32>
    %172 = tpu.matmul %169, %171, %cst_80 {dimension_numbers = #tpu.dot_dimension_numbers<[1], [0], [0], [1], [0, 0, 1, 1], [], []>} : vector<32x32xbf16>, vector<32x128xbf16>, vector<32x128xf32> -> vector<32x128xf32>
    %173 = arith.addf %128, %172 : vector<32x128xf32>
    %c0_81 = arith.constant 0 : index
    %c3 = arith.constant 3 : index
    %c0_82 = arith.constant 0 : index
    %c0_83 = arith.constant 0 : index
    %174 = vector.load %arg9[%c0_81, %c3, %c0_82, %c0_83] : memref<1x12x128x32xbf16, #tpu.memory_space<vmem>>, vector<1x1x128x32xbf16>
    %175 = vector.shape_cast %174 : vector<1x1x128x32xbf16> to vector<128x32xbf16>
    %cst_84 = arith.constant dense<0.000000e+00> : vector<32x32xf32>
    %176 = tpu.matmul %37, %175, %cst_84 {dimension_numbers = #tpu.dot_dimension_numbers<[1], [0], [0], [1], [0, 0, 1, 1], [], []>} : vector<32x128xbf16>, vector<128x32xbf16>, vector<32x32xf32> -> vector<32x32xf32>
    %177 = vector.extract_strided_slice %14 {offsets = [3, 0], sizes = [1, 32], strides = [1, 1]} : vector<12x32xf32> to vector<1x32xf32>
    %178 = vector.broadcast %177 : vector<1x32xf32> to vector<32x32xf32>
    %179 = arith.addf %176, %178 : vector<32x32xf32>
    %180 = arith.truncf %179 : vector<32x32xf32> to vector<32x32xbf16>
    %181 = vector.shape_cast %180 : vector<32x32xbf16> to vector<4x8x32xbf16>
    %c0_85 = arith.constant 0 : index
    %c7 = arith.constant 7 : index
    %c0_86 = arith.constant 0 : index
    %c0_87 = arith.constant 0 : index
    %182 = vector.load %arg9[%c0_85, %c7, %c0_86, %c0_87] : memref<1x12x128x32xbf16, #tpu.memory_space<vmem>>, vector<1x1x128x32xbf16>
    %183 = vector.shape_cast %182 : vector<1x1x128x32xbf16> to vector<128x32xbf16>
    %cst_88 = arith.constant dense<0.000000e+00> : vector<32x32xf32>
    %184 = tpu.matmul %37, %183, %cst_88 {dimension_numbers = #tpu.dot_dimension_numbers<[1], [0], [0], [1], [0, 0, 1, 1], [], []>} : vector<32x128xbf16>, vector<128x32xbf16>, vector<32x32xf32> -> vector<32x32xf32>
    %185 = vector.extract_strided_slice %14 {offsets = [7, 0], sizes = [1, 32], strides = [1, 1]} : vector<12x32xf32> to vector<1x32xf32>
    %186 = vector.broadcast %185 : vector<1x32xf32> to vector<32x32xf32>
    %187 = arith.addf %184, %186 : vector<32x32xf32>
    %188 = arith.truncf %187 : vector<32x32xf32> to vector<32x32xbf16>
    %189 = vector.shape_cast %188 : vector<32x32xbf16> to vector<4x8x32xbf16>
    %c0_89 = arith.constant 0 : index
    %c11 = arith.constant 11 : index
    %c0_90 = arith.constant 0 : index
    %c0_91 = arith.constant 0 : index
    %190 = vector.load %arg9[%c0_89, %c11, %c0_90, %c0_91] : memref<1x12x128x32xbf16, #tpu.memory_space<vmem>>, vector<1x1x128x32xbf16>
    %191 = vector.shape_cast %190 : vector<1x1x128x32xbf16> to vector<128x32xbf16>
    %cst_92 = arith.constant dense<0.000000e+00> : vector<32x32xf32>
    %192 = tpu.matmul %37, %191, %cst_92 {dimension_numbers = #tpu.dot_dimension_numbers<[1], [0], [0], [1], [0, 0, 1, 1], [], []>} : vector<32x128xbf16>, vector<128x32xbf16>, vector<32x32xf32> -> vector<32x32xf32>
    %193 = vector.extract_strided_slice %14 {offsets = [11, 0], sizes = [1, 32], strides = [1, 1]} : vector<12x32xf32> to vector<1x32xf32>
    %194 = vector.broadcast %193 : vector<1x32xf32> to vector<32x32xf32>
    %195 = arith.addf %192, %194 : vector<32x32xf32>
    %196 = arith.truncf %195 : vector<32x32xf32> to vector<32x32xbf16>
    %197 = vector.shape_cast %196 : vector<32x32xbf16> to vector<4x8x32xbf16>
    "tpu.trace_start"() <{level = 10 : i32, message = "bqd,bkd->bqk"}> : () -> ()
    %cst_93 = arith.constant dense<0.000000e+00> : vector<4x8x8xf32>
    %198 = tpu.matmul %181, %189, %cst_93 {dimension_numbers = #tpu.dot_dimension_numbers<[2], [2], [1], [1], [0, 0, 0, 1, 1, 1], [0], [0]>} : vector<4x8x32xbf16>, vector<4x8x32xbf16>, vector<4x8x8xf32> -> vector<4x8x8xf32>
    "tpu.trace_stop"() : () -> ()
    %cst_94 = arith.constant 0.176776692 : f32
    %199 = vector.broadcast %cst_94 : f32 to vector<4x8x8xf32>
    %200 = arith.mulf %198, %199 : vector<4x8x8xf32>
    %cst_95 = arith.constant dense<0xFF800000> : vector<4x8xf32>
    %201 = vector.multi_reduction <maximumf>, %200, %cst_95 [2] : vector<4x8x8xf32> to vector<4x8xf32>
    %202 = vector.shape_cast %201 : vector<4x8xf32> to vector<4x8x1xf32>
    %203 = vector.broadcast %202 : vector<4x8x1xf32> to vector<4x8x8xf32>
    %204 = arith.subf %200, %203 : vector<4x8x8xf32>
    %205 = math.exp %204 : vector<4x8x8xf32>
    %cst_96 = arith.constant dense<0.000000e+00> : vector<4x8xf32>
    %206 = vector.multi_reduction <add>, %205, %cst_96 [2] : vector<4x8x8xf32> to vector<4x8xf32>
    %207 = vector.shape_cast %206 : vector<4x8xf32> to vector<4x8x1xf32>
    %208 = tpu.reciprocal %207 {approx = true} : vector<4x8x1xf32> -> vector<4x8x1xf32>
    %209 = vector.broadcast %208 : vector<4x8x1xf32> to vector<4x8x8xf32>
    %210 = arith.mulf %205, %209 : vector<4x8x8xf32>
    %211 = arith.truncf %210 : vector<4x8x8xf32> to vector<4x8x8xbf16>
    "tpu.trace_start"() <{level = 10 : i32, message = "bqk,bkd->bqd"}> : () -> ()
    %cst_97 = arith.constant dense<0.000000e+00> : vector<4x8x32xf32>
    %212 = tpu.matmul %211, %197, %cst_97 {dimension_numbers = #tpu.dot_dimension_numbers<[2], [1], [1], [2], [0, 0, 0, 1, 1, 2], [0], [0]>} : vector<4x8x8xbf16>, vector<4x8x32xbf16>, vector<4x8x32xf32> -> vector<4x8x32xf32>
    "tpu.trace_stop"() : () -> ()
    %213 = vector.shape_cast %212 : vector<4x8x32xf32> to vector<32x32xf32>
    %214 = arith.truncf %213 : vector<32x32xf32> to vector<32x32xbf16>
    %c0_98 = arith.constant 0 : index
    %c3_99 = arith.constant 3 : index
    %c0_100 = arith.constant 0 : index
    %c0_101 = arith.constant 0 : index
    %215 = vector.load %arg10[%c0_98, %c3_99, %c0_100, %c0_101] : memref<1x4x32x128xbf16, #tpu.memory_space<vmem>>, vector<1x1x32x128xbf16>
    %216 = vector.shape_cast %215 : vector<1x1x32x128xbf16> to vector<32x128xbf16>
    %cst_102 = arith.constant dense<0.000000e+00> : vector<32x128xf32>
    %217 = tpu.matmul %214, %216, %cst_102 {dimension_numbers = #tpu.dot_dimension_numbers<[1], [0], [0], [1], [0, 0, 1, 1], [], []>} : vector<32x32xbf16>, vector<32x128xbf16>, vector<32x128xf32> -> vector<32x128xf32>
    %218 = arith.addf %173, %217 : vector<32x128xf32>
    %219 = arith.addf %4, %218 : vector<32x128xf32>
    %220 = vector.broadcast %11 : vector<1x128xf32> to vector<32x128xf32>
    %221 = arith.addf %219, %220 : vector<32x128xf32>
    %cst_103 = arith.constant dense<0.000000e+00> : vector<32xf32>
    %222 = vector.multi_reduction <add>, %221, %cst_103 [1] : vector<32x128xf32> to vector<32xf32>
    %223 = vector.shape_cast %222 : vector<32xf32> to vector<32x1xf32>
    %cst_104 = arith.constant 1.280000e+02 : f32
    %224 = vector.broadcast %cst_104 : f32 to vector<32x1xf32>
    %225 = arith.divf %223, %224 : vector<32x1xf32>
    %226 = vector.broadcast %225 : vector<32x1xf32> to vector<32x128xf32>
    %227 = arith.subf %221, %226 : vector<32x128xf32>
    %228 = arith.mulf %227, %227 : vector<32x128xf32>
    %cst_105 = arith.constant dense<0.000000e+00> : vector<32xf32>
    %229 = vector.multi_reduction <add>, %228, %cst_105 [1] : vector<32x128xf32> to vector<32xf32>
    %230 = vector.shape_cast %229 : vector<32xf32> to vector<32x1xf32>
    %cst_106 = arith.constant 1.280000e+02 : f32
    %231 = vector.broadcast %cst_106 : f32 to vector<32x1xf32>
    %232 = arith.divf %230, %231 : vector<32x1xf32>
    %233 = vector.broadcast %225 : vector<32x1xf32> to vector<32x128xf32>
    %234 = arith.subf %221, %233 : vector<32x128xf32>
    %cst_107 = arith.constant 9.99999974E-6 : f32
    %235 = vector.broadcast %cst_107 : f32 to vector<32x1xf32>
    %236 = arith.addf %232, %235 : vector<32x1xf32>
    %237 = math.rsqrt %236 : vector<32x1xf32>
    %238 = vector.broadcast %237 : vector<32x1xf32> to vector<32x128xf32>
    %239 = arith.mulf %234, %238 : vector<32x128xf32>
    %240 = vector.broadcast %9 : vector<1x128xf32> to vector<32x128xf32>
    %241 = arith.mulf %239, %240 : vector<32x128xf32>
    %242 = vector.broadcast %10 : vector<1x128xf32> to vector<32x128xf32>
    %243 = arith.addf %241, %242 : vector<32x128xf32>
    %244 = arith.truncf %243 : vector<32x128xf32> to vector<32x128xbf16>
    %c0_108 = arith.constant 0 : index
    %c0_109 = arith.constant 0 : index
    %c0_110 = arith.constant 0 : index
    %245 = vector.load %arg11[%c0_108, %c0_109, %c0_110] : memref<1x128x512xbf16, #tpu.memory_space<vmem>>, vector<1x128x512xbf16>
    %246 = vector.shape_cast %245 : vector<1x128x512xbf16> to vector<128x512xbf16>
    %cst_111 = arith.constant dense<0.000000e+00> : vector<32x512xf32>
    %247 = tpu.matmul %244, %246, %cst_111 {dimension_numbers = #tpu.dot_dimension_numbers<[1], [0], [0], [1], [0, 0, 1, 1], [], []>} : vector<32x128xbf16>, vector<128x512xbf16>, vector<32x512xf32> -> vector<32x512xf32>
    %c0_112 = arith.constant 0 : index
    %c0_113 = arith.constant 0 : index
    %c0_114 = arith.constant 0 : index
    %248 = vector.load %arg8[%c0_112, %c0_113, %c0_114] : memref<1x1x512xf32, #tpu.memory_space<vmem>>, vector<1x1x512xf32>
    %249 = vector.shape_cast %248 : vector<1x1x512xf32> to vector<1x512xf32>
    %250 = vector.broadcast %249 : vector<1x512xf32> to vector<32x512xf32>
    %251 = arith.addf %247, %250 : vector<32x512xf32>
    %cst_115 = arith.constant 1.702000e+00 : f32
    %252 = vector.broadcast %cst_115 : f32 to vector<32x512xf32>
    %253 = arith.mulf %252, %251 : vector<32x512xf32>
    %254 = arith.negf %253 : vector<32x512xf32>
    %255 = math.exp %254 : vector<32x512xf32>
    %cst_116 = arith.constant 1.000000e+00 : f32
    %256 = vector.broadcast %cst_116 : f32 to vector<32x512xf32>
    %257 = arith.addf %256, %255 : vector<32x512xf32>
    %258 = arith.divf %256, %257 : vector<32x512xf32>
    %259 = arith.mulf %251, %258 : vector<32x512xf32>
    %260 = arith.truncf %259 : vector<32x512xf32> to vector<32x512xbf16>
    %c0_117 = arith.constant 0 : index
    %c0_118 = arith.constant 0 : index
    %c0_119 = arith.constant 0 : index
    %261 = vector.load %arg12[%c0_117, %c0_118, %c0_119] : memref<1x512x128xbf16, #tpu.memory_space<vmem>>, vector<1x512x128xbf16>
    %262 = vector.shape_cast %261 : vector<1x512x128xbf16> to vector<512x128xbf16>
    %cst_120 = arith.constant dense<0.000000e+00> : vector<32x128xf32>
    %263 = tpu.matmul %260, %262, %cst_120 {dimension_numbers = #tpu.dot_dimension_numbers<[1], [0], [0], [1], [0, 0, 1, 1], [], []>} : vector<32x512xbf16>, vector<512x128xbf16>, vector<32x128xf32> -> vector<32x128xf32>
    %264 = vector.broadcast %12 : vector<1x128xf32> to vector<32x128xf32>
    %265 = arith.addf %263, %264 : vector<32x128xf32>
    %266 = arith.addf %221, %265 : vector<32x128xf32>
    %267 = vector.shape_cast %266 : vector<32x128xf32> to vector<4x8x128xf32>
    %c0_121 = arith.constant 0 : index
    %c0_122 = arith.constant 0 : index
    %c0_123 = arith.constant 0 : index
    %268 = vector.load %arg14[%c0_121, %c0_122, %c0_123] : memref<4x8x128xf32, #tpu.memory_space<vmem>>, vector<4x8x128xf32>
    tpu.vector_store %arg14[%c0_121, %c0_122, %c0_123], %267 {strides = array<i32>} : memref<4x8x128xf32, #tpu.memory_space<vmem>>, vector<4x8x128xf32>,
    %c1_i32 = arith.constant 1 : i32
    %269 = arith.cmpi eq, %arg0, %c1_i32 : i32
    %270 = arith.extui %269 : i1 to i32
    %c0_i32_124 = arith.constant 0 : i32
    %271 = arith.cmpi ne, %270, %c0_i32_124 : i32
    scf.if %271 {
      %272 = vector.shape_cast %266 : vector<32x128xf32> to vector<4x8x128xf32>
      %273 = vector.extract_strided_slice %272 {offsets = [0, 0, 0], sizes = [4, 1, 128], strides = [1, 1, 1]} : vector<4x8x128xf32> to vector<4x1x128xf32>
      %274 = vector.shape_cast %273 : vector<4x1x128xf32> to vector<4x128xf32>
      %c0_125 = arith.constant 0 : index
      %c0_126 = arith.constant 0 : index
      %275 = vector.load %arg4[%c0_125, %c0_126] : memref<1x128xf32, #tpu.memory_space<vmem>>, vector<1x128xf32>
      %c0_127 = arith.constant 0 : index
      %c0_128 = arith.constant 0 : index
      %276 = vector.load %arg5[%c0_127, %c0_128] : memref<1x128xf32, #tpu.memory_space<vmem>>, vector<1x128xf32>
      %cst_129 = arith.constant dense<0.000000e+00> : vector<4xf32>
      %277 = vector.multi_reduction <add>, %274, %cst_129 [1] : vector<4x128xf32> to vector<4xf32>
      %278 = vector.shape_cast %277 : vector<4xf32> to vector<4x1xf32>
      %cst_130 = arith.constant 1.280000e+02 : f32
      %279 = vector.broadcast %cst_130 : f32 to vector<4x1xf32>
      %280 = arith.divf %278, %279 : vector<4x1xf32>
      %281 = vector.broadcast %280 : vector<4x1xf32> to vector<4x128xf32>
      %282 = arith.subf %274, %281 : vector<4x128xf32>
      %283 = arith.mulf %282, %282 : vector<4x128xf32>
      %cst_131 = arith.constant dense<0.000000e+00> : vector<4xf32>
      %284 = vector.multi_reduction <add>, %283, %cst_131 [1] : vector<4x128xf32> to vector<4xf32>
      %285 = vector.shape_cast %284 : vector<4xf32> to vector<4x1xf32>
      %cst_132 = arith.constant 1.280000e+02 : f32
      %286 = vector.broadcast %cst_132 : f32 to vector<4x1xf32>
      %287 = arith.divf %285, %286 : vector<4x1xf32>
      %288 = vector.broadcast %280 : vector<4x1xf32> to vector<4x128xf32>
      %289 = arith.subf %274, %288 : vector<4x128xf32>
      %cst_133 = arith.constant 9.99999974E-6 : f32
      %290 = vector.broadcast %cst_133 : f32 to vector<4x1xf32>
      %291 = arith.addf %287, %290 : vector<4x1xf32>
      %292 = math.rsqrt %291 : vector<4x1xf32>
      %293 = vector.broadcast %292 : vector<4x1xf32> to vector<4x128xf32>
      %294 = arith.mulf %289, %293 : vector<4x128xf32>
      %295 = vector.broadcast %275 : vector<1x128xf32> to vector<4x128xf32>
      %296 = arith.mulf %294, %295 : vector<4x128xf32>
      %297 = vector.broadcast %276 : vector<1x128xf32> to vector<4x128xf32>
      %298 = arith.addf %296, %297 : vector<4x128xf32>
      %299 = arith.truncf %298 : vector<4x128xf32> to vector<4x128xbf16>
      %c0_134 = arith.constant 0 : index
      %c0_135 = arith.constant 0 : index
      %300 = vector.load %arg2[%c0_134, %c0_135] : memref<128x128xbf16, #tpu.memory_space<vmem>>, vector<128x128xbf16>
      %cst_136 = arith.constant dense<0.000000e+00> : vector<4x128xf32>
      %301 = tpu.matmul %299, %300, %cst_136 {dimension_numbers = #tpu.dot_dimension_numbers<[1], [0], [0], [1], [0, 0, 1, 1], [], []>} : vector<4x128xbf16>, vector<128x128xbf16>, vector<4x128xf32> -> vector<4x128xf32>
      %c0_137 = arith.constant 0 : index
      %c0_138 = arith.constant 0 : index
      %302 = vector.load %arg3[%c0_137, %c0_138] : memref<1x128xf32, #tpu.memory_space<vmem>>, vector<1x128xf32>
      %303 = vector.broadcast %302 : vector<1x128xf32> to vector<4x128xf32>
      %304 = arith.addf %301, %303 : vector<4x128xf32>
      %c0_139 = arith.constant 0 : index
      %c0_140 = arith.constant 0 : index
      %305 = vector.load %arg13[%c0_139, %c0_140] : memref<4x128xf32, #tpu.memory_space<vmem>>, vector<4x128xf32>
      tpu.vector_store %arg13[%c0_139, %c0_140], %304 {strides = array<i32>} : memref<4x128xf32, #tpu.memory_space<vmem>>, vector<4x128xf32>,
    } else {
    }
    return
  }
  func.func @transform_1(%arg0: i32) -> (i32, i32) {
    %c0_i32 = arith.constant 0 : i32
    %c0_i32_0 = arith.constant 0 : i32
    %c0_i32_1 = arith.constant 0 : i32
    return %c0_i32, %c0_i32_0 : i32, i32
  }
  func.func @transform_2(%arg0: i32) -> (i32, i32) {
    %c0_i32 = arith.constant 0 : i32
    %c0_i32_0 = arith.constant 0 : i32
    %c0_i32_1 = arith.constant 0 : i32
    return %c0_i32, %c0_i32_0 : i32, i32
  }
  func.func @transform_3(%arg0: i32) -> (i32, i32) {
    %c0_i32 = arith.constant 0 : i32
    %c0_i32_0 = arith.constant 0 : i32
    %c0_i32_1 = arith.constant 0 : i32
    return %c0_i32, %c0_i32_0 : i32, i32
  }
  func.func @transform_4(%arg0: i32) -> (i32, i32) {
    %c0_i32 = arith.constant 0 : i32
    %c0_i32_0 = arith.constant 0 : i32
    %c0_i32_1 = arith.constant 0 : i32
    return %c0_i32, %c0_i32_0 : i32, i32
  }
  func.func @transform_5(%arg0: i32) -> (i32, i32, i32) {
    %c0_i32 = arith.constant 0 : i32
    %c0_i32_0 = arith.constant 0 : i32
    %c0_i32_1 = arith.constant 0 : i32
    return %arg0, %c0_i32, %c0_i32_0 : i32, i32, i32
  }
  func.func @transform_6(%arg0: i32) -> (i32, i32, i32) {
    %c0_i32 = arith.constant 0 : i32
    %c0_i32_0 = arith.constant 0 : i32
    %c0_i32_1 = arith.constant 0 : i32
    return %arg0, %c0_i32, %c0_i32_0 : i32, i32, i32
  }
  func.func @transform_7(%arg0: i32) -> (i32, i32, i32) {
    %c0_i32 = arith.constant 0 : i32
    %c0_i32_0 = arith.constant 0 : i32
    %c0_i32_1 = arith.constant 0 : i32
    return %arg0, %c0_i32, %c0_i32_0 : i32, i32, i32
  }
  func.func @transform_8(%arg0: i32) -> (i32, i32, i32, i32) {
    %c0_i32 = arith.constant 0 : i32
    %c0_i32_0 = arith.constant 0 : i32
    %c0_i32_1 = arith.constant 0 : i32
    %c0_i32_2 = arith.constant 0 : i32
    return %arg0, %c0_i32, %c0_i32_0, %c0_i32_1 : i32, i32, i32, i32
  }
  func.func @transform_9(%arg0: i32) -> (i32, i32, i32, i32) {
    %c0_i32 = arith.constant 0 : i32
    %c0_i32_0 = arith.constant 0 : i32
    %c0_i32_1 = arith.constant 0 : i32
    %c0_i32_2 = arith.constant 0 : i32
    return %arg0, %c0_i32, %c0_i32_0, %c0_i32_1 : i32, i32, i32, i32
  }
  func.func @transform_10(%arg0: i32) -> (i32, i32, i32) {
    %c0_i32 = arith.constant 0 : i32
    %c0_i32_0 = arith.constant 0 : i32
    %c0_i32_1 = arith.constant 0 : i32
    return %arg0, %c0_i32, %c0_i32_0 : i32, i32, i32
  }
  func.func @transform_11(%arg0: i32) -> (i32, i32, i32) {
    %c0_i32 = arith.constant 0 : i32
    %c0_i32_0 = arith.constant 0 : i32
    %c0_i32_1 = arith.constant 0 : i32
    return %arg0, %c0_i32, %c0_i32_0 : i32, i32, i32
  }
  func.func @transform_12(%arg0: i32) -> (i32, i32) {
    %c0_i32 = arith.constant 0 : i32
    %c0_i32_0 = arith.constant 0 : i32
    %c0_i32_1 = arith.constant 0 : i32
    return %c0_i32, %c0_i32_0 : i32, i32
  }
}

</mosaic_0001>

<bundles_post_ra>
// kernel: encoder_forward.2
= control target key start
LH: loop header
LB: loop body
LE: loop exit
PB: predicated region body
PF: predicated region fallthrough
CT: control target
= control target key end

     0   :  { %s5359_s19 = smov 0   ;;  %s6009_s0 = inlined_call_operand.vmem [shape: f32[2,8,128], index: 0, kind: input, shape index: {}]   ;;  %s6010_s1 = inlined_call_operand.vmem [shape: bf16[128,128], index: 1, kind: input, shape index: {}]   ;;  %s6011_s2 = inlined_call_operand.vmem [shape: f32[1,128], index: 2, kind: input, shape index: {}]   ;;  %s6012_s3 = inlined_call_operand.vmem [shape: f32[1,128], index: 3, kind: input, shape index: {}]   ;;  %s6013_s4 = inlined_call_operand.vmem [shape: f32[1,128], index: 4, kind: input, shape index: {}]   ;;  %s6014_s5 = inlined_call_operand.vmem [shape: f32[2,8,128], index: 5, kind: input, shape index: {}]   ;;  %s6015_s6 = inlined_call_operand.vmem [shape: f32[2,12,32], index: 6, kind: input, shape index: {}]   ;;  %s6016_s7 = inlined_call_operand.vmem [shape: f32[2,1,512], index: 7, kind: input, shape index: {}]   ;;  %s6017_s8 = inlined_call_operand.vmem [shape: bf16[2,12,128,32], index: 8, kind: input, shape index: {}]   ;;  %s6018_s9 = inlined_call_operand.vmem [shape: bf16[2,4,32,128], index: 9, kind: input, shape index: {}]   ;;  %s6019_s10 = inlined_call_operand.vmem [shape: bf16[2,128,512], index: 10, kind: input, shape index: {}]   ;;  %s6020_s11 = inlined_call_operand.vmem [shape: bf16[2,512,128], index: 11, kind: input, shape index: {}]   ;;  %s6021_s12 = inlined_call_operand.vmem [shape: f32[2,8,128], index: 12, kind: output, shape index: {}]  }
   0x1   :  { %6022 = sst [smem:[#allocation6_spill]] %s6014_s5 }
   0x2 LB: > { %s5365_s20 = sadd.s32 4294967295, %s5289_s19   ;;  %p3986_p0 = scmp.ge.s32.totalorder %s5289_s19, 1  ;;  %s5289_s19 = sphi %s5359_s19, %s22_s19  }
   0x3   : > { %p391_p1 = scmp.lt.s32.totalorder %s5289_s19, 3 }
   0x5   : > { %p392_p2 = pnand %p3986_p0, %p391_p1 }
   0x6   : > { %p454_p3 = scmp.lt.s32.totalorder (!%p392_p2), %s5365_s20, 1  ;;  %s6023_s5 = sld [smem:[#allocation6_spill]] (!%p392_p2) }
   0x7   : > { %395 = sbr.rel (%p392_p2) target bundleno = 5450 (0x154a), region = 64  ;;  %p3998_p4 = scmp.ne.s32.totalorder (!%p392_p2), %s5365_s20, 0 }
   0xe   : > { %s455_s21 = scalar_select %p454_p3, %s5365_s20, 1 }
   0xf   : > { %v524_v0 = vld [vmem:[%s6009_s0] sm:$0xff] (!%p3998_p4)  ;;  %v526_v1 = vld [vmem:[%s6009_s0 + $0x8] sm:$0xff] (!%p3998_p4) }
  0x10   : > { %s3987_s22 = sshll.u32 %s455_s21, 3  ;;  %s4413_s23 = sshll.u32 %s455_s21, 4  ;;  %525 = vst [vmem:[#allocation2] sm:$0xff] (!%p3998_p4), %v524_v0  ;;  %527 = vst [vmem:[#allocation2 + $0x8] sm:$0xff] (!%p3998_p4), %v526_v1 }
  0x11   : > { %s5374_s26 = scalar_lea.vmem %s6023_s5, %s3987_s22  ;;  %s5379_s29 = scalar_lea.vmem %s6015_s6, %s4413_s23 }
  0x12   : > { %s3990_s1 = sshll.u32 %s455_s21, 2  ;;  %s5005_s30 = smul.u32 768, %s455_s21 }
  0x13   : > { %s5384_s14 = scalar_lea.vmem %s6016_s7, %s3990_s1  ;;  %s4414_s15 = sshll.u32 %s455_s21, 6 }
  0x14   : > { %s5389_s18 = scalar_lea.vmem %s6017_s8, %s5005_s30  ;;  %s5394_s25 = scalar_lea.vmem %s6018_s9, %s4414_s15 }
  0x15   : > { %s4415_s23 = sshll.u32 %s455_s21, 8  ;;  %491 = sbr.rel (%p3998_p4) target bundleno = 31 (0x1f), region = 68 }
  0x16   : > { %s5399_s5 = scalar_lea.vmem %s6019_s10, %s4415_s23  ;;  %s5404_s13 = scalar_lea.vmem %s6020_s11, %s4415_s23 }
  0x1c   : > { %535 = vsyncadd [#allocation3], 256 }
  0x1d   : > { %5285 = dma.done.wait [#allocation3], 256 }
  0x1e   : > { %5286 = vsyncadd [#allocation3], 4294967040 }
  0x1f PF: > { %v540_v2 = vld [vmem:[#allocation2] sm:$0xff]  ;;  %v541_v3 = vld [vmem:[#allocation2 + $0x8] sm:$0xff]  ;;  %v5291_v6 = vmov 0.0   ;;  %v5021_v17 = vld [vmem:[%s5389_s18 + $0x10] sm:$0xff]   ;;  %vm5292_vm0 = vmmov 0   ;;  %v568_v32 = vlaneseq  ;;  %vm928_vm1 = vcmask 261120  }
  0x20   : > { %545 = vadd.xlane.f32.xlu0 %v540_v2  ;;  %v5017_v4 = vld [vmem:[%s5389_s18] sm:$0xff]   ;;  %4637 = vmatprep.subr.bf16.mxu0 %v5291_v6  ;;  %v5019_v7 = vld [vmem:[%s5389_s18 + $0x8] sm:$0xff]   ;;  %v5022_v18 = vld [vmem:[%s5389_s18 + $0x110] sm:$0xff]   ;;  %vm1051_vm2 = vcmask 1043456   ;;  %vm1023_vm3 = vcmask 64512   ;;  %p4407_p5 = scmp.ne.s32.totalorder %s5365_s20, 1 }
  0x21   : > { %v5018_v5 = vld [vmem:[%s5389_s18 + $0x100] sm:$0xff]   ;;  %4657 = vmatprep.subr.bf16.mxu1 %v5291_v6  ;;  %4638 = vmatpush3.bf16.msra.mxu0 %v5017_v4  ;;  %v5020_v16 = vld [vmem:[%s5389_s18 + $0x108] sm:$0xff]   ;;  %v5023_v19 = vld [vmem:[%s5389_s18 + $0x18] sm:$0xff]   ;;  %v5459_v36 = vshrl.u32 %v568_v32, 7 }
  0x22   : > { %4658 = vmatpush3.bf16.msra.mxu1 %v5018_v5  ;;  %4639 = vmatprep.subr.bf16.mxu0 %v5291_v6  ;;  %v5024_v20 = vld [vmem:[%s5389_s18 + $0x118] sm:$0xff]   ;;  %v5025_v21 = vld [vmem:[%s5389_s18 + $0x20] sm:$0xff]   ;;  %v5027_v23 = vld [vmem:[%s5389_s18 + $0x28] sm:$0xff]  }
  0x23   : > { %4659 = vmatprep.subr.bf16.mxu1 %v5291_v6  ;;  %v5026_v22 = vld [vmem:[%s5389_s18 + $0x120] sm:$0xff]   ;;  %v5028_v24 = vld [vmem:[%s5389_s18 + $0x128] sm:$0xff]   ;;  %v5029_v25 = vld [vmem:[%s5389_s18 + $0x30] sm:$0xff]   ;;  %4653 = vmatprep.mubr.msk.bf16.mxu0 %vm5292_vm0, %v5291_v6  ;;  %v5462_v37 = vsub.s32 0, %v5459_v36  ;;  %v5467_v41 = vsub.s32 1, %v5459_v36 }
  0x24   : > { %547 = vadd.xlane.f32.xlu0 %v541_v3  ;;  %v5030_v26 = vld [vmem:[%s5389_s18 + $0x130] sm:$0xff]   ;;  %v5031_v27 = vld [vmem:[%s5389_s18 + $0x38] sm:$0xff]   ;;  %4673 = vmatprep.mubr.msk.bf16.mxu1 %vm5292_vm0, %v5291_v6  ;;  %v542_v38 = vld [vmem:[%s5374_s26] sm:$0xff] }
  0x25   : > { %4640 = vmatpush3.bf16.msra.mxu0 %v5019_v7  ;;  %v5032_v28 = vld [vmem:[%s5389_s18 + $0x138] sm:$0xff]   ;;  %v571_v40 = vrot.slane %v542_v38, %v5462_v37  ;;  %v577_v44 = vrot.slane %v542_v38, %v5467_v41  ;;  %v5033_v50 = vld [vmem:[%s5389_s18 + $0x200] sm:$0xff]   ;;  %v5034_v52 = vld [vmem:[%s5389_s18 + $0x208] sm:$0xff]  }
  0x26   : > { %4641 = vmatprep.subr.bf16.mxu0 %v5291_v6  ;;  %4660 = vmatpush3.bf16.msra.mxu1 %v5020_v16  ;;  %v5035_v53 = vld [vmem:[%s5389_s18 + $0x210] sm:$0xff]   ;;  %v5036_v54 = vld [vmem:[%s5389_s18 + $0x218] sm:$0xff]   ;;  %v5037_v55 = vld [vmem:[%s5389_s18 + $0x220] sm:$0xff]  }
  0x27   : > { %4661 = vmatprep.subr.bf16.mxu1 %v5291_v6  ;;  %v5038_v56 = vld [vmem:[%s5389_s18 + $0x228] sm:$0xff]   ;;  %v5039_v57 = vld [vmem:[%s5389_s18 + $0x230] sm:$0xff]   ;;  %v5040_v58 = vld [vmem:[%s5389_s18 + $0x238] sm:$0xff]  }
  0x28   : > { %v5041_v59 = vld [vmem:[%s5389_s18 + $0x40] sm:$0xff]   ;;  %v5042_v60 = vld [vmem:[%s5389_s18 + $0x48] sm:$0xff]   ;;  %v5043_v61 = vld [vmem:[%s5389_s18 + $0x50] sm:$0xff]  }
  0x29   : > { %4642 = vmatpush3.bf16.msra.mxu0 %v5021_v17  ;;  %v5044_v62 = vld [vmem:[%s5389_s18 + $0x58] sm:$0xff]   ;;  %v5045_v63 = vld [vmem:[%s5389_s18 + $0x60] sm:$0xff]   ;;  %v5046_v0 = vld [vmem:[%s5389_s18 + $0x68] sm:$0xff]  }
  0x2a   : > { %4662 = vmatpush3.bf16.msra.mxu1 %v5022_v18  ;;  %4643 = vmatprep.subr.bf16.mxu0 %v5291_v6  ;;  %v5047_v1 = vld [vmem:[%s5389_s18 + $0x70] sm:$0xff]   ;;  %v5050_v4 = vld [vmem:[%s5389_s18 + $0x248] sm:$0xff]   ;;  %v5052_v7 = vld [vmem:[%s5389_s18 + $0x258] sm:$0xff]  }
  0x2b   : > { %4663 = vmatprep.subr.bf16.mxu1 %v5291_v6  ;;  %v5051_v5 = vld [vmem:[%s5389_s18 + $0x250] sm:$0xff]  }
  0x2d   : > { %4644 = vmatpush3.bf16.msra.mxu0 %v5023_v19 }
  0x2e   : > { %4664 = vmatpush3.bf16.msra.mxu1 %v5024_v20  ;;  %4645 = vmatprep.subr.bf16.mxu0 %v5291_v6 }
  0x2f   : > { %4665 = vmatprep.subr.bf16.mxu1 %v5291_v6 }
  0x31   : > { %4646 = vmatpush3.bf16.msra.mxu0 %v5025_v21 }
  0x32   : > { %4666 = vmatpush3.bf16.msra.mxu1 %v5026_v22  ;;  %4647 = vmatprep.subr.bf16.mxu0 %v5291_v6 }
  0x33   : > { %4667 = vmatprep.subr.bf16.mxu1 %v5291_v6 }
  0x35   : > { %4648 = vmatpush3.bf16.msra.mxu0 %v5027_v23 }
  0x36   : > { %4668 = vmatpush3.bf16.msra.mxu1 %v5028_v24  ;;  %4649 = vmatprep.subr.bf16.mxu0 %v5291_v6 }
  0x37   : > { %4669 = vmatprep.subr.bf16.mxu1 %v5291_v6 }
  0x39   : > { %4650 = vmatpush3.bf16.msra.mxu0 %v5029_v25 }
  0x3a   : > { %4670 = vmatpush3.bf16.msra.mxu1 %v5030_v26  ;;  %4651 = vmatprep.subr.bf16.mxu0 %v5291_v6 }
  0x3b   : > { %4671 = vmatprep.subr.bf16.mxu1 %v5291_v6 }
  0x3d   : > { %4652 = vmatpush3.bf16.msra.mxu0 %v5031_v27 }
  0x3e   : > { %4672 = vmatpush3.bf16.msra.mxu1 %v5032_v28  ;;  %4677 = vmatprep.subr.bf16.mxu0 %v5291_v6 }
  0x3f   : > { %4697 = vmatprep.subr.bf16.mxu1 %v5291_v6 }
  0xad   : > { %v546_v8 = vpop.xlane.xlu0 %545 }
  0xae   : > { %v550_v9 = vmul.f32 0.0078125, %v546_v8  ;;  %v5053_v8 = vld [vmem:[%s5389_s18 + $0x260] sm:$0xff]  }
  0xb0   : > { %v5421_v10 = vsub.f32 %v540_v2, %v550_v9  ;;  %v5048_v2 = vld [vmem:[%s5389_s18 + $0x78] sm:$0xff]   ;;  %v5054_v9 = vld [vmem:[%s5389_s18 + $0x268] sm:$0xff]  }
  0xb1   : > { %v548_v11 = vpop.xlane.xlu0 %547 }
  0xb2   : > { %v551_v12 = vmul.f32 0.0078125, %v548_v11  ;;  %v554_v13 = vmul.f32 %v5421_v10, %v5421_v10  ;;  %v5056_v11 = vld [vmem:[%s5389_s18 + $0x278] sm:$0xff]  }
  0xb4   : > { %v5425_v14 = vsub.f32 %v541_v3, %v551_v12  ;;  %556 = vadd.xlane.f32.xlu1 %v554_v13  ;;  %v5049_v3 = vld [vmem:[%s5389_s18 + $0x240] sm:$0xff]   ;;  %v715_v12 = vsub.s32 4, %v5459_v36 }
  0xb5   : > { %v5539_v13 = vld [vmem:[%s5379_s29] sm:$0xff] }
  0xb6   : > { %v555_v15 = vmul.f32 %v5425_v14, %v5425_v14  ;;  %v600_v22 = vrot.slane %v5539_v13, %v5462_v37 }
  0xb8   : > { %558 = vadd.xlane.f32.xlu1 %v555_v15 }
 0x141   : > { %v557_v29 = vpop.xlane.xlu1 %556 }
 0x142   : > { %v560_v30 = vmul.f32 0.0078125, %v557_v29 }
 0x144   : > { %v562_v31 = vadd.f32 1e-05, %v560_v30 }
 0x145   : > { %v559_v33 = vpop.xlane.xlu1 %558 }
 0x146   : > { %5201 = vrsqrt.f32 %v562_v31  ;;  %v561_v34 = vmul.f32 0.0078125, %v559_v33 }
 0x148   : > { %v563_v35 = vadd.f32 1e-05, %v561_v34  ;;  %v5557_v34 = vld [vmem:[%s5379_s29 + $0x8] sm:$0xf] }
 0x14a   : > { %5203 = vrsqrt.f32 %v563_v35  ;;  %v832_v35 = vrot.slane %v5557_v34, %v5462_v37 }
 0x150   : > { %v5202_v39 = vpop.eup %5201 }
 0x151   : > { %v566_v42 = vmul.f32 %v5202_v39, %v5421_v10  ;;  %v5055_v10 = vld [vmem:[%s5389_s18 + $0x270] sm:$0xff]  }
 0x153   : > { %v572_v45 = vmul.f32 %v571_v40, %v566_v42 }
 0x154   : > { %v5204_v43 = vpop.eup %5203 }
 0x155   : > { %v567_v46 = vmul.f32 %v5204_v43, %v5425_v14  ;;  %v578_v48 = vadd.f32 %v577_v44, %v572_v45  ;;  %v716_v14 = vrot.slane %v5539_v13, %v715_v12 }
 0x157   : > { %v573_v47 = vmul.f32 %v571_v40, %v567_v46 }
 0x159   : > { %v579_v49 = vadd.f32 %v577_v44, %v573_v47 }
 0x15b   : > { %v5473_v51 = vpack.c.bf16 %v579_v49, %v578_v48 }
 0x15d   : > { %4654 = vmatmul.mubr.bf16.vlgmr.msra.gmra.mrb[0].mxu0 %v5473_v51  ;;  %4674 = vmatmul.mubr.bf16.vlgmr.msra.gmra.mrb[0].mxu1 %v5473_v51 }
 0x15e   : > { %4678 = vmatpush3.bf16.msra.mxu0 %v5033_v50  ;;  %4693 = vmatprep.mubr.msk.bf16.mxu0 %vm5292_vm0, %v5291_v6 }
 0x15f   : > { %4679 = vmatprep.subr.bf16.mxu0 %v5291_v6  ;;  %4699 = vmatprep.mubr.msk.bf16.mxu1 %vm5292_vm0, %v5291_v6 }
 0x162   : > { %4680 = vmatpush3.bf16.msra.mxu0 %v5034_v52 }
 0x163   : > { %4681 = vmatprep.subr.bf16.mxu0 %v5291_v6 }
 0x166   : > { %4682 = vmatpush3.bf16.msra.mxu0 %v5035_v53  ;;  %v5571_v53 = vrot.slane %v5557_v34, %v5467_v41 }
 0x167   : > { %4683 = vmatprep.subr.bf16.mxu0 %v5291_v6 }
 0x16a   : > { %4684 = vmatpush3.bf16.msra.mxu0 %v5036_v54 }
 0x16b   : > { %4685 = vmatprep.subr.bf16.mxu0 %v5291_v6 }
 0x16e   : > { %4686 = vmatpush3.bf16.msra.mxu0 %v5037_v55 }
 0x16f   : > { %4687 = vmatprep.subr.bf16.mxu0 %v5291_v6 }
 0x172   : > { %4688 = vmatpush3.bf16.msra.mxu0 %v5038_v56 }
 0x173   : > { %4689 = vmatprep.subr.bf16.mxu0 %v5291_v6 }
 0x176   : > { %4690 = vmatpush3.bf16.msra.mxu0 %v5039_v57 }
 0x177   : > { %4691 = vmatprep.subr.bf16.mxu0 %v5291_v6 }
 0x17a   : > { %4692 = vmatpush3.bf16.msra.mxu0 %v5040_v58 }
 0x17b   : > { %4721 = vmatprep.subr.bf16.mxu0 %v5291_v6 }
 0x17d   : > { %4694 = vmatmul.mubr.bf16.vlgmr.msra.gmra.mrb[4].mxu0 %v5473_v51 }
 0x17e   : > { %4722 = vmatpush3.bf16.msra.mxu0 %v5041_v59  ;;  %4737 = vmatprep.mubr.msk.bf16.mxu0 %vm5292_vm0, %v5291_v6 }
 0x17f   : > { %4723 = vmatprep.subr.bf16.mxu0 %v5291_v6 }
 0x182   : > { %4724 = vmatpush3.bf16.msra.mxu0 %v5042_v60 }
 0x183   : > { %4725 = vmatprep.subr.bf16.mxu0 %v5291_v6 }
 0x186   : > { %4726 = vmatpush3.bf16.msra.mxu0 %v5043_v61 }
 0x187   : > { %4727 = vmatprep.subr.bf16.mxu0 %v5291_v6 }
 0x18a   : > { %4728 = vmatpush3.bf16.msra.mxu0 %v5044_v62 }
 0x18b   : > { %4729 = vmatprep.subr.bf16.mxu0 %v5291_v6 }
 0x18e   : > { %4730 = vmatpush3.bf16.msra.mxu0 %v5045_v63 }
 0x18f   : > { %4731 = vmatprep.subr.bf16.mxu0 %v5291_v6 }
 0x192   : > { %4732 = vmatpush3.bf16.msra.mxu0 %v5046_v0 }
 0x193   : > { %4733 = vmatprep.subr.bf16.mxu0 %v5291_v6 }
 0x196   : > { %4734 = vmatpush3.bf16.msra.mxu0 %v5047_v1 }
 0x197   : > { %4735 = vmatprep.subr.bf16.mxu0 %v5291_v6 }
 0x19a   : > { %4736 = vmatpush3.bf16.msra.mxu0 %v5048_v2 }
 0x19b   : > { %4761 = vmatprep.subr.bf16.mxu0 %v5291_v6 }
 0x19d   : > { %4738 = vmatmul.mubr.bf16.vlgmr.msra.gmra.mrb[8].mxu0 %v5473_v51 }
 0x19e   : > { %4762 = vmatpush3.bf16.msra.mxu0 %v5049_v3  ;;  %4777 = vmatprep.mubr.msk.bf16.mxu0 %vm5292_vm0, %v5291_v6 }
 0x19f   : > { %4763 = vmatprep.subr.bf16.mxu0 %v5291_v6 }
 0x1a2   : > { %4764 = vmatpush3.bf16.msra.mxu0 %v5050_v4 }
 0x1a3   : > { %4765 = vmatprep.subr.bf16.mxu0 %v5291_v6 }
 0x1a6   : > { %4766 = vmatpush3.bf16.msra.mxu0 %v5051_v5 }
 0x1a7   : > { %4767 = vmatprep.subr.bf16.mxu0 %v5291_v6 }
 0x1aa   : > { %4768 = vmatpush3.bf16.msra.mxu0 %v5052_v7 }
 0x1ab   : > { %4769 = vmatprep.subr.bf16.mxu0 %v5291_v6 }
 0x1ae   : > { %4770 = vmatpush3.bf16.msra.mxu0 %v5053_v8 }
 0x1af   : > { %4771 = vmatprep.subr.bf16.mxu0 %v5291_v6 }
 0x1b2   : > { %4772 = vmatpush3.bf16.msra.mxu0 %v5054_v9 }
 0x1b3   : > { %4773 = vmatprep.subr.bf16.mxu0 %v5291_v6 }
 0x1b6   : > { %4774 = vmatpush3.bf16.msra.mxu0 %v5055_v10 }
 0x1b7   : > { %4775 = vmatprep.subr.bf16.mxu0 %v5291_v6 }
 0x1ba   : > { %4776 = vmatpush3.bf16.msra.mxu0 %v5056_v11 }
 0x1bb   : > { %4805 = vmatprep.subr.bf16.mxu0 %v5291_v6 }
 0x1bd   : > { %4778 = vmatmul.mubr.bf16.vlgmr.msra.gmra.mrb[12].mxu0 %v5473_v51 }
 0x1be   : > { %4809 = vmatprep.mubr.msk.bf16.mxu0 %vm5292_vm0, %v5291_v6 }
 0x230   : > { %v683_v15 = vpop.f32.mrb[0].mxu0  ;;  %v799_v16 = vpop.f32.mrb[0].mxu1 }
 0x231   : > { %v800_v17 = vadd.f32 %v799_v16, %v716_v14  ;;  %v4655_v18 = vpop.f32.mrb[1].mxu0  ;;  %v4675_v19 = vpop.f32.mrb[1].mxu1  ;;  %v684_v28 = vadd.f32 %v683_v15, %v600_v22 }
 0x232   : > { %v686_v20 = vpop.f32.mrb[2].mxu0  ;;  %v802_v21 = vpop.f32.mrb[2].mxu1 }
 0x233   : > { %v4419_v23 = vpack.c.bf16 %v800_v17, %v800_v17  ;;  %v4656_v24 = vpop.f32.mrb[3].mxu0  ;;  %v4676_v25 = vpop.f32.mrb[3].mxu1  ;;  %v803_v27 = vadd.f32 %v802_v21, %v716_v14  ;;  %v4417_v30 = vpack.c.bf16 %v684_v28, %v684_v28  ;;  %v687_v32 = vadd.f32 %v686_v20, %v600_v22  ;;  %v5057_v28 = vld [vmem:[%s5389_s18 + $0x140] sm:$0xff]  }
 0x235   : > { %v933_v26 = vsel %vm928_vm1, %v4419_v23, 0  ;;  %v4420_v29 = vpack.c.bf16 %v803_v27, %v803_v27  ;;  %v4418_v33 = vpack.c.bf16 %v687_v32, %v687_v32  ;;  %v5060_v32 = vld [vmem:[%s5389_s18 + $0x158] sm:$0xff]  }
 0x236   : > { %4698 = vmatpush3.bf16.xpose.msra.mxu1 %v933_v26 }
 0x237   : > { %4703 = vmatprep.subr.bf16.mxu1 %v5291_v6  ;;  %v979_v31 = vsel %vm928_vm1, %v4420_v29, 0 }
 0x23d   : > { %4700 = vmatmul.mubr.msk.bf16.vlgmr.msra.gmra.mrb[4].mxu1 %vm928_vm1, %v4417_v30  ;;  %v5058_v30 = vld [vmem:[%s5389_s18 + $0x148] sm:$0xff]  }
 0x23e   : > { %4704 = vmatpush3.bf16.xpose.msra.mxu1 %v979_v31  ;;  %4705 = vmatprep.mubr.msk.bf16.mxu1 %vm5292_vm0, %v5291_v6  ;;  %v5059_v31 = vld [vmem:[%s5389_s18 + $0x150] sm:$0xff]  }
 0x23f   : > { %4709 = vmatprep.subr.bf16.mxu1 %v5291_v6 }
 0x245   : > { %4706 = vmatmul.mubr.msk.bf16.vlgmr.msra.gmra.mrb[8].mxu1 %vm928_vm1, %v4418_v33  ;;  %v5061_v33 = vld [vmem:[%s5389_s18 + $0x160] sm:$0xff]  }
 0x246   : > { %4711 = vmatprep.mubr.msk.bf16.mxu1 %vm5292_vm0, %v5291_v6 }
 0x250   : > { %v915_v38 = vpop.f32.mrb[4].mxu0 }
 0x251   : > { %v916_v39 = vadd.f32 %v915_v38, %v832_v35  ;;  %v4695_v40 = vpop.f32.mrb[5].mxu0  ;;  %v5063_v38 = vld [vmem:[%s5389_s18 + $0x170] sm:$0xff]  }
 0x252   : > { %v918_v42 = vpop.f32.mrb[6].mxu0 }
 0x253   : > { %v4421_v43 = vpack.c.bf16 %v916_v39, %v916_v39  ;;  %v919_v44 = vadd.f32 %v918_v42, %v832_v35  ;;  %v4696_v45 = vpop.f32.mrb[7].mxu0  ;;  %v5062_v35 = vld [vmem:[%s5389_s18 + $0x168] sm:$0xff]   ;;  %v5064_v39 = vld [vmem:[%s5389_s18 + $0x178] sm:$0xff]  }
 0x255   : > { %v1053_v46 = vsel %vm1051_vm2, %v4421_v43, 0  ;;  %v4422_v22 = vpack.c.bf16 %v919_v44, %v919_v44 }
 0x256   : > { %4710 = vmatpush3.bf16.msra.mxu1 %v1053_v46 }
 0x257   : > { %4715 = vmatprep.subr.bf16.mxu1 %v5291_v6  ;;  %v1099_v25 = vsel %vm1051_vm2, %v4422_v22, 0 }
 0x270   : > { %v5563_v47 = vpop.f32.mrb[8].mxu0 }
 0x271   : > { %v4739_v48 = vpop.f32.mrb[9].mxu0 }
 0x272   : > { %v5565_v49 = vpop.f32.mrb[10].mxu0 }
 0x273   : > { %v4740_v50 = vpop.f32.mrb[11].mxu0 }
 0x290   : > { %v5567_v52 = vpop.f32.mrb[12].mxu0 }
 0x291   : > { %v4779_v54 = vpop.f32.mrb[13].mxu0 }
 0x292   : > { %v1484_v55 = vpop.f32.mrb[14].mxu0 }
 0x293   : > { %v5574_v56 = vadd.f32 %v1484_v55, %v5571_v53  ;;  %v4780_v57 = vpop.f32.mrb[15].mxu0  ;;  %v1281_v55 = vsub.s32 5, %v5459_v36 }
 0x295   : > { %v1282_v57 = vrot.slane %v5539_v13, %v1281_v55 }
 0x310   : > { %v969_v58 = vpop.f32.mrb[4].mxu1 }
 0x311   : > { %v1021_v59 = vmul.f32 0.17677669, %v969_v58  ;;  %v4701_v60 = vpop.f32.mrb[5].mxu1 }
 0x312   : > { %v972_v61 = vpop.f32.mrb[6].mxu1 }
 0x313   : > { %v4702_v62 = vpop.f32.mrb[7].mxu1  ;;  %v1024_v63 = vsel %vm1023_vm3, %v1021_v59, -inf }
 0x314   : > { %1025 = vmax.xlane.f32.xlu0 %v1024_v63  ;;  %v1166_v62 = vrot.slane %v5539_v13, %v5467_v41 }
 0x318   : > { %v1015_v0 = vpop.f32.mrb[8].mxu1 }
 0x319   : > { %v1022_v1 = vmul.f32 0.17677669, %v1015_v0  ;;  %v4707_v2 = vpop.f32.mrb[9].mxu1 }
 0x31a   : > { %v1018_v3 = vpop.f32.mrb[10].mxu1 }
 0x31b   : > { %v4708_v4 = vpop.f32.mrb[11].mxu1  ;;  %v1027_v5 = vsel %vm1023_vm3, %v1022_v1, -inf  ;;  %v1250_v3 = vadd.f32 %v5563_v47, %v1166_v62 }
 0x31c   : > { %1028 = vmax.xlane.f32.xlu1 %v1027_v5 }
 0x31d   : > { %v4423_v5 = vpack.c.bf16 %v1250_v3, %v1250_v3 }
 0x3a1   : > { %v1026_v7 = vpop.xlane.xlu0 %1025 }
 0x3a2   : > { %v1030_v8 = vsub.f32 %v1021_v59, %v1026_v7  ;;  %v1482_v7 = vadd.f32 %v5567_v52, %v5571_v53 }
 0x3a4   : > { %v1032_v9 = vmul.f32 1.442695, %v1030_v8  ;;  %v4427_v47 = vpack.c.bf16 %v1482_v7, %v1482_v7  ;;  %v5077_v7 = vld [vmem:[%s5389_s18 + $0x80] sm:$0xff]  }
 0x3a6   : > { %5205 = vpow2.f32 %v1032_v9  ;;  %v1253_v9 = vadd.f32 %v5565_v49, %v1166_v62  ;;  %v5074_v62 = vld [vmem:[%s5389_s18 + $0x1b8] sm:$0xff]  }
 0x3a9   : > { %v1029_v10 = vpop.xlane.xlu1 %1028 }
 0x3aa   : > { %v1031_v11 = vsub.f32 %v1022_v1, %v1029_v10  ;;  %v4424_v10 = vpack.c.bf16 %v1253_v9, %v1253_v9 }
 0x3ac   : > { %v1034_v14 = vmul.f32 1.442695, %v1031_v11  ;;  %v1616_v11 = vsel %vm1051_vm2, %v4427_v47, 0 }
 0x3ae   : > { %5207 = vpow2.f32 %v1034_v14 }
 0x3b0   : > { %v5206_v15 = vpop.eup %5205 }
 0x3b1   : > { %v1036_v16 = vsel %vm1023_vm3, %v5206_v15, 0.0 }
 0x3b2   : > { %1037 = vadd.xlane.f32.xlu0 %v1036_v16 }
 0x3b8   : > { %v5208_v17 = vpop.eup %5207 }
 0x3b9   : > { %v1039_v18 = vsel %vm1023_vm3, %v5208_v17, 0.0 }
 0x3ba   : > { %1040 = vadd.xlane.f32.xlu1 %v1039_v18 }
 0x43f   : > { %v1038_v19 = vpop.xlane.xlu0 %1037 }
 0x440   : > { %5209 = vrcp.f32 %v1038_v19 }
 0x447   : > { %v1041_v20 = vpop.xlane.xlu1 %1040 }
 0x448   : > { %5211 = vrcp.f32 %v1041_v20 }
 0x44a   : > { %v5210_v21 = vpop.eup %5209 }
 0x44b   : > { %v1044_v23 = vmul.f32 %v5210_v21, %v5206_v15 }
 0x44d   : > { %v1046_v24 = vpack.c.bf16 %v1044_v23, %v1044_v23 }
 0x44f   : > { %4712 = vmatmul.mubr.msk.bf16.vlgmr.msra.gmra.mrb[12].mxu1 %vm1023_vm3, %v1046_v24 }
 0x450   : > { %4716 = vmatpush3.bf16.msra.mxu1 %v1099_v25  ;;  %4717 = vmatprep.mubr.msk.bf16.mxu1 %vm5292_vm0, %v5291_v6 }
 0x451   : > { %4741 = vmatprep.subr.bf16.mxu1 %v5291_v6 }
 0x452   : > { %v5212_v26 = vpop.eup %5211 }
 0x453   : > { %v1045_v27 = vmul.f32 %v5212_v26, %v5208_v17 }
 0x455   : > { %v1047_v29 = vpack.c.bf16 %v1045_v27, %v1045_v27 }
 0x457   : > { %4718 = vmatmul.mubr.msk.bf16.vlgmr.msra.gmra.mrb[16].mxu1 %vm1023_vm3, %v1047_v29 }
 0x458   : > { %4742 = vmatpush3.bf16.msra.mxu1 %v5057_v28  ;;  %4757 = vmatprep.mubr.msk.bf16.mxu1 %vm5292_vm0, %v5291_v6 }
 0x459   : > { %4743 = vmatprep.subr.bf16.mxu1 %v5291_v6 }
 0x45c   : > { %4744 = vmatpush3.bf16.msra.mxu1 %v5058_v30 }
 0x45d   : > { %4745 = vmatprep.subr.bf16.mxu1 %v5291_v6 }
 0x460   : > { %4746 = vmatpush3.bf16.msra.mxu1 %v5059_v31 }
 0x461   : > { %4747 = vmatprep.subr.bf16.mxu1 %v5291_v6 }
 0x464   : > { %4748 = vmatpush3.bf16.msra.mxu1 %v5060_v32 }
 0x465   : > { %4749 = vmatprep.subr.bf16.mxu1 %v5291_v6 }
 0x468   : > { %4750 = vmatpush3.bf16.msra.mxu1 %v5061_v33 }
 0x469   : > { %4751 = vmatprep.subr.bf16.mxu1 %v5291_v6 }
 0x46c   : > { %4752 = vmatpush3.bf16.msra.mxu1 %v5062_v35 }
 0x46d   : > { %4753 = vmatprep.subr.bf16.mxu1 %v5291_v6 }
 0x470   : > { %4754 = vmatpush3.bf16.msra.mxu1 %v5063_v38 }
 0x471   : > { %4755 = vmatprep.subr.bf16.mxu1 %v5291_v6 }
 0x474   : > { %4756 = vmatpush3.bf16.msra.mxu1 %v5064_v39  ;;  %v4428_v39 = vpack.c.bf16 %v5574_v56, %v5574_v56  ;;  %v5066_v56 = vld [vmem:[%s5394_s25 + $0x8] sm:$0xff]  }
 0x475   : > { %4781 = vmatprep.subr.bf16.mxu1 %v5291_v6 }
 0x477   : > { %4758 = vmatmul.mubr.bf16.vlgmr.msra.gmra.mrb[20].mxu1 %v5473_v51 }
 0x478   : > { %4783 = vmatprep.mubr.msk.bf16.mxu1 %vm5292_vm0, %v5291_v6 }
 0x522   : > { %v5607_v40 = vpop.f32.mrb[12].mxu1 }
 0x523   : > { %v4713_v42 = vpop.f32.mrb[13].mxu1 }
 0x524   : > { %v1092_v43 = vpop.f32.mrb[14].mxu1 }
 0x525   : > { %v4714_v44 = vpop.f32.mrb[15].mxu1 }
 0x526   : > { %v1662_v44 = vsel %vm1051_vm2, %v4428_v39, 0  ;;  %v5090_v39 = vld [vmem:[%s5389_s18 + $0x2a8] sm:$0xff]  }
 0x52a   : > { %v5609_v45 = vpop.f32.mrb[16].mxu1 }
 0x52b   : > { %v1141_v46 = vpack.c.bf16 %v5609_v45, %v5607_v40  ;;  %v4719_v48 = vpop.f32.mrb[17].mxu1  ;;  %v5071_v40 = vld [vmem:[%s5389_s18 + $0x1a0] sm:$0xff]   ;;  %v5072_v45 = vld [vmem:[%s5389_s18 + $0x1a8] sm:$0xff]  }
 0x52c   : > { %v1138_v50 = vpop.f32.mrb[18].mxu1 }
 0x52d   : > { %v4720_v54 = vpop.f32.mrb[19].mxu1 }
 0x52e   : > { %v5065_v54 = vld [vmem:[%s5394_s25] sm:$0xff]  }
 0x54a   : > { %v1365_v58 = vpop.f32.mrb[20].mxu1 }
 0x54b   : > { %v1366_v59 = vadd.f32 %v1365_v58, %v1282_v57  ;;  %v4759_v60 = vpop.f32.mrb[21].mxu1  ;;  %v5067_v58 = vld [vmem:[%s5389_s18 + $0x180] sm:$0xff]  }
 0x54c   : > { %v1368_v61 = vpop.f32.mrb[22].mxu1  ;;  %v5069_v60 = vld [vmem:[%s5389_s18 + $0x190] sm:$0xff]  }
 0x54d   : > { %v4425_v63 = vpack.c.bf16 %v1366_v59, %v1366_v59  ;;  %v4760_v0 = vpop.f32.mrb[23].mxu1  ;;  %v1369_v2 = vadd.f32 %v1368_v61, %v1282_v57  ;;  %v5068_v59 = vld [vmem:[%s5389_s18 + $0x188] sm:$0xff]   ;;  %v5070_v61 = vld [vmem:[%s5389_s18 + $0x198] sm:$0xff]  }
 0x54e   : > { %v5076_v0 = vld [vmem:[%s5394_s25 + $0x18] sm:$0xff]  }
 0x54f   : > { %v1498_v1 = vsel %vm928_vm1, %v4425_v63, 0  ;;  %v4426_v4 = vpack.c.bf16 %v1369_v2, %v1369_v2  ;;  %v5075_v63 = vld [vmem:[%s5394_s25 + $0x10] sm:$0xff]  }
 0x550   : > { %4782 = vmatpush3.bf16.xpose.msra.mxu1 %v1498_v1  ;;  %4806 = vmatpush3.bf16.msra.mxu0 %v5075_v63 }
 0x551   : > { %4787 = vmatprep.subr.bf16.mxu1 %v5291_v6  ;;  %v1544_v8 = vsel %vm928_vm1, %v4426_v4, 0  ;;  %4807 = vmatprep.subr.bf16.mxu0 %v5291_v6 }
 0x554   : > { %4808 = vmatpush3.bf16.msra.mxu0 %v5076_v0 }
 0x555   : > { %4821 = vmatprep.subr.bf16.mxu0 %v5291_v6 }
 0x557   : > { %4784 = vmatmul.mubr.msk.bf16.vlgmr.msra.gmra.mrb[24].mxu1 %vm928_vm1, %v4423_v5 }
 0x558   : > { %4788 = vmatpush3.bf16.xpose.msra.mxu1 %v1544_v8  ;;  %4789 = vmatprep.mubr.msk.bf16.mxu1 %vm5292_vm0, %v5291_v6 }
 0x559   : > { %4793 = vmatprep.subr.bf16.mxu1 %v5291_v6 }
 0x55f   : > { %4790 = vmatmul.mubr.msk.bf16.vlgmr.msra.gmra.mrb[28].mxu1 %vm928_vm1, %v4424_v10 }
 0x560   : > { %4794 = vmatpush3.bf16.msra.mxu1 %v1616_v11  ;;  %4795 = vmatprep.mubr.msk.bf16.mxu1 %vm5292_vm0, %v5291_v6  ;;  %v5078_v11 = vld [vmem:[%s5389_s18 + $0x88] sm:$0xff]  }
 0x561   : > { %4799 = vmatprep.subr.bf16.mxu1 %v5291_v6 }
 0x62a   : > { %v1534_v52 = vpop.f32.mrb[24].mxu1 }
 0x62b   : > { %v1586_v53 = vmul.f32 0.17677669, %v1534_v52  ;;  %v4785_v14 = vpop.f32.mrb[25].mxu1 }
 0x62c   : > { %v1537_v15 = vpop.f32.mrb[26].mxu1 }
 0x62d   : > { %v4786_v16 = vpop.f32.mrb[27].mxu1  ;;  %v1588_v49 = vsel %vm1023_vm3, %v1586_v53, -inf }
 0x62e   : > { %1589 = vmax.xlane.f32.xlu0 %v1588_v49  ;;  %v5080_v49 = vld [vmem:[%s5389_s18 + $0x98] sm:$0xff]  }
 0x632   : > { %v1580_v17 = vpop.f32.mrb[28].mxu1 }
 0x633   : > { %v1587_v18 = vmul.f32 0.17677669, %v1580_v17  ;;  %v4791_v19 = vpop.f32.mrb[29].mxu1  ;;  %v5081_v17 = vld [vmem:[%s5389_s18 + $0xa0] sm:$0xff]  }
 0x634   : > { %v1583_v20 = vpop.f32.mrb[30].mxu1  ;;  %v5083_v19 = vld [vmem:[%s5389_s18 + $0xb0] sm:$0xff]  }
 0x635   : > { %v4792_v21 = vpop.f32.mrb[31].mxu1  ;;  %v1591_v22 = vsel %vm1023_vm3, %v1587_v18, -inf  ;;  %v5084_v20 = vld [vmem:[%s5389_s18 + $0xb8] sm:$0xff]  }
 0x636   : > { %1592 = vmax.xlane.f32.xlu1 %v1591_v22  ;;  %v5085_v21 = vld [vmem:[%s5389_s18 + $0x280] sm:$0xff]   ;;  %v1957_v22 = vsub.s32 6, %v5459_v36 }
 0x6bb   : > { %v1590_v23 = vpop.xlane.xlu0 %1589 }
 0x6bc   : > { %v1594_v24 = vsub.f32 %v1586_v53, %v1590_v23  ;;  %v5079_v53 = vld [vmem:[%s5389_s18 + $0x90] sm:$0xff]   ;;  %v5086_v23 = vld [vmem:[%s5389_s18 + $0x288] sm:$0xff]  }
 0x6be   : > { %v1596_v25 = vmul.f32 1.442695, %v1594_v24  ;;  %v1958_v24 = vrot.slane %v5539_v13, %v1957_v22 }
 0x6c0   : > { %5213 = vpow2.f32 %v1596_v25 }
 0x6c3   : > { %v1593_v26 = vpop.xlane.xlu1 %1592 }
 0x6c4   : > { %v1595_v27 = vsub.f32 %v1587_v18, %v1593_v26  ;;  %v5082_v18 = vld [vmem:[%s5389_s18 + $0xa8] sm:$0xff]   ;;  %v5087_v26 = vld [vmem:[%s5389_s18 + $0x290] sm:$0xff]  }
 0x6c6   : > { %v1598_v28 = vmul.f32 1.442695, %v1595_v27 }
 0x6c8   : > { %5215 = vpow2.f32 %v1598_v28 }
 0x6ca   : > { %v5214_v29 = vpop.eup %5213 }
 0x6cb   : > { %v1600_v30 = vsel %vm1023_vm3, %v5214_v29, 0.0 }
 0x6cc   : > { %1601 = vadd.xlane.f32.xlu0 %v1600_v30 }
 0x6d2   : > { %v5216_v31 = vpop.eup %5215 }
 0x6d3   : > { %v1603_v32 = vsel %vm1023_vm3, %v5216_v31, 0.0 }
 0x6d4   : > { %1604 = vadd.xlane.f32.xlu1 %v1603_v32 }
 0x759   : > { %v1602_v33 = vpop.xlane.xlu0 %1601 }
 0x75a   : > { %5217 = vrcp.f32 %v1602_v33  ;;  %v5088_v33 = vld [vmem:[%s5389_s18 + $0x298] sm:$0xff]  }
 0x761   : > { %v1605_v35 = vpop.xlane.xlu1 %1604 }
 0x762   : > { %5219 = vrcp.f32 %v1605_v35 }
 0x764   : > { %v5218_v38 = vpop.eup %5217 }
 0x765   : > { %v1608_v42 = vmul.f32 %v5218_v38, %v5214_v29  ;;  %v5089_v38 = vld [vmem:[%s5389_s18 + $0x2a0] sm:$0xff]  }
 0x767   : > { %v1610_v43 = vpack.c.bf16 %v1608_v42, %v1608_v42  ;;  %v5091_v42 = vld [vmem:[%s5389_s18 + $0x2b0] sm:$0xff]  }
 0x769   : > { %4796 = vmatmul.mubr.msk.bf16.vlgmr.msra.gmra.mrb[32].mxu1 %vm1023_vm3, %v1610_v43  ;;  %v5092_v43 = vld [vmem:[%s5389_s18 + $0x2b8] sm:$0xff]  }
 0x76a   : > { %4800 = vmatpush3.bf16.msra.mxu1 %v1662_v44  ;;  %4801 = vmatprep.mubr.msk.bf16.mxu1 %vm5292_vm0, %v5291_v6 }
 0x76b   : > { %4813 = vmatprep.subr.bf16.mxu1 %v5291_v6 }
 0x76c   : > { %v5220_v48 = vpop.eup %5219 }
 0x76d   : > { %v1609_v50 = vmul.f32 %v5220_v48, %v5216_v31 }
 0x76f   : > { %v1611_v57 = vpack.c.bf16 %v1609_v50, %v1609_v50 }
 0x771   : > { %4802 = vmatmul.mubr.msk.bf16.vlgmr.msra.gmra.mrb[36].mxu1 %vm1023_vm3, %v1611_v57 }
 0x772   : > { %4814 = vmatpush3.bf16.msra.mxu1 %v5065_v54  ;;  %4817 = vmatprep.mubr.msk.bf16.mxu1 %vm5292_vm0, %v5291_v6 }
 0x773   : > { %4815 = vmatprep.subr.bf16.mxu1 %v5291_v6 }
 0x776   : > { %4816 = vmatpush3.bf16.msra.mxu1 %v5066_v56 }
 0x777   : > { %4841 = vmatprep.subr.bf16.mxu1 %v5291_v6 }
 0x779   : > { %4818 = vmatmul.mubr.msk.bf16.vlgmr.msra.gmra.mrb[40].mxu1 %vm928_vm1, %v1141_v46  ;;  %v5073_v46 = vld [vmem:[%s5389_s18 + $0x1b0] sm:$0xff]  }
 0x77a   : > { %4842 = vmatpush3.bf16.msra.mxu1 %v5067_v58  ;;  %4857 = vmatprep.mubr.msk.bf16.mxu1 %vm5292_vm0, %v5291_v6  ;;  %v5738_v58 = vsub.s32 2, %v5459_v36 }
 0x77b   : > { %4843 = vmatprep.subr.bf16.mxu1 %v5291_v6 }
 0x77e   : > { %4844 = vmatpush3.bf16.msra.mxu1 %v5068_v59  ;;  %v1842_v59 = vrot.slane %v5539_v13, %v5738_v58  ;;  %v2074_v13 = vrot.slane %v5557_v34, %v5738_v58 }
 0x77f   : > { %4845 = vmatprep.subr.bf16.mxu1 %v5291_v6 }
 0x782   : > { %4846 = vmatpush3.bf16.msra.mxu1 %v5069_v60 }
 0x783   : > { %4847 = vmatprep.subr.bf16.mxu1 %v5291_v6 }
 0x786   : > { %4848 = vmatpush3.bf16.msra.mxu1 %v5070_v61 }
 0x787   : > { %4849 = vmatprep.subr.bf16.mxu1 %v5291_v6 }
 0x78a   : > { %4850 = vmatpush3.bf16.msra.mxu1 %v5071_v40 }
 0x78b   : > { %4851 = vmatprep.subr.bf16.mxu1 %v5291_v6 }
 0x78e   : > { %4852 = vmatpush3.bf16.msra.mxu1 %v5072_v45 }
 0x78f   : > { %4853 = vmatprep.subr.bf16.mxu1 %v5291_v6 }
 0x792   : > { %4854 = vmatpush3.bf16.msra.mxu1 %v5073_v46 }
 0x793   : > { %4855 = vmatprep.subr.bf16.mxu1 %v5291_v6 }
 0x796   : > { %4856 = vmatpush3.bf16.msra.mxu1 %v5074_v62 }
 0x797   : > { %4881 = vmatprep.subr.bf16.mxu1 %v5291_v6 }
 0x799   : > { %4858 = vmatmul.mubr.bf16.vlgmr.msra.gmra.mrb[44].mxu1 %v5473_v51 }
 0x79a   : > { %4883 = vmatprep.mubr.msk.bf16.mxu1 %vm5292_vm0, %v5291_v6 }
 0x83c   : > { %v1652_v1 = vpop.f32.mrb[32].mxu1 }
 0x83d   : > { %v4797_v2 = vpop.f32.mrb[33].mxu1 }
 0x83e   : > { %v1655_v3 = vpop.f32.mrb[34].mxu1 }
 0x83f   : > { %v4798_v4 = vpop.f32.mrb[35].mxu1 }
 0x844   : > { %v1698_v5 = vpop.f32.mrb[36].mxu1 }
 0x845   : > { %v1704_v8 = vpack.c.bf16 %v1698_v5, %v1652_v1  ;;  %v4803_v9 = vpop.f32.mrb[37].mxu1 }
 0x846   : > { %v1701_v47 = vpop.f32.mrb[38].mxu1 }
 0x847   : > { %v4804_v10 = vpop.f32.mrb[39].mxu1  ;;  %4810 = vmatmul.mubr.msk.bf16.vlgmr.msra.gmra.mrb[16].mxu0 %vm928_vm1, %v1704_v8 }
 0x848   : > { %4822 = vmatpush3.bf16.msra.mxu0 %v5077_v7  ;;  %4837 = vmatprep.mubr.msk.bf16.mxu0 %vm5292_vm0, %v5291_v6 }
 0x849   : > { %4823 = vmatprep.subr.bf16.mxu0 %v5291_v6 }
 0x84c   : > { %4824 = vmatpush3.bf16.msra.mxu0 %v5078_v11  ;;  %v5688_v52 = vpop.f32.mrb[40].mxu1 }
 0x84d   : > { %v4819_v14 = vpop.f32.mrb[41].mxu1  ;;  %4825 = vmatprep.subr.bf16.mxu0 %v5291_v6 }
 0x84e   : > { %v5692_v15 = vpop.f32.mrb[42].mxu1 }
 0x84f   : > { %v4820_v16 = vpop.f32.mrb[43].mxu1 }
 0x850   : > { %4826 = vmatpush3.bf16.msra.mxu0 %v5079_v53 }
 0x851   : > { %4827 = vmatprep.subr.bf16.mxu0 %v5291_v6 }
 0x854   : > { %4828 = vmatpush3.bf16.msra.mxu0 %v5080_v49 }
 0x855   : > { %4829 = vmatprep.subr.bf16.mxu0 %v5291_v6 }
 0x858   : > { %4830 = vmatpush3.bf16.msra.mxu0 %v5081_v17 }
 0x859   : > { %4831 = vmatprep.subr.bf16.mxu0 %v5291_v6 }
 0x85c   : > { %4832 = vmatpush3.bf16.msra.mxu0 %v5082_v18 }
 0x85d   : > { %4833 = vmatprep.subr.bf16.mxu0 %v5291_v6 }
 0x860   : > { %4834 = vmatpush3.bf16.msra.mxu0 %v5083_v19 }
 0x861   : > { %4835 = vmatprep.subr.bf16.mxu0 %v5291_v6 }
 0x864   : > { %4836 = vmatpush3.bf16.msra.mxu0 %v5084_v20 }
 0x865   : > { %4861 = vmatprep.subr.bf16.mxu0 %v5291_v6 }
 0x867   : > { %4838 = vmatmul.mubr.bf16.vlgmr.msra.gmra.mrb[20].mxu0 %v5473_v51 }
 0x868   : > { %4862 = vmatpush3.bf16.msra.mxu0 %v5085_v21  ;;  %4877 = vmatprep.mubr.msk.bf16.mxu0 %vm5292_vm0, %v5291_v6 }
 0x869   : > { %4863 = vmatprep.subr.bf16.mxu0 %v5291_v6 }
 0x86c   : > { %v2041_v25 = vpop.f32.mrb[44].mxu1  ;;  %4864 = vmatpush3.bf16.msra.mxu0 %v5086_v23 }
 0x86d   : > { %v2042_v27 = vadd.f32 %v2041_v25, %v1958_v24  ;;  %v4859_v28 = vpop.f32.mrb[45].mxu1  ;;  %4865 = vmatprep.subr.bf16.mxu0 %v5291_v6 }
 0x86e   : > { %v2044_v29 = vpop.f32.mrb[46].mxu1 }
 0x86f   : > { %v4431_v30 = vpack.c.bf16 %v2042_v27, %v2042_v27  ;;  %v2045_v31 = vadd.f32 %v2044_v29, %v1958_v24  ;;  %v4860_v32 = vpop.f32.mrb[47].mxu1 }
 0x870   : > { %4866 = vmatpush3.bf16.msra.mxu0 %v5087_v26 }
 0x871   : > { %v2174_v35 = vsel %vm928_vm1, %v4431_v30, 0  ;;  %4867 = vmatprep.subr.bf16.mxu0 %v5291_v6  ;;  %v4432_v61 = vpack.c.bf16 %v2045_v31, %v2045_v31 }
 0x872   : > { %4882 = vmatpush3.bf16.xpose.msra.mxu1 %v2174_v35 }
 0x873   : > { %4887 = vmatprep.subr.bf16.mxu1 %v5291_v6  ;;  %v2220_v0 = vsel %vm928_vm1, %v4432_v61, 0  ;;  %v5096_v61 = vld [vmem:[%s5389_s18 + $0xd8] sm:$0xff]  }
 0x874   : > { %4868 = vmatpush3.bf16.msra.mxu0 %v5088_v33 }
 0x875   : > { %4869 = vmatprep.subr.bf16.mxu0 %v5291_v6 }
 0x878   : > { %4870 = vmatpush3.bf16.msra.mxu0 %v5089_v38 }
 0x879   : > { %4871 = vmatprep.subr.bf16.mxu0 %v5291_v6 }
 0x87c   : > { %4872 = vmatpush3.bf16.msra.mxu0 %v5090_v39 }
 0x87d   : > { %4873 = vmatprep.subr.bf16.mxu0 %v5291_v6 }
 0x880   : > { %4874 = vmatpush3.bf16.msra.mxu0 %v5091_v42 }
 0x881   : > { %4875 = vmatprep.subr.bf16.mxu0 %v5291_v6 }
 0x884   : > { %4876 = vmatpush3.bf16.msra.mxu0 %v5092_v43 }
 0x885   : > { %4905 = vmatprep.subr.bf16.mxu0 %v5291_v6 }
 0x887   : > { %4878 = vmatmul.mubr.bf16.vlgmr.msra.gmra.mrb[24].mxu0 %v5473_v51 }
 0x888   : > { %4909 = vmatprep.mubr.msk.bf16.mxu0 %vm5292_vm0, %v5291_v6 }
 0x91a   : > { %v1759_v44 = vpop.f32.mrb[16].mxu0 }
 0x91b   : > { %v5732_v48 = vadd.f32 %v5688_v52, %v1759_v44  ;;  %v4811_v50 = vpop.f32.mrb[17].mxu0 }
 0x91c   : > { %v1762_v54 = vpop.f32.mrb[18].mxu0 }
 0x91d   : > { %v5735_v57 = vadd.f32 %v5692_v15, %v1762_v54  ;;  %v4812_v56 = vpop.f32.mrb[19].mxu0  ;;  %v5093_v54 = vld [vmem:[%s5389_s18 + $0xc0] sm:$0xff]  }
 0x93a   : > { %v1925_v60 = vpop.f32.mrb[20].mxu0 }
 0x93b   : > { %v1926_v40 = vadd.f32 %v1925_v60, %v1842_v59  ;;  %v4839_v45 = vpop.f32.mrb[21].mxu0  ;;  %v5095_v60 = vld [vmem:[%s5389_s18 + $0xd0] sm:$0xff]  }
 0x93c   : > { %v1928_v46 = vpop.f32.mrb[22].mxu0  ;;  %v5098_v45 = vld [vmem:[%s5389_s18 + $0xe8] sm:$0xff]  }
 0x93d   : > { %v4429_v62 = vpack.c.bf16 %v1926_v40, %v1926_v40  ;;  %v4840_v63 = vpop.f32.mrb[23].mxu0  ;;  %v1929_v1 = vadd.f32 %v1928_v46, %v1842_v59  ;;  %v5094_v59 = vld [vmem:[%s5389_s18 + $0xc8] sm:$0xff]   ;;  %v5097_v40 = vld [vmem:[%s5389_s18 + $0xe0] sm:$0xff]   ;;  %v5099_v46 = vld [vmem:[%s5389_s18 + $0xf0] sm:$0xff]  }
 0x93e   : > { %v5101_v63 = vld [vmem:[%s5389_s18 + $0x2c0] sm:$0xff]  }
 0x93f   : > { %4884 = vmatmul.mubr.msk.bf16.vlgmr.msra.gmra.mrb[48].mxu1 %vm928_vm1, %v4429_v62  ;;  %v4430_v2 = vpack.c.bf16 %v1929_v1, %v1929_v1  ;;  %v5100_v62 = vld [vmem:[%s5389_s18 + $0xf8] sm:$0xff]   ;;  %v5103_v1 = vld [vmem:[%s5389_s18 + $0x2d0] sm:$0xff]  }
 0x940   : > { %4888 = vmatpush3.bf16.xpose.msra.mxu1 %v2220_v0  ;;  %4889 = vmatprep.mubr.msk.bf16.mxu1 %vm5292_vm0, %v5291_v6  ;;  %v5102_v0 = vld [vmem:[%s5389_s18 + $0x2c8] sm:$0xff]  }
 0x941   : > { %4893 = vmatprep.subr.bf16.mxu1 %v5291_v6 }
 0x947   : > { %4890 = vmatmul.mubr.msk.bf16.vlgmr.msra.gmra.mrb[52].mxu1 %vm928_vm1, %v4430_v2  ;;  %v5104_v2 = vld [vmem:[%s5389_s18 + $0x2d8] sm:$0xff]  }
 0x948   : > { %4895 = vmatprep.mubr.msk.bf16.mxu1 %vm5292_vm0, %v5291_v6 }
 0x95a   : > { %v2157_v3 = vpop.f32.mrb[24].mxu0 }
 0x95b   : > { %v2158_v4 = vadd.f32 %v2157_v3, %v2074_v13  ;;  %v4879_v5 = vpop.f32.mrb[25].mxu0  ;;  %v5106_v3 = vld [vmem:[%s5389_s18 + $0x2e8] sm:$0xff]  }
 0x95c   : > { %v2160_v7 = vpop.f32.mrb[26].mxu0  ;;  %v5108_v5 = vld [vmem:[%s5389_s18 + $0x2f8] sm:$0xff]  }
 0x95d   : > { %v4433_v8 = vpack.c.bf16 %v2158_v4, %v2158_v4  ;;  %v2161_v9 = vadd.f32 %v2160_v7, %v2074_v13  ;;  %v4880_v47 = vpop.f32.mrb[27].mxu0  ;;  %v5105_v13 = vld [vmem:[%s5389_s18 + $0x2e0] sm:$0xff]   ;;  %v5107_v4 = vld [vmem:[%s5389_s18 + $0x2f0] sm:$0xff]  }
 0x95e   : > { %v5109_v7 = vld [vmem:[%s5394_s25 + $0x20] sm:$0xff]  }
 0x95f   : > { %v2292_v10 = vsel %vm1051_vm2, %v4433_v8, 0  ;;  %v4434_v38 = vpack.c.bf16 %v2161_v9, %v2161_v9  ;;  %4906 = vmatpush3.bf16.msra.mxu0 %v5109_v7  ;;  %v5110_v8 = vld [vmem:[%s5394_s25 + $0x28] sm:$0xff]  }
 0x960   : > { %4894 = vmatpush3.bf16.msra.mxu1 %v2292_v10  ;;  %4907 = vmatprep.subr.bf16.mxu0 %v5291_v6 }
 0x961   : > { %4899 = vmatprep.subr.bf16.mxu1 %v5291_v6  ;;  %v2338_v43 = vsel %vm1051_vm2, %v4434_v38, 0 }
 0x963   : > { %4908 = vmatpush3.bf16.msra.mxu0 %v5110_v8 }
 0x964   : > { %4933 = vmatprep.subr.bf16.mxu0 %v5291_v6 }
 0xa12   : > { %v2210_v11 = vpop.f32.mrb[48].mxu1 }
 0xa13   : > { %v2262_v52 = vmul.f32 0.17677669, %v2210_v11  ;;  %v4885_v53 = vpop.f32.mrb[49].mxu1 }
 0xa14   : > { %v2213_v14 = vpop.f32.mrb[50].mxu1  ;;  %v5111_v53 = vld [vmem:[%s5389_s18 + $0x1c0] sm:$0xff]  }
 0xa15   : > { %v4886_v15 = vpop.f32.mrb[51].mxu1  ;;  %v2264_v16 = vsel %vm1023_vm3, %v2262_v52, -inf }
 0xa16   : > { %2265 = vmax.xlane.f32.xlu0 %v2264_v16 }
 0xa1a   : > { %v2256_v49 = vpop.f32.mrb[52].mxu1 }
 0xa1b   : > { %v2263_v17 = vmul.f32 0.17677669, %v2256_v49  ;;  %v4891_v18 = vpop.f32.mrb[53].mxu1 }
 0xa1c   : > { %v2259_v19 = vpop.f32.mrb[54].mxu1  ;;  %v5113_v18 = vld [vmem:[%s5389_s18 + $0x1d0] sm:$0xff]  }
 0xa1d   : > { %v4892_v20 = vpop.f32.mrb[55].mxu1  ;;  %v2267_v21 = vsel %vm1023_vm3, %v2263_v17, -inf  ;;  %v5114_v19 = vld [vmem:[%s5389_s18 + $0x1d8] sm:$0xff]  }
 0xa1e   : > { %2268 = vmax.xlane.f32.xlu1 %v2267_v21  ;;  %v5115_v20 = vld [vmem:[%s5389_s18 + $0x1e0] sm:$0xff]   ;;  %v5116_v21 = vld [vmem:[%s5389_s18 + $0x1e8] sm:$0xff]  }
 0xaa3   : > { %v2266_v22 = vpop.xlane.xlu0 %2265 }
 0xaa4   : > { %v2270_v23 = vsub.f32 %v2262_v52, %v2266_v22  ;;  %v5117_v22 = vld [vmem:[%s5389_s18 + $0x1f0] sm:$0xff]  }
 0xaa6   : > { %v2272_v24 = vmul.f32 1.442695, %v2270_v23  ;;  %v5118_v23 = vld [vmem:[%s5389_s18 + $0x1f8] sm:$0xff]  }
 0xaa8   : > { %5221 = vpow2.f32 %v2272_v24 }
 0xaab   : > { %v2269_v25 = vpop.xlane.xlu1 %2268 }
 0xaac   : > { %v2271_v26 = vsub.f32 %v2263_v17, %v2269_v25  ;;  %v5112_v17 = vld [vmem:[%s5389_s18 + $0x1c8] sm:$0xff]  }
 0xaae   : > { %v2274_v27 = vmul.f32 1.442695, %v2271_v26 }
 0xab0   : > { %5223 = vpow2.f32 %v2274_v27 }
 0xab2   : > { %v5222_v28 = vpop.eup %5221 }
 0xab3   : > { %v2276_v29 = vsel %vm1023_vm3, %v5222_v28, 0.0 }
 0xab4   : > { %2277 = vadd.xlane.f32.xlu0 %v2276_v29 }
 0xaba   : > { %v5224_v30 = vpop.eup %5223 }
 0xabb   : > { %v2279_v31 = vsel %vm1023_vm3, %v5224_v30, 0.0 }
 0xabc   : > { %2280 = vadd.xlane.f32.xlu1 %v2279_v31 }
 0xb41   : > { %v2278_v32 = vpop.xlane.xlu0 %2277 }
 0xb42   : > { %5225 = vrcp.f32 %v2278_v32 }
 0xb49   : > { %v2281_v33 = vpop.xlane.xlu1 %2280 }
 0xb4a   : > { %5227 = vrcp.f32 %v2281_v33 }
 0xb4c   : > { %v5226_v35 = vpop.eup %5225 }
 0xb4d   : > { %v2284_v39 = vmul.f32 %v5226_v35, %v5222_v28  ;;  %v5831_v28 = vsub.s32 3, %v5459_v36 }
 0xb4f   : > { %v2286_v42 = vpack.c.bf16 %v2284_v39, %v2284_v39 }
 0xb51   : > { %4896 = vmatmul.mubr.msk.bf16.vlgmr.msra.gmra.mrb[56].mxu1 %vm1023_vm3, %v2286_v42 }
 0xb52   : > { %4900 = vmatpush3.bf16.msra.mxu1 %v2338_v43  ;;  %4901 = vmatprep.mubr.msk.bf16.mxu1 %vm5292_vm0, %v5291_v6 }
 0xb53   : > { %4913 = vmatprep.subr.bf16.mxu1 %v5291_v6 }
 0xb54   : > { %v5228_v44 = vpop.eup %5227 }
 0xb55   : > { %v2285_v50 = vmul.f32 %v5228_v44, %v5224_v30  ;;  %v2696_v30 = vrot.slane %v5557_v34, %v5831_v28 }
 0xb57   : > { %v2287_v56 = vpack.c.bf16 %v2285_v50, %v2285_v50  ;;  %v2579_v50 = vsub.s32 7, %v5459_v36 }
 0xb59   : > { %4902 = vmatmul.mubr.msk.bf16.vlgmr.msra.gmra.mrb[60].mxu1 %vm1023_vm3, %v2287_v56 }
 0xb5a   : > { %4914 = vmatpush3.bf16.msra.mxu1 %v5093_v54  ;;  %4929 = vmatprep.mubr.msk.bf16.mxu1 %vm5292_vm0, %v5291_v6  ;;  %v5273_v54 = vld [vmem:[%s5379_s29] sm:$0xff] }
 0xb5b   : > { %4915 = vmatprep.subr.bf16.mxu1 %v5291_v6  ;;  %v2580_v56 = vrot.slane %v5273_v54, %v2579_v50  ;;  %v5119_v50 = vld [vmem:[%s5394_s25 + $0x30] sm:$0xff]  }
 0xb5e   : > { %4916 = vmatpush3.bf16.msra.mxu1 %v5094_v59 }
 0xb5f   : > { %4917 = vmatprep.subr.bf16.mxu1 %v5291_v6 }
 0xb62   : > { %4918 = vmatpush3.bf16.msra.mxu1 %v5095_v60 }
 0xb63   : > { %4919 = vmatprep.subr.bf16.mxu1 %v5291_v6 }
 0xb66   : > { %4920 = vmatpush3.bf16.msra.mxu1 %v5096_v61 }
 0xb67   : > { %4921 = vmatprep.subr.bf16.mxu1 %v5291_v6 }
 0xb6a   : > { %4922 = vmatpush3.bf16.msra.mxu1 %v5097_v40  ;;  %v2464_v40 = vrot.slane %v5273_v54, %v5831_v28 }
 0xb6b   : > { %4923 = vmatprep.subr.bf16.mxu1 %v5291_v6 }
 0xb6e   : > { %4924 = vmatpush3.bf16.msra.mxu1 %v5098_v45 }
 0xb6f   : > { %4925 = vmatprep.subr.bf16.mxu1 %v5291_v6 }
 0xb72   : > { %4926 = vmatpush3.bf16.msra.mxu1 %v5099_v46 }
 0xb73   : > { %4927 = vmatprep.subr.bf16.mxu1 %v5291_v6 }
 0xb76   : > { %4928 = vmatpush3.bf16.msra.mxu1 %v5100_v62 }
 0xb77   : > { %4953 = vmatprep.subr.bf16.mxu1 %v5291_v6 }
 0xb79   : > { %4930 = vmatmul.mubr.bf16.vlgmr.msra.gmra.mrb[64].mxu1 %v5473_v51 }
 0xb7a   : > { %4954 = vmatpush3.bf16.msra.mxu1 %v5101_v63  ;;  %4969 = vmatprep.mubr.msk.bf16.mxu1 %vm5292_vm0, %v5291_v6 }
 0xb7b   : > { %4955 = vmatprep.subr.bf16.mxu1 %v5291_v6 }
 0xb7e   : > { %4956 = vmatpush3.bf16.msra.mxu1 %v5102_v0 }
 0xb7f   : > { %4957 = vmatprep.subr.bf16.mxu1 %v5291_v6 }
 0xb82   : > { %4958 = vmatpush3.bf16.msra.mxu1 %v5103_v1 }
 0xb83   : > { %4959 = vmatprep.subr.bf16.mxu1 %v5291_v6 }
 0xb86   : > { %4960 = vmatpush3.bf16.msra.mxu1 %v5104_v2 }
 0xb87   : > { %4961 = vmatprep.subr.bf16.mxu1 %v5291_v6 }
 0xb8a   : > { %4962 = vmatpush3.bf16.msra.mxu1 %v5105_v13 }
 0xb8b   : > { %4963 = vmatprep.subr.bf16.mxu1 %v5291_v6 }
 0xb8e   : > { %4964 = vmatpush3.bf16.msra.mxu1 %v5106_v3 }
 0xb8f   : > { %4965 = vmatprep.subr.bf16.mxu1 %v5291_v6 }
 0xb92   : > { %4966 = vmatpush3.bf16.msra.mxu1 %v5107_v4 }
 0xb93   : > { %4967 = vmatprep.subr.bf16.mxu1 %v5291_v6 }
 0xb96   : > { %4968 = vmatpush3.bf16.msra.mxu1 %v5108_v5 }
 0xb97   : > { %4997 = vmatprep.subr.bf16.mxu1 %v5291_v6 }
 0xb99   : > { %4970 = vmatmul.mubr.bf16.vlgmr.msra.gmra.mrb[68].mxu1 %v5473_v51 }
 0xb9a   : > { %5001 = vmatprep.mubr.msk.bf16.mxu1 %vm5292_vm0, %v5291_v6  ;;  %4998 = vmatpush3.bf16.msra.mxu1 %v5119_v50  ;;  %v5162_v50 = vld [vmem:[%s5399_s5 + $0xcc] ss:$16 sps:$4 sm:$0xff]  }
 0xb9b   : > { %4999 = vmatprep.subr.bf16.mxu1 %v5291_v6 }
 0xc24   : > { %v2328_v9 = vpop.f32.mrb[56].mxu1 }
 0xc25   : > { %v4897_v47 = vpop.f32.mrb[57].mxu1 }
 0xc26   : > { %v2331_v10 = vpop.f32.mrb[58].mxu1 }
 0xc27   : > { %v4898_v11 = vpop.f32.mrb[59].mxu1 }
 0xc2c   : > { %v2374_v52 = vpop.f32.mrb[60].mxu1 }
 0xc2d   : > { %v2380_v14 = vpack.c.bf16 %v2374_v52, %v2328_v9  ;;  %v4903_v15 = vpop.f32.mrb[61].mxu1 }
 0xc2e   : > { %v2377_v16 = vpop.f32.mrb[62].mxu1 }
 0xc2f   : > { %v4904_v49 = vpop.f32.mrb[63].mxu1  ;;  %4910 = vmatmul.mubr.msk.bf16.vlgmr.msra.gmra.mrb[28].mxu0 %vm928_vm1, %v2380_v14 }
 0xc30   : > { %4934 = vmatpush3.bf16.msra.mxu0 %v5111_v53  ;;  %4949 = vmatprep.mubr.msk.bf16.mxu0 %vm5292_vm0, %v5291_v6 }
 0xc31   : > { %4935 = vmatprep.subr.bf16.mxu0 %v5291_v6 }
 0xc34   : > { %4936 = vmatpush3.bf16.msra.mxu0 %v5112_v17 }
 0xc35   : > { %4937 = vmatprep.subr.bf16.mxu0 %v5291_v6 }
 0xc38   : > { %4938 = vmatpush3.bf16.msra.mxu0 %v5113_v18 }
 0xc39   : > { %4939 = vmatprep.subr.bf16.mxu0 %v5291_v6 }
 0xc3c   : > { %4940 = vmatpush3.bf16.msra.mxu0 %v5114_v19 }
 0xc3d   : > { %4941 = vmatprep.subr.bf16.mxu0 %v5291_v6 }
 0xc40   : > { %4942 = vmatpush3.bf16.msra.mxu0 %v5115_v20 }
 0xc41   : > { %4943 = vmatprep.subr.bf16.mxu0 %v5291_v6 }
 0xc44   : > { %4944 = vmatpush3.bf16.msra.mxu0 %v5116_v21 }
 0xc45   : > { %4945 = vmatprep.subr.bf16.mxu0 %v5291_v6 }
 0xc48   : > { %4946 = vmatpush3.bf16.msra.mxu0 %v5117_v22 }
 0xc49   : > { %4947 = vmatprep.subr.bf16.mxu0 %v5291_v6 }
 0xc4c   : > { %v2547_v24 = vpop.f32.mrb[64].mxu1  ;;  %4948 = vmatpush3.bf16.msra.mxu0 %v5118_v23 }
 0xc4d   : > { %v4931_v25 = vpop.f32.mrb[65].mxu1  ;;  %4973 = vmatprep.subr.bf16.mxu0 %v5291_v6  ;;  %v2548_v63 = vadd.f32 %v2547_v24, %v2464_v40 }
 0xc4e   : > { %v2550_v26 = vpop.f32.mrb[66].mxu1 }
 0xc4f   : > { %v4932_v27 = vpop.f32.mrb[67].mxu1  ;;  %4950 = vmatmul.mubr.bf16.vlgmr.msra.gmra.mrb[32].mxu0 %v5473_v51  ;;  %v4435_v0 = vpack.c.bf16 %v2548_v63, %v2548_v63  ;;  %v2551_v13 = vadd.f32 %v2550_v26, %v2464_v40  ;;  %v5875_v63 = vld [vmem:[%s5374_s26] sm:$0xff] }
 0xc50   : > { %4975 = vmatprep.mubr.msk.bf16.mxu0 %vm5292_vm0, %v5291_v6 }
 0xc51   : > { %v4436_v4 = vpack.c.bf16 %v2551_v13, %v2551_v13 }
 0xc6c   : > { %v2779_v29 = vpop.f32.mrb[68].mxu1 }
 0xc6d   : > { %v4971_v31 = vpop.f32.mrb[69].mxu1  ;;  %v2780_v1 = vadd.f32 %v2779_v29, %v2696_v30 }
 0xc6e   : > { %v2782_v32 = vpop.f32.mrb[70].mxu1 }
 0xc6f   : > { %v5835_v33 = vadd.f32 %v2782_v32, %v2696_v30  ;;  %v4972_v35 = vpop.f32.mrb[71].mxu1  ;;  %v4439_v3 = vpack.c.bf16 %v2780_v1, %v2780_v1  ;;  %v5275_v1 = vld [vmem:[#allocation2] sm:$0xff] }
 0xc71   : > { %v2914_v5 = vsel %vm1051_vm2, %v4439_v3, 0  ;;  %v4440_v31 = vpack.c.bf16 %v5835_v33, %v5835_v33  ;;  %v5120_v33 = vld [vmem:[%s5394_s25 + $0x38] sm:$0xff]  }
 0xc72   : > { %5000 = vmatpush3.bf16.msra.mxu1 %v5120_v33  ;;  %v5157_v33 = vld [vmem:[%s5399_s5 + $0xc0] ss:$16 sps:$4 sm:$0xff]  }
 0xd02   : > { %v2435_v38 = vpop.f32.mrb[28].mxu0 }
 0xd03   : > { %v5838_v39 = vadd.f32 %v2435_v38, %v5732_v48  ;;  %v4911_v51 = vpop.f32.mrb[29].mxu0  ;;  %v2960_v38 = vsel %vm1051_vm2, %v4440_v31, 0  ;;  %v5145_v31 = vld [vmem:[%s5399_s5 + $0x80] ss:$16 sps:$4 sm:$0xff]  }
 0xd04   : > { %v2438_v42 = vpop.f32.mrb[30].mxu0 }
 0xd05   : > { %v5841_v43 = vadd.f32 %v2438_v42, %v5735_v57  ;;  %v4912_v44 = vpop.f32.mrb[31].mxu0 }
 0xd22   : > { %v2663_v34 = vpop.f32.mrb[32].mxu0 }
 0xd23   : > { %v2664_v59 = vadd.f32 %v2663_v34, %v2580_v56  ;;  %v4951_v60 = vpop.f32.mrb[33].mxu0 }
 0xd24   : > { %v2666_v61 = vpop.f32.mrb[34].mxu0 }
 0xd25   : > { %v4437_v45 = vpack.c.bf16 %v2664_v59, %v2664_v59  ;;  %v4952_v46 = vpop.f32.mrb[35].mxu0  ;;  %v2667_v62 = vadd.f32 %v2666_v61, %v2580_v56 }
 0xd27   : > { %v2796_v48 = vsel %vm928_vm1, %v4437_v45, 0  ;;  %v4438_v57 = vpack.c.bf16 %v2667_v62, %v2667_v62 }
 0xd28   : > { %4974 = vmatpush3.bf16.xpose.msra.mxu0 %v2796_v48 }
 0xd29   : > { %4979 = vmatprep.subr.bf16.mxu0 %v5291_v6  ;;  %v2842_v2 = vsel %vm928_vm1, %v4438_v57, 0  ;;  %v3071_v57 = vrot.slane %v5875_v63, %v715_v12  ;;  %v5121_v12 = vld [vmem:[%s5399_s5] ss:$16 sps:$4 sm:$0xff]  }
 0xd2f   : > { %4976 = vmatmul.mubr.msk.bf16.vlgmr.msra.gmra.mrb[36].mxu0 %vm928_vm1, %v4435_v0 }
 0xd30   : > { %4980 = vmatpush3.bf16.xpose.msra.mxu0 %v2842_v2  ;;  %4981 = vmatprep.mubr.msk.bf16.mxu0 %vm5292_vm0, %v5291_v6 }
 0xd31   : > { %4985 = vmatprep.subr.bf16.mxu0 %v5291_v6 }
 0xd37   : > { %4982 = vmatmul.mubr.msk.bf16.vlgmr.msra.gmra.mrb[40].mxu0 %vm928_vm1, %v4436_v4 }
 0xd38   : > { %4986 = vmatpush3.bf16.msra.mxu0 %v2914_v5  ;;  %4987 = vmatprep.mubr.msk.bf16.mxu0 %vm5292_vm0, %v5291_v6 }
 0xd39   : > { %4991 = vmatprep.subr.bf16.mxu0 %v5291_v6 }
 0xe02   : > { %v2832_v7 = vpop.f32.mrb[36].mxu0 }
 0xe03   : > { %v2884_v8 = vmul.f32 0.17677669, %v2832_v7  ;;  %v4977_v9 = vpop.f32.mrb[37].mxu0 }
 0xe04   : > { %v2835_v47 = vpop.f32.mrb[38].mxu0  ;;  %v5124_v9 = vld [vmem:[%s5399_s5 + $0x8] ss:$16 sps:$4 sm:$0xff]  }
 0xe05   : > { %v4978_v10 = vpop.f32.mrb[39].mxu0  ;;  %v2886_v11 = vsel %vm1023_vm3, %v2884_v8, -inf  ;;  %v5126_v47 = vld [vmem:[%s5399_s5 + $0xc] ss:$16 sps:$4 sm:$0xff]  }
 0xe06   : > { %2887 = vmax.xlane.f32.xlu0 %v2886_v11  ;;  %v5129_v10 = vld [vmem:[%s5399_s5 + $0x24] ss:$16 sps:$4 sm:$0xff]   ;;  %3366 = vmatprep.subr.bf16.mxu1 %v5126_v47  ;;  %v5127_v11 = vld [vmem:[%s5399_s5 + $0x20] ss:$16 sps:$4 sm:$0xff]  }
 0xe07   : > { %v5169_v47 = vld [vmem:[%s5404_s13 + $0x40] sm:$0xff]  }
 0xe0a   : > { %v2878_v52 = vpop.f32.mrb[40].mxu0 }
 0xe0b   : > { %v2885_v53 = vmul.f32 0.17677669, %v2878_v52  ;;  %v4983_v14 = vpop.f32.mrb[41].mxu0  ;;  %v5130_v52 = vld [vmem:[%s5399_s5 + $0x28] ss:$16 sps:$4 sm:$0xff]  }
 0xe0c   : > { %v2881_v15 = vpop.f32.mrb[42].mxu0 }
 0xe0d   : > { %v4984_v16 = vpop.f32.mrb[43].mxu0  ;;  %v2889_v49 = vsel %vm1023_vm3, %v2885_v53, -inf }
 0xe0e   : > { %2890 = vmax.xlane.f32.xlu1 %v2889_v49 }
 0xe93   : > { %v2888_v17 = vpop.xlane.xlu0 %2887 }
 0xe94   : > { %v2892_v18 = vsub.f32 %v2884_v8, %v2888_v17  ;;  %v5123_v8 = vld [vmem:[%s5399_s5 + $0x4] ss:$16 sps:$4 sm:$0xff]  }
 0xe96   : > { %v2894_v19 = vmul.f32 1.442695, %v2892_v18 }
 0xe98   : > { %5229 = vpow2.f32 %v2894_v19 }
 0xe9b   : > { %v2891_v20 = vpop.xlane.xlu1 %2890 }
 0xe9c   : > { %v2893_v21 = vsub.f32 %v2885_v53, %v2891_v20  ;;  %v5135_v20 = vld [vmem:[%s5399_s5 + $0x44] ss:$16 sps:$4 sm:$0xff]  }
 0xe9e   : > { %v2896_v22 = vmul.f32 1.442695, %v2893_v21  ;;  %v5138_v21 = vld [vmem:[%s5399_s5 + $0x4c] ss:$16 sps:$4 sm:$0xff]  }
 0xea0   : > { %5231 = vpow2.f32 %v2896_v22  ;;  %v5133_v22 = vld [vmem:[%s5399_s5 + $0x40] ss:$16 sps:$4 sm:$0xff]  }
 0xea2   : > { %v5230_v23 = vpop.eup %5229 }
 0xea3   : > { %v2898_v24 = vsel %vm1023_vm3, %v5230_v23, 0.0 }
 0xea4   : > { %2899 = vadd.xlane.f32.xlu0 %v2898_v24  ;;  %v5141_v24 = vld [vmem:[%s5399_s5 + $0x64] ss:$16 sps:$4 sm:$0xff]  }
 0xeaa   : > { %v5232_v25 = vpop.eup %5231 }
 0xeab   : > { %v2901_v26 = vsel %vm1023_vm3, %v5232_v25, 0.0 }
 0xeac   : > { %2902 = vadd.xlane.f32.xlu1 %v2901_v26  ;;  %v5139_v26 = vld [vmem:[%s5399_s5 + $0x60] ss:$16 sps:$4 sm:$0xff]  }
 0xf31   : > { %v2900_v27 = vpop.xlane.xlu0 %2899 }
 0xf32   : > { %5233 = vrcp.f32 %v2900_v27  ;;  %v5142_v27 = vld [vmem:[%s5399_s5 + $0x68] ss:$16 sps:$4 sm:$0xff]  }
 0xf39   : > { %v2903_v29 = vpop.xlane.xlu1 %2902 }
 0xf3a   : > { %5235 = vrcp.f32 %v2903_v29  ;;  %v5147_v29 = vld [vmem:[%s5399_s5 + $0x84] ss:$16 sps:$4 sm:$0xff]  }
 0xf3c   : > { %v5234_v30 = vpop.eup %5233 }
 0xf3d   : > { %v2906_v32 = vmul.f32 %v5234_v30, %v5230_v23  ;;  %v5136_v23 = vld [vmem:[%s5399_s5 + $0x48] ss:$16 sps:$4 sm:$0xff]   ;;  %v5150_v30 = vld [vmem:[%s5399_s5 + $0x8c] ss:$16 sps:$4 sm:$0xff]  }
 0xf3f   : > { %v2908_v35 = vpack.c.bf16 %v2906_v32, %v2906_v32  ;;  %v5148_v32 = vld [vmem:[%s5399_s5 + $0x88] ss:$16 sps:$4 sm:$0xff]  }
 0xf41   : > { %4988 = vmatmul.mubr.msk.bf16.vlgmr.msra.gmra.mrb[44].mxu0 %vm1023_vm3, %v2908_v35  ;;  %v5153_v35 = vld [vmem:[%s5399_s5 + $0xa4] ss:$16 sps:$4 sm:$0xff]  }
 0xf42   : > { %4992 = vmatpush3.bf16.msra.mxu0 %v2960_v38  ;;  %4993 = vmatprep.mubr.msk.bf16.mxu0 %vm5292_vm0, %v5291_v6  ;;  %v5156_v38 = vld [vmem:[%s5399_s5 + $0xac] ss:$16 sps:$4 sm:$0xff]  }
 0xf43   : > { %3323 = vmatprep.subr.bf16.mxu0 %v5123_v8 }
 0xf44   : > { %v5236_v51 = vpop.eup %5235 }
 0xf45   : > { %v2907_v42 = vmul.f32 %v5236_v51, %v5232_v25  ;;  %v5144_v25 = vld [vmem:[%s5399_s5 + $0x6c] ss:$16 sps:$4 sm:$0xff]   ;;  %v5151_v51 = vld [vmem:[%s5399_s5 + $0xa0] ss:$16 sps:$4 sm:$0xff]  }
 0xf47   : > { %v2909_v44 = vpack.c.bf16 %v2907_v42, %v2907_v42  ;;  %v5154_v42 = vld [vmem:[%s5399_s5 + $0xa8] ss:$16 sps:$4 sm:$0xff]  }
 0xf49   : > { %4994 = vmatmul.mubr.msk.bf16.vlgmr.msra.gmra.mrb[48].mxu0 %vm1023_vm3, %v2909_v44  ;;  %v5159_v44 = vld [vmem:[%s5399_s5 + $0xc4] ss:$16 sps:$4 sm:$0xff]  }
 0xf4a   : > { %3324 = vmatpush1.bf16.msra.mxu0 %v5121_v12 }
 0xf4b   : > { %3325 = vmatprep.subr.bf16.mxu0 %v5129_v10  ;;  %v5170_v10 = vld [vmem:[%s5404_s13 + $0xc0] sm:$0xff]  }
 0xf4e   : > { %3326 = vmatpush1.bf16.msra.mxu0 %v5127_v11  ;;  %v5172_v11 = vld [vmem:[%s5404_s13 + $0x80] sm:$0xff]  }
 0xf4f   : > { %3327 = vmatprep.subr.bf16.mxu0 %v5135_v20  ;;  %v5182_v20 = vld [vmem:[%s5404_s13 + $0xd8] sm:$0xff]  }
 0xf52   : > { %3328 = vmatpush1.bf16.msra.mxu0 %v5133_v22  ;;  %v5184_v22 = vld [vmem:[%s5404_s13 + $0x98] sm:$0xff]  }
 0xf53   : > { %3329 = vmatprep.subr.bf16.mxu0 %v5141_v24  ;;  %v5186_v24 = vld [vmem:[%s5404_s13 + $0xe0] sm:$0xff]  }
 0xf56   : > { %3330 = vmatpush1.bf16.msra.mxu0 %v5139_v26  ;;  %v5188_v26 = vld [vmem:[%s5404_s13 + $0xa0] sm:$0xff]  }
 0xf57   : > { %3331 = vmatprep.subr.bf16.mxu0 %v5147_v29  ;;  %v5190_v29 = vld [vmem:[%s5404_s13 + $0xe8] sm:$0xff]  }
 0xf5a   : > { %3332 = vmatpush1.bf16.msra.mxu0 %v5145_v31  ;;  %v5192_v31 = vld [vmem:[%s5404_s13 + $0xa8] sm:$0xff]  }
 0xf5b   : > { %3333 = vmatprep.subr.bf16.mxu0 %v5153_v35  ;;  %v5194_v35 = vld [vmem:[%s5404_s13 + $0xf0] sm:$0xff]  }
 0xf5e   : > { %3334 = vmatpush1.bf16.msra.mxu0 %v5151_v51  ;;  %v5196_v51 = vld [vmem:[%s5404_s13 + $0xb0] sm:$0xff]  }
 0xf5f   : > { %3335 = vmatprep.subr.bf16.mxu0 %v5159_v44  ;;  %v5198_v44 = vld [vmem:[%s5404_s13 + $0xf8] sm:$0xff]  }
 0xf62   : > { %3336 = vmatpush1.bf16.msra.mxu0 %v5157_v33  ;;  %v5200_v33 = vld [vmem:[%s5404_s13 + $0xb8] sm:$0xff]  }
0x1014   : > { %v2950_v54 = vpop.f32.mrb[44].mxu0 }
0x1015   : > { %v4989_v56 = vpop.f32.mrb[45].mxu0 }
0x1016   : > { %v2953_v34 = vpop.f32.mrb[46].mxu0  ;;  %v5165_v56 = vld [vmem:[%s5399_s5 + $0xe4] ss:$16 sps:$4 sm:$0xff]  }
0x1017   : > { %v4990_v59 = vpop.f32.mrb[47].mxu0  ;;  %v5168_v34 = vld [vmem:[%s5399_s5 + $0xec] ss:$16 sps:$4 sm:$0xff]   ;;  %3337 = vmatprep.subr.bf16.mxu0 %v5165_v56 }
0x1018   : > { %v5163_v59 = vld [vmem:[%s5399_s5 + $0xe0] ss:$16 sps:$4 sm:$0xff]  }
0x1019   : > { %3338 = vmatpush1.bf16.msra.mxu0 %v5163_v59 }
0x101a   : > { %4593 = vmatprep.subr.bf16.mxu0 %v5169_v47 }
0x101c   : > { %v2996_v60 = vpop.f32.mrb[48].mxu0 }
0x101d   : > { %v3002_v61 = vpack.c.bf16 %v2996_v60, %v2950_v54  ;;  %v4995_v40 = vpop.f32.mrb[49].mxu0  ;;  %v5160_v54 = vld [vmem:[%s5399_s5 + $0xc8] ss:$16 sps:$4 sm:$0xff]  }
0x101e   : > { %v2999_v45 = vpop.f32.mrb[50].mxu0  ;;  %v5166_v60 = vld [vmem:[%s5399_s5 + $0xe8] ss:$16 sps:$4 sm:$0xff]  }
0x101f   : > { %v4996_v46 = vpop.f32.mrb[51].mxu0  ;;  %5002 = vmatmul.mubr.msk.bf16.vlgmr.msra.gmra.mrb[72].mxu1 %vm928_vm1, %v3002_v61  ;;  %v5293_v61 = vmov 0  }
0x1020   : > { %3367 = vmatpush1.bf16.msra.mxu1 %v5124_v9  ;;  %3355 = vmatprep.mubr.bf16.mxu0 %v5293_v61 }
0x1021   : > { %3398 = vmatprep.mubr.bf16.mxu1 %v5293_v61 }
0x10f2   : > { %v3057_v48 = vpop.f32.mrb[72].mxu1 }
0x10f3   : > { %v3064_v62 = vadd.f32 %v3057_v48, %v5838_v39  ;;  %v5003_v6 = vpop.f32.mrb[73].mxu1  ;;  %v5276_v39 = vld [vmem:[#allocation2 + $0x8] sm:$0xff] }
0x10f4   : > { %v3060_v0 = vpop.f32.mrb[74].mxu1 }
0x10f5   : > { %v3066_v2 = vadd.f32 %v5275_v1, %v3064_v62  ;;  %v3065_v13 = vadd.f32 %v3060_v0, %v5841_v43  ;;  %v5004_v3 = vpop.f32.mrb[75].mxu1  ;;  %v5132_v43 = vld [vmem:[%s5399_s5 + $0x2c] ss:$16 sps:$4 sm:$0xff]  }
0x10f6   : > { %3368 = vmatprep.subr.bf16.mxu1 %v5132_v43  ;;  %v5171_v43 = vld [vmem:[%s5404_s13] sm:$0xff]  }
0x10f7   : > { %v3067_v4 = vadd.f32 %v5276_v39, %v3065_v13  ;;  %v5881_v5 = vadd.f32 %v3071_v57, %v3066_v2  ;;  %3369 = vmatpush1.bf16.msra.mxu1 %v5130_v52  ;;  %v3105_v39 = vrot.slane %v5875_v63, %v5831_v28  ;;  %v5173_v52 = vld [vmem:[%s5404_s13 + $0x48] sm:$0xff]  }
0x10f8   : > { %3370 = vmatprep.subr.bf16.mxu1 %v5138_v21  ;;  %v5183_v21 = vld [vmem:[%s5404_s13 + $0x18] sm:$0xff]  }
0x10f9   : > { %3074 = vadd.xlane.f32.xlu0 %v5881_v5  ;;  %v5884_v7 = vadd.f32 %v3071_v57, %v3067_v4  ;;  %v3099_v57 = vrot.slane %v5875_v63, %v5738_v58 }
0x10fb   : > { %3076 = vadd.xlane.f32.xlu1 %v5884_v7  ;;  %3371 = vmatpush1.bf16.msra.mxu1 %v5136_v23  ;;  %v5185_v23 = vld [vmem:[%s5404_s13 + $0x60] sm:$0xff]  }
0x10fc   : > { %3372 = vmatprep.subr.bf16.mxu1 %v5144_v25  ;;  %v5187_v25 = vld [vmem:[%s5404_s13 + $0x20] sm:$0xff]  }
0x10ff   : > { %3373 = vmatpush1.bf16.msra.mxu1 %v5142_v27  ;;  %v5189_v27 = vld [vmem:[%s5404_s13 + $0x68] sm:$0xff]  }
0x1100   : > { %3374 = vmatprep.subr.bf16.mxu1 %v5150_v30  ;;  %v5191_v30 = vld [vmem:[%s5404_s13 + $0x28] sm:$0xff]  }
0x1103   : > { %3375 = vmatpush1.bf16.msra.mxu1 %v5148_v32  ;;  %v5193_v32 = vld [vmem:[%s5404_s13 + $0x70] sm:$0xff]  }
0x1104   : > { %3376 = vmatprep.subr.bf16.mxu1 %v5156_v38  ;;  %v5195_v38 = vld [vmem:[%s5404_s13 + $0x30] sm:$0xff]  }
0x1107   : > { %3377 = vmatpush1.bf16.msra.mxu1 %v5154_v42  ;;  %v5197_v42 = vld [vmem:[%s5404_s13 + $0x78] sm:$0xff]  }
0x1108   : > { %3378 = vmatprep.subr.bf16.mxu1 %v5162_v50  ;;  %v5199_v50 = vld [vmem:[%s5404_s13 + $0x38] sm:$0xff]  }
0x110b   : > { %3379 = vmatpush1.bf16.msra.mxu1 %v5160_v54  ;;  %v3141_v54 = vld [vmem:[%s5384_s14] sm:$0xf] }
0x110c   : > { %3380 = vmatprep.subr.bf16.mxu1 %v5168_v34  ;;  %v3146_v56 = vrot.slane %v3141_v54, %v5462_v37  ;;  %v3154_v34 = vrot.slane %v3141_v54, %v5738_v58  ;;  %v3150_v59 = vrot.slane %v3141_v54, %v5467_v41 }
0x110f   : > { %3381 = vmatpush1.bf16.msra.mxu1 %v5166_v60  ;;  %v3158_v60 = vrot.slane %v3141_v54, %v5831_v28 }
0x1110   : > { %4615 = vmatprep.subr.bf16.mxu1 %v5170_v10 }
0x1186   : > { %v3075_v53 = vpop.xlane.xlu0 %3074 }
0x1187   : > { %v3078_v14 = vmul.f32 0.0078125, %v3075_v53  ;;  %v5174_v53 = vld [vmem:[%s5404_s13 + $0xc8] sm:$0xff]  }
0x1188   : > { %v3077_v15 = vpop.xlane.xlu1 %3076 }
0x1189   : > { %v5896_v16 = vsub.f32 %v5881_v5, %v3078_v14  ;;  %v3079_v49 = vmul.f32 0.0078125, %v3077_v15  ;;  %v5175_v14 = vld [vmem:[%s5404_s13 + $0x8] sm:$0xff]  }
0x118a   : > { %v5176_v15 = vld [vmem:[%s5404_s13 + $0x88] sm:$0xff]  }
0x118b   : > { %v5899_v17 = vsub.f32 %v5884_v7, %v3079_v49  ;;  %v3082_v18 = vmul.f32 %v5896_v16, %v5896_v16  ;;  %v5178_v49 = vld [vmem:[%s5404_s13 + $0xd0] sm:$0xff]  }
0x118d   : > { %3084 = vadd.xlane.f32.xlu0 %v3082_v18  ;;  %v3083_v19 = vmul.f32 %v5899_v17, %v5899_v17  ;;  %v5180_v18 = vld [vmem:[%s5404_s13 + $0x90] sm:$0xff]  }
0x118f   : > { %3086 = vadd.xlane.f32.xlu1 %v3083_v19  ;;  %v5181_v19 = vld [vmem:[%s5404_s13 + $0x58] sm:$0xff]  }
0x121a   : > { %v3085_v40 = vpop.xlane.xlu0 %3084 }
0x121b   : > { %v3088_v45 = vmul.f32 0.0078125, %v3085_v40 }
0x121c   : > { %v3087_v46 = vpop.xlane.xlu1 %3086 }
0x121d   : > { %v3090_v48 = vadd.f32 1e-05, %v3088_v45  ;;  %v3089_v62 = vmul.f32 0.0078125, %v3087_v46 }
0x121f   : > { %5237 = vrsqrt.f32 %v3090_v48  ;;  %v3091_v6 = vadd.f32 1e-05, %v3089_v62 }
0x1221   : > { %5239 = vrsqrt.f32 %v3091_v6 }
0x1229   : > { %v5238_v0 = vpop.eup %5237 }
0x122a   : > { %v3094_v1 = vmul.f32 %v5238_v0, %v5896_v16  ;;  %v5177_v16 = vld [vmem:[%s5404_s13 + $0x50] sm:$0xff]  }
0x122b   : > { %v5240_v2 = vpop.eup %5239 }
0x122c   : > { %v3095_v13 = vmul.f32 %v5240_v2, %v5899_v17  ;;  %v3100_v3 = vmul.f32 %v3099_v57, %v3094_v1  ;;  %v5179_v17 = vld [vmem:[%s5404_s13 + $0x10] sm:$0xff]  }
0x122e   : > { %v3101_v4 = vmul.f32 %v3099_v57, %v3095_v13  ;;  %v3106_v12 = vadd.f32 %v3105_v39, %v3100_v3 }
0x1230   : > { %v3107_v8 = vadd.f32 %v3105_v39, %v3101_v4 }
0x1232   : > { %v3108_v9 = vpack.c.bf16 %v3107_v8, %v3106_v12 }
0x1234   : > { %3356 = vmatmul.mubr.bf16.vlgmr.msra.gmra.mrb[52].mxu0 %v3108_v9  ;;  %3399 = vmatmul.mubr.bf16.vlgmr.msra.gmra.mrb[76].mxu1 %v3108_v9 }
0x1235   : > { %4594 = vmatpush3.bf16.msra.mxu0 %v5171_v43  ;;  %4616 = vmatpush3.bf16.msra.mxu1 %v5172_v11 }
0x1236   : > { %4595 = vmatprep.subr.bf16.mxu0 %v5173_v52  ;;  %4617 = vmatprep.subr.bf16.mxu1 %v5174_v53 }
0x1239   : > { %4596 = vmatpush3.bf16.msra.mxu0 %v5175_v14  ;;  %4618 = vmatpush3.bf16.msra.mxu1 %v5176_v15 }
0x123a   : > { %4597 = vmatprep.subr.bf16.mxu0 %v5177_v16  ;;  %4619 = vmatprep.subr.bf16.mxu1 %v5178_v49 }
0x123d   : > { %4598 = vmatpush3.bf16.msra.mxu0 %v5179_v17  ;;  %4620 = vmatpush3.bf16.msra.mxu1 %v5180_v18 }
0x123e   : > { %4599 = vmatprep.subr.bf16.mxu0 %v5181_v19  ;;  %4621 = vmatprep.subr.bf16.mxu1 %v5182_v20 }
0x1241   : > { %4600 = vmatpush3.bf16.msra.mxu0 %v5183_v21  ;;  %4622 = vmatpush3.bf16.msra.mxu1 %v5184_v22 }
0x1242   : > { %4601 = vmatprep.subr.bf16.mxu0 %v5185_v23  ;;  %4623 = vmatprep.subr.bf16.mxu1 %v5186_v24 }
0x1245   : > { %4602 = vmatpush3.bf16.msra.mxu0 %v5187_v25  ;;  %4624 = vmatpush3.bf16.msra.mxu1 %v5188_v26 }
0x1246   : > { %4603 = vmatprep.subr.bf16.mxu0 %v5189_v27  ;;  %4625 = vmatprep.subr.bf16.mxu1 %v5190_v29 }
0x1249   : > { %4604 = vmatpush3.bf16.msra.mxu0 %v5191_v30  ;;  %4626 = vmatpush3.bf16.msra.mxu1 %v5192_v31 }
0x124a   : > { %4605 = vmatprep.subr.bf16.mxu0 %v5193_v32  ;;  %4627 = vmatprep.subr.bf16.mxu1 %v5194_v35 }
0x124d   : > { %4606 = vmatpush3.bf16.msra.mxu0 %v5195_v38  ;;  %4628 = vmatpush3.bf16.msra.mxu1 %v5196_v51 }
0x124e   : > { %4607 = vmatprep.subr.bf16.mxu0 %v5197_v42  ;;  %4629 = vmatprep.subr.bf16.mxu1 %v5198_v44 }
0x1251   : > { %4608 = vmatpush3.bf16.msra.mxu0 %v5199_v50  ;;  %4630 = vmatpush3.bf16.msra.mxu1 %v5200_v33 }
0x1307   : > { %v3357_v61 = vpop.f32.mrb[52].mxu0  ;;  %v3400_v40 = vpop.f32.mrb[76].mxu1 }
0x1308   : > { %v5972_v45 = vadd.f32 %v3357_v61, %v3146_v56  ;;  %v5974_v46 = vadd.f32 %v3400_v40, %v3154_v34  ;;  %v3359_v48 = vpop.f32.mrb[53].mxu0  ;;  %v3402_v62 = vpop.f32.mrb[77].mxu1 }
0x1309   : > { %v5976_v6 = vadd.f32 %v3359_v48, %v3150_v59  ;;  %v5978_v57 = vadd.f32 %v3402_v62, %v3158_v60  ;;  %v3361_v0 = vpop.f32.mrb[54].mxu0  ;;  %v3404_v37 = vpop.f32.mrb[78].mxu1 }
0x130a   : > { %v4367_v58 = vmul.f32 -1.702, %v5972_v45  ;;  %v4369_v41 = vmul.f32 -1.702, %v5974_v46  ;;  %v3362_v1 = vadd.f32 %v3361_v0, %v3146_v56  ;;  %v3405_v28 = vadd.f32 %v3404_v37, %v3154_v34  ;;  %v3363_v2 = vpop.f32.mrb[55].mxu0  ;;  %v3406_v13 = vpop.f32.mrb[79].mxu1 }
0x130b   : > { %v4368_v3 = vmul.f32 -1.702, %v5976_v6  ;;  %v4370_v39 = vmul.f32 -1.702, %v5978_v57  ;;  %v3364_v4 = vadd.f32 %v3363_v2, %v3150_v59  ;;  %v3407_v12 = vadd.f32 %v3406_v13, %v3158_v60 }
0x130c   : > { %v3425_v8 = vmul.f32 1.442695, %v4367_v58  ;;  %v3429_v9 = vmul.f32 1.442695, %v4369_v41  ;;  %v4371_v47 = vmul.f32 -1.702, %v3362_v1 }
0x130d   : > { %v3427_v10 = vmul.f32 1.442695, %v4368_v3  ;;  %v3431_v43 = vmul.f32 1.442695, %v4370_v39  ;;  %v4373_v11 = vmul.f32 -1.702, %v3405_v28 }
0x130e   : > { %5241 = vpow2.f32 %v3425_v8  ;;  %v3433_v52 = vmul.f32 1.442695, %v4371_v47  ;;  %v4372_v53 = vmul.f32 -1.702, %v3364_v4  ;;  %v4374_v14 = vmul.f32 -1.702, %v3407_v12 }
0x130f   : > { %5243 = vpow2.f32 %v3429_v9  ;;  %v3437_v15 = vmul.f32 1.442695, %v4373_v11 }
0x1310   : > { %5245 = vpow2.f32 %v3427_v10  ;;  %v3435_v16 = vmul.f32 1.442695, %v4372_v53  ;;  %v3439_v49 = vmul.f32 1.442695, %v4374_v14 }
0x1311   : > { %5247 = vpow2.f32 %v3431_v43 }
0x1312   : > { %5249 = vpow2.f32 %v3433_v52 }
0x1313   : > { %5251 = vpow2.f32 %v3437_v15 }
0x1314   : > { %5253 = vpow2.f32 %v3435_v16 }
0x1315   : > { %5255 = vpow2.f32 %v3439_v49 }
0x1318   : > { %v5242_v17 = vpop.eup %5241 }
0x1319   : > { %v5244_v18 = vpop.eup %5243  ;;  %v3441_v19 = vadd.f32 1.0, %v5242_v17 }
0x131a   : > { %v5246_v20 = vpop.eup %5245  ;;  %v3443_v21 = vadd.f32 1.0, %v5244_v18 }
0x131b   : > { %v5248_v22 = vpop.eup %5247  ;;  %5257 = vrcp.f32 %v3441_v19  ;;  %v3442_v23 = vadd.f32 1.0, %v5246_v20 }
0x131c   : > { %v5250_v24 = vpop.eup %5249  ;;  %5259 = vrcp.f32 %v3443_v21  ;;  %v3444_v25 = vadd.f32 1.0, %v5248_v22 }
0x131d   : > { %v5252_v26 = vpop.eup %5251  ;;  %5261 = vrcp.f32 %v3442_v23  ;;  %v3445_v27 = vadd.f32 1.0, %v5250_v24  ;;  %v4408_v23 = vld [vmem:[%s6012_s3] ss:$0 sm:$0xff] (!%p4407_p5) }
0x131e   : > { %v5254_v29 = vpop.eup %5253  ;;  %5263 = vrcp.f32 %v3444_v25  ;;  %v3447_v30 = vadd.f32 1.0, %v5252_v26  ;;  %v4409_v25 = vld [vmem:[%s6013_s4] ss:$0 sm:$0xff] (!%p4407_p5) }
0x131f   : > { %v5256_v31 = vpop.eup %5255  ;;  %5265 = vrcp.f32 %v3445_v27  ;;  %v3446_v32 = vadd.f32 1.0, %v5254_v29 }
0x1320   : > { %5267 = vrcp.f32 %v3447_v30  ;;  %v3448_v35 = vadd.f32 1.0, %v5256_v31 }
0x1321   : > { %5269 = vrcp.f32 %v3446_v32 }
0x1322   : > { %5271 = vrcp.f32 %v3448_v35 }
0x1325   : > { %v5258_v38 = vpop.eup %5257 }
0x1326   : > { %v5260_v51 = vpop.eup %5259  ;;  %v3465_v54 = vmul.f32 %v5258_v38, %v5972_v45 }
0x1327   : > { %v5262_v42 = vpop.eup %5261  ;;  %v3467_v59 = vmul.f32 %v5260_v51, %v5974_v46  ;;  %v3544_v46 = vrot.slane %v5875_v63, %v1281_v55 }
0x1328   : > { %v5264_v44 = vpop.eup %5263  ;;  %v3466_v40 = vmul.f32 %v5262_v42, %v5976_v6 }
0x1329   : > { %v5266_v50 = vpop.eup %5265  ;;  %v3468_v0 = vmul.f32 %v5264_v44, %v5978_v57 }
0x132a   : > { %v5268_v33 = vpop.eup %5267  ;;  %v3469_v56 = vmul.f32 %v5266_v50, %v3362_v1 }
0x132b   : > { %v5270_v34 = vpop.eup %5269  ;;  %v3471_v60 = vmul.f32 %v5268_v33, %v3405_v28 }
0x132c   : > { %v5272_v61 = vpop.eup %5271  ;;  %v3473_v48 = vpack.c.bf16 %v3469_v56, %v3465_v54  ;;  %v3470_v62 = vmul.f32 %v5270_v34, %v3364_v4 }
0x132d   : > { %v3475_v37 = vpack.c.bf16 %v3471_v60, %v3467_v59  ;;  %v3472_v58 = vmul.f32 %v5272_v61, %v3407_v12 }
0x132e   : > { %v3474_v41 = vpack.c.bf16 %v3470_v62, %v3466_v40 }
0x132f   : > { %v3476_v2 = vpack.c.bf16 %v3472_v58, %v3468_v0 }
0x1330   : > { %3769 = vmatprep.mubr.bf16.mxu0 %v3474_v41 }
0x1331   : > { %3810 = vmatprep.mubr.bf16.mxu1 %v3476_v2  ;;  %3770 = vmatmul.mubr.bf16.vlgmr.msra.gmra.mrb[56].mxu0 %v3473_v48 }
0x1332   : > { %3811 = vmatmul.mubr.bf16.vlgmr.msra.gmra.mrb[80].mxu1 %v3475_v37 }
0x1404   : > { %v4609_v45 = vpop.f32.mrb[56].mxu0 }
0x1405   : > { %v4631_v1 = vpop.f32.mrb[80].mxu1  ;;  %v4610_v28 = vpop.f32.mrb[57].mxu0 }
0x1406   : > { %v4611_v6 = vadd.f32 %v4610_v28, %v4609_v45  ;;  %v4632_v13 = vpop.f32.mrb[81].mxu1  ;;  %v4612_v3 = vpop.f32.mrb[58].mxu0 }
0x1407   : > { %v4633_v39 = vadd.f32 %v4632_v13, %v4631_v1  ;;  %v4634_v57 = vpop.f32.mrb[82].mxu1  ;;  %v4613_v4 = vpop.f32.mrb[59].mxu0 }
0x1408   : > { %v3772_v12 = vadd.f32 %v4611_v6, %v3544_v46  ;;  %v4614_v8 = vadd.f32 %v4613_v4, %v4612_v3  ;;  %v4635_v9 = vpop.f32.mrb[83].mxu1 }
0x1409   : > { %v4636_v47 = vadd.f32 %v4635_v9, %v4634_v57 }
0x140a   : > { %v3813_v10 = vadd.f32 %v4633_v39, %v3772_v12  ;;  %v3775_v43 = vadd.f32 %v4614_v8, %v3544_v46  ;;  %3826 = sbr.rel (%p4407_p5) target bundleno = 5450 (0x154a), region = 106 }
0x140c   : > { %v3819_v11 = vadd.f32 %v3813_v10, %v5881_v5  ;;  %v3816_v52 = vadd.f32 %v4636_v47, %v3775_v43 }
0x140e   : > { %3821 = vst [vmem:[#allocation2] sm:$0xff] %v3819_v11  ;;  %v3820_v36 = vadd.f32 %v3816_v52, %v5884_v7  ;;  %3829 = vadd.xlane.f32.xlu0 (!%p4407_p5), %v3819_v11 }
0x1410   : > { %3822 = vst [vmem:[#allocation2 + $0x8] sm:$0xff] %v3820_v36 }
0x1412   : > { %3831 = vadd.xlane.f32.xlu0 %v3820_v36 }
0x149b   : > { %v3830_v55 = vpop.xlane.xlu0 %3829 }
0x149c   : > { %v3833_v63 = vmul.f32 0.0078125, %v3830_v55 }
0x149e   : > { %v3835_v53 = vsub.f32 %v3819_v11, %v3833_v63 }
0x149f   : > { %v3832_v14 = vpop.xlane.xlu0 %3831 }
0x14a0   : > { %v3834_v15 = vmul.f32 0.0078125, %v3832_v14  ;;  %v3837_v16 = vmul.f32 %v3835_v53, %v3835_v53 }
0x14a2   : > { %v3836_v49 = vsub.f32 %v3820_v36, %v3834_v15  ;;  %3839 = vadd.xlane.f32.xlu1 %v3837_v16 }
0x14a4   : > { %v3838_v17 = vmul.f32 %v3836_v49, %v3836_v49 }
0x14a6   : > { %3841 = vadd.xlane.f32.xlu1 %v3838_v17 }
0x152f   : > { %v3840_v5 = vpop.xlane.xlu1 %3839 }
0x1530   : > { %v3843_v18 = vmul.f32 0.0078125, %v3840_v5 }
0x1532   : > { %v3845_v19 = vadd.f32 1e-05, %v3843_v18 }
0x1533   : > { %v3842_v7 = vpop.xlane.xlu1 %3841 }
0x1534   : > { %5277 = vrsqrt.f32 %v3845_v19  ;;  %v3844_v20 = vmul.f32 0.0078125, %v3842_v7 }
0x1536   : > { %v3846_v21 = vadd.f32 1e-05, %v3844_v20 }
0x1538   : > { %5279 = vrsqrt.f32 %v3846_v21 }
0x153e   : > { %v5278_v22 = vpop.eup %5277 }
0x153f   : > { %v3849_v24 = vmul.f32 %v5278_v22, %v3835_v53 }
0x1541   : > { %v3857_v26 = vmul.f32 %v4408_v23, %v3849_v24 }
0x1542   : > { %v5280_v27 = vpop.eup %5279 }
0x1543   : > { %v3865_v29 = vadd.f32 %v4409_v25, %v3857_v26  ;;  %v3850_v30 = vmul.f32 %v5280_v27, %v3836_v49 }
0x1545   : > { %3867 = vst [vmem:[%s6021_s12] sm:$0xff] %v3865_v29  ;;  %v3858_v31 = vmul.f32 %v4408_v23, %v3850_v30 }
0x1547   : > { %v3866_v32 = vadd.f32 %v4409_v25, %v3858_v31 }
0x1549   : > { %3868 = vst [vmem:[%s6021_s12 + $0x8] sm:$0xff] %v3866_v32 }
0x154a PF: > { %s22_s19 = sadd.s32 1, %s5289_s19  }
0x154b   : > { %p19_p6 = scmp.ge.s32.totalorder %s22_s19, 4  }
0x154d   :  { %21 = sbr.rel (!%p19_p6) target bundleno = 2 (0x2), region = 172 }
0x1554   :  { %3880 = vsyncmov [#allocation3] }
0x1557   :  { %s3881_s24 = vpop.sfrf %3880 }
0x1558   :  { %p4412_p7 = scmp.ne.s32.totalorder %s3881_s24, 0 }
0x155a   :  { %3885 = shalt.err (%p4412_p7)  }

// kernel: encoder_forward.3
= control target key start
LH: loop header
LB: loop body
LE: loop exit
PB: predicated region body
PF: predicated region fallthrough
CT: control target
= control target key end

     0   :  { %s7133_s21 = smov 0   ;;  %s7907_s0 = inlined_call_operand.vmem [shape: f32[4,8,128], index: 0, kind: input, shape index: {}]   ;;  %s7908_s1 = inlined_call_operand.vmem [shape: bf16[128,128], index: 1, kind: input, shape index: {}]   ;;  %s7909_s2 = inlined_call_operand.vmem [shape: f32[1,128], index: 2, kind: input, shape index: {}]   ;;  %s7910_s3 = inlined_call_operand.vmem [shape: f32[1,128], index: 3, kind: input, shape index: {}]   ;;  %s7911_s4 = inlined_call_operand.vmem [shape: f32[1,128], index: 4, kind: input, shape index: {}]   ;;  %s7912_s5 = inlined_call_operand.vmem [shape: f32[2,8,128], index: 5, kind: input, shape index: {}]   ;;  %s7913_s6 = inlined_call_operand.vmem [shape: f32[2,12,32], index: 6, kind: input, shape index: {}]   ;;  %s7914_s7 = inlined_call_operand.vmem [shape: f32[2,1,512], index: 7, kind: input, shape index: {}]   ;;  %s7915_s8 = inlined_call_operand.vmem [shape: bf16[2,12,128,32], index: 8, kind: input, shape index: {}]   ;;  %s7916_s9 = inlined_call_operand.vmem [shape: bf16[2,4,32,128], index: 9, kind: input, shape index: {}]   ;;  %s7917_s10 = inlined_call_operand.vmem [shape: bf16[2,128,512], index: 10, kind: input, shape index: {}]   ;;  %s7918_s11 = inlined_call_operand.vmem [shape: bf16[2,512,128], index: 11, kind: input, shape index: {}]   ;;  %s7919_s12 = inlined_call_operand.vmem [shape: f32[4,128], index: 12, kind: output, shape index: {}]  }
   0x1   :  { %7921 = sst [smem:[#allocation7_spill]] %s7912_s5 }
   0x2   :  { %7922 = sst [smem:[#allocation8_spill]] %s7919_s12 }
   0x3 LB: > { %7923 = sst [smem:[#allocation6_spill]] %s7061_s21  ;;  %s7139_s22 = sadd.s32 4294967295, %s7061_s21   ;;  %s7061_s21 = sphi %s7133_s21, %s22_s21  }
   0x4   : > { %p5393_p0 = scmp.ge.s32.totalorder %s7061_s21, 1  ;;  %p391_p1 = scmp.lt.s32.totalorder %s7061_s21, 3 }
   0x6   : > { %p392_p2 = pnand %p5393_p0, %p391_p1 }
   0x7   : > { %p454_p3 = scmp.lt.s32.totalorder (!%p392_p2), %s7139_s22, 1  ;;  %s7924_s5 = sld [smem:[#allocation7_spill]] (!%p392_p2) }
   0x8   : > { %395 = sbr.rel (%p392_p2) target bundleno = 5791 (0x169f), region = 64  ;;  %p5405_p4 = scmp.ne.s32.totalorder (!%p392_p2), %s7139_s22, 0 }
   0xf   : > { %s455_s23 = scalar_select %p454_p3, %s7139_s22, 1 }
  0x10   : > { %v524_v0 = vld [vmem:[%s7907_s0] sm:$0xff] (!%p5405_p4)  ;;  %v526_v1 = vld [vmem:[%s7907_s0 + $0x8] sm:$0xff] (!%p5405_p4)  ;;  %v528_v2 = vld [vmem:[%s7907_s0 + $0x10] sm:$0xff] (!%p5405_p4) }
  0x11   : > { %s5394_s24 = sshll.u32 %s455_s23, 3  ;;  %s5881_s25 = sshll.u32 %s455_s23, 4  ;;  %525 = vst [vmem:[#allocation2] sm:$0xff] (!%p5405_p4), %v524_v0  ;;  %527 = vst [vmem:[#allocation2 + $0x8] sm:$0xff] (!%p5405_p4), %v526_v1  ;;  %v530_v3 = vld [vmem:[%s7907_s0 + $0x18] sm:$0xff] (!%p5405_p4) }
  0x12   : > { %s7148_s28 = scalar_lea.vmem %s7924_s5, %s5394_s24  ;;  %s7153_s13 = scalar_lea.vmem %s7913_s6, %s5881_s25  ;;  %529 = vst [vmem:[#allocation2 + $0x10] sm:$0xff] (!%p5405_p4), %v528_v2  ;;  %531 = vst [vmem:[#allocation2 + $0x18] sm:$0xff] (!%p5405_p4), %v530_v3 }
  0x13   : > { %s5397_s14 = sshll.u32 %s455_s23, 2  ;;  %s6694_s15 = smul.u32 768, %s455_s23 }
  0x14   : > { %s7158_s18 = scalar_lea.vmem %s7914_s7, %s5397_s14  ;;  %s5882_s19 = sshll.u32 %s455_s23, 6 }
  0x15   : > { %s7163_s12 = scalar_lea.vmem %s7915_s8, %s6694_s15  ;;  %s7168_s27 = scalar_lea.vmem %s7916_s9, %s5882_s19 }
  0x16   : > { %s5883_s25 = sshll.u32 %s455_s23, 8  ;;  %491 = sbr.rel (%p5405_p4) target bundleno = 32 (0x20), region = 68 }
  0x17   : > { %s7173_s5 = scalar_lea.vmem %s7917_s10, %s5883_s25  ;;  %s7178_s17 = scalar_lea.vmem %s7918_s11, %s5883_s25 }
  0x1d   : > { %539 = vsyncadd [#allocation3], 512 }
  0x1e   : > { %7057 = dma.done.wait [#allocation3], 512 }
  0x1f   : > { %7058 = vsyncadd [#allocation3], 4294966784 }
  0x20 PF: > { %v544_v4 = vld [vmem:[#allocation2] sm:$0xff]  ;;  %v546_v5 = vld [vmem:[#allocation2 + $0x10] sm:$0xff]  ;;  %v545_v6 = vld [vmem:[#allocation2 + $0x8] sm:$0xff]  ;;  %v596_v44 = vlaneseq  ;;  %vm7064_vm0 = vmmov 0   ;;  %vm1003_vm1 = vcmask 261120   ;;  %vm1244_vm2 = vcmask 1043456  }
  0x21   : > { %551 = vadd.xlane.f32.xlu0 %v544_v4  ;;  %555 = vadd.xlane.f32.xlu1 %v546_v5  ;;  %v547_v7 = vld [vmem:[#allocation2 + $0x18] sm:$0xff]  ;;  %v6708_v8 = vld [vmem:[%s7163_s12] sm:$0xff]   ;;  %v6710_v26 = vld [vmem:[%s7163_s12 + $0x8] sm:$0xff]   ;;  %vm1192_vm3 = vcmask 64512   ;;  %p5866_p5 = scmp.ne.s32.totalorder %s7139_s22, 1 }
  0x22   : > { %v6709_v9 = vld [vmem:[%s7163_s12 + $0x100] sm:$0xff]   ;;  %6198 = vmatprep.subr.bf16.mxu0 %v6708_v8  ;;  %v6711_v27 = vld [vmem:[%s7163_s12 + $0x108] sm:$0xff]   ;;  %v6712_v28 = vld [vmem:[%s7163_s12 + $0x10] sm:$0xff]   ;;  %v7226_v51 = vshrl.u32 %v596_v44, 7  ;;  %vm5066_vm4 = vcmask (!%p5866_p5), 1041409   ;;  %vm5069_vm5 = vcmask (!%p5866_p5), 1042434  }
  0x23   : > { %6218 = vmatprep.subr.bf16.mxu1 %v6709_v9  ;;  %6199 = vmatpush3.bf16.msra.mxu0 %v6708_v8  ;;  %v6713_v29 = vld [vmem:[%s7163_s12 + $0x110] sm:$0xff]   ;;  %v6714_v30 = vld [vmem:[%s7163_s12 + $0x18] sm:$0xff]   ;;  %v6716_v32 = vld [vmem:[%s7163_s12 + $0x20] sm:$0xff]   ;;  %vm5072_vm6 = vcmask (!%p5866_p5), 1043459   ;;  %vm7067_vm7 = vmmov (!%p5866_p5), 0  }
  0x24   : > { %6219 = vmatpush3.bf16.msra.mxu1 %v6709_v9  ;;  %6200 = vmatprep.subr.bf16.mxu0 %v6710_v26  ;;  %v6715_v31 = vld [vmem:[%s7163_s12 + $0x118] sm:$0xff]   ;;  %v6717_v33 = vld [vmem:[%s7163_s12 + $0x120] sm:$0xff]   ;;  %v6718_v34 = vld [vmem:[%s7163_s12 + $0x28] sm:$0xff]   ;;  %v7229_v55 = vsub.s32 0, %v7226_v51  ;;  %v7234_v59 = vsub.s32 1, %v7226_v51 }
  0x25   : > { %553 = vadd.xlane.f32.xlu0 %v545_v6  ;;  %557 = vadd.xlane.f32.xlu1 %v547_v7  ;;  %v6719_v35 = vld [vmem:[%s7163_s12 + $0x128] sm:$0xff]   ;;  %v6720_v36 = vld [vmem:[%s7163_s12 + $0x30] sm:$0xff]   ;;  %v6722_v38 = vld [vmem:[%s7163_s12 + $0x38] sm:$0xff]  }
  0x26   : > { %6220 = vmatprep.subr.bf16.mxu1 %v6711_v27  ;;  %v6721_v37 = vld [vmem:[%s7163_s12 + $0x130] sm:$0xff]   ;;  %v6723_v39 = vld [vmem:[%s7163_s12 + $0x138] sm:$0xff]   ;;  %v6724_v40 = vld [vmem:[%s7163_s12 + $0x200] sm:$0xff]  }
  0x27   : > { %6201 = vmatpush3.bf16.msra.mxu0 %v6710_v26  ;;  %v548_v56 = vld [vmem:[%s7148_s28] sm:$0xff] }
  0x28   : > { %6221 = vmatpush3.bf16.msra.mxu1 %v6711_v27  ;;  %6202 = vmatprep.subr.bf16.mxu0 %v6712_v28  ;;  %v599_v58 = vrot.slane %v548_v56, %v7229_v55  ;;  %v607_v63 = vrot.slane %v548_v56, %v7234_v59 }
  0x29   : > { %6222 = vmatprep.subr.bf16.mxu1 %v6713_v29 }
  0x2b   : > { %6203 = vmatpush3.bf16.msra.mxu0 %v6712_v28 }
  0x2c   : > { %6223 = vmatpush3.bf16.msra.mxu1 %v6713_v29  ;;  %6204 = vmatprep.subr.bf16.mxu0 %v6714_v30 }
  0x2d   : > { %6224 = vmatprep.subr.bf16.mxu1 %v6715_v31 }
  0x2f   : > { %6205 = vmatpush3.bf16.msra.mxu0 %v6714_v30 }
  0x30   : > { %6225 = vmatpush3.bf16.msra.mxu1 %v6715_v31  ;;  %6206 = vmatprep.subr.bf16.mxu0 %v6716_v32 }
  0x31   : > { %6226 = vmatprep.subr.bf16.mxu1 %v6717_v33 }
  0x33   : > { %6207 = vmatpush3.bf16.msra.mxu0 %v6716_v32 }
  0x34   : > { %6227 = vmatpush3.bf16.msra.mxu1 %v6717_v33  ;;  %6208 = vmatprep.subr.bf16.mxu0 %v6718_v34 }
  0x35   : > { %6228 = vmatprep.subr.bf16.mxu1 %v6719_v35 }
  0x37   : > { %6209 = vmatpush3.bf16.msra.mxu0 %v6718_v34 }
  0x38   : > { %6229 = vmatpush3.bf16.msra.mxu1 %v6719_v35  ;;  %6210 = vmatprep.subr.bf16.mxu0 %v6720_v36 }
  0x39   : > { %6230 = vmatprep.subr.bf16.mxu1 %v6721_v37 }
  0x3b   : > { %6211 = vmatpush3.bf16.msra.mxu0 %v6720_v36 }
  0x3c   : > { %6231 = vmatpush3.bf16.msra.mxu1 %v6721_v37  ;;  %6212 = vmatprep.subr.bf16.mxu0 %v6722_v38 }
  0x3d   : > { %6232 = vmatprep.subr.bf16.mxu1 %v6723_v39 }
  0x3f   : > { %6213 = vmatpush3.bf16.msra.mxu0 %v6722_v38 }
  0x40   : > { %6233 = vmatpush3.bf16.msra.mxu1 %v6723_v39  ;;  %6238 = vmatprep.subr.bf16.mxu0 %v6724_v40 }
  0xae   : > { %v552_v10 = vpop.xlane.xlu0 %551  ;;  %v556_v11 = vpop.xlane.xlu1 %555 }
  0xaf   : > { %v560_v12 = vmul.f32 0.0078125, %v552_v10  ;;  %v562_v13 = vmul.f32 0.0078125, %v556_v11 }
  0xb1   : > { %v7195_v14 = vsub.f32 %v544_v4, %v560_v12  ;;  %v7197_v15 = vsub.f32 %v546_v5, %v562_v13 }
  0xb2   : > { %v554_v16 = vpop.xlane.xlu0 %553  ;;  %v558_v17 = vpop.xlane.xlu1 %557 }
  0xb3   : > { %v561_v18 = vmul.f32 0.0078125, %v554_v16  ;;  %v568_v19 = vmul.f32 %v7195_v14, %v7195_v14  ;;  %v563_v20 = vmul.f32 0.0078125, %v558_v17  ;;  %v570_v23 = vmul.f32 %v7197_v15, %v7197_v15  ;;  %v6727_v16 = vld [vmem:[%s7163_s12 + $0x218] sm:$0xff]   ;;  %v6728_v17 = vld [vmem:[%s7163_s12 + $0x220] sm:$0xff]  }
  0xb5   : > { %v7201_v21 = vsub.f32 %v545_v6, %v561_v18  ;;  %572 = vadd.xlane.f32.xlu0 %v568_v19  ;;  %v7203_v22 = vsub.f32 %v547_v7, %v563_v20  ;;  %v6729_v18 = vld [vmem:[%s7163_s12 + $0x228] sm:$0xff]   ;;  %v6730_v19 = vld [vmem:[%s7163_s12 + $0x230] sm:$0xff]   ;;  %v6731_v20 = vld [vmem:[%s7163_s12 + $0x238] sm:$0xff]  }
  0xb7   : > { %v569_v24 = vmul.f32 %v7201_v21, %v7201_v21  ;;  %v571_v25 = vmul.f32 %v7203_v22, %v7203_v22 }
  0xb9   : > { %576 = vadd.xlane.f32.xlu0 %v570_v23  ;;  %574 = vadd.xlane.f32.xlu1 %v569_v24  ;;  %v7266_v23 = vld [vmem:[%s7153_s13] sm:$0xff] }
  0xba   : > { %v633_v34 = vrot.slane %v7266_v23, %v7229_v55 }
  0xbd   : > { %578 = vadd.xlane.f32.xlu1 %v571_v25 }
 0x142   : > { %v573_v41 = vpop.xlane.xlu0 %572 }
 0x143   : > { %v580_v42 = vmul.f32 0.0078125, %v573_v41 }
 0x145   : > { %v584_v43 = vadd.f32 1e-05, %v580_v42 }
 0x146   : > { %v575_v45 = vpop.xlane.xlu1 %574  ;;  %v577_v46 = vpop.xlane.xlu0 %576 }
 0x147   : > { %6892 = vrsqrt.f32 %v584_v43  ;;  %v581_v47 = vmul.f32 0.0078125, %v575_v45  ;;  %v582_v48 = vmul.f32 0.0078125, %v577_v46 }
 0x149   : > { %v585_v49 = vadd.f32 1e-05, %v581_v47  ;;  %v586_v50 = vadd.f32 1e-05, %v582_v48 }
 0x14a   : > { %v579_v52 = vpop.xlane.xlu1 %578 }
 0x14b   : > { %6894 = vrsqrt.f32 %v585_v49  ;;  %v583_v53 = vmul.f32 0.0078125, %v579_v52 }
 0x14c   : > { %6896 = vrsqrt.f32 %v586_v50  ;;  %v7286_v50 = vld [vmem:[%s7153_s13 + $0x8] sm:$0xf] }
 0x14d   : > { %v587_v54 = vadd.f32 1e-05, %v583_v53  ;;  %v893_v53 = vrot.slane %v7286_v50, %v7229_v55 }
 0x14f   : > { %6898 = vrsqrt.f32 %v587_v54 }
 0x151   : > { %v6893_v57 = vpop.eup %6892 }
 0x152   : > { %v592_v60 = vmul.f32 %v6893_v57, %v7195_v14  ;;  %v6725_v14 = vld [vmem:[%s7163_s12 + $0x208] sm:$0xff]  }
 0x154   : > { %v600_v0 = vmul.f32 %v599_v58, %v592_v60 }
 0x155   : > { %v6895_v61 = vpop.eup %6894 }
 0x156   : > { %v6897_v62 = vpop.eup %6896  ;;  %v593_v1 = vmul.f32 %v6895_v61, %v7201_v21  ;;  %v608_v5 = vadd.f32 %v607_v63, %v600_v0  ;;  %v7063_v21 = vmov 0.0  }
 0x157   : > { %v594_v2 = vmul.f32 %v6897_v62, %v7197_v15  ;;  %v6726_v15 = vld [vmem:[%s7163_s12 + $0x210] sm:$0xff]   ;;  %6258 = vmatprep.subr.bf16.mxu1 %v7063_v21 }
 0x158   : > { %v601_v3 = vmul.f32 %v599_v58, %v593_v1 }
 0x159   : > { %v6899_v4 = vpop.eup %6898  ;;  %v602_v7 = vmul.f32 %v599_v58, %v594_v2 }
 0x15a   : > { %v609_v6 = vadd.f32 %v607_v63, %v601_v3  ;;  %v595_v8 = vmul.f32 %v6899_v4, %v7203_v22  ;;  %v762_v22 = vsub.s32 4, %v7226_v51 }
 0x15b   : > { %v610_v11 = vadd.f32 %v607_v63, %v602_v7 }
 0x15c   : > { %v7241_v9 = vpack.c.bf16 %v609_v6, %v608_v5  ;;  %v603_v10 = vmul.f32 %v599_v58, %v595_v8  ;;  %v763_v24 = vrot.slane %v7266_v23, %v762_v22 }
 0x15e   : > { %v611_v12 = vadd.f32 %v607_v63, %v603_v10  ;;  %6214 = vmatprep.mubr.bf16.mxu0 %v7241_v9  ;;  %6234 = vmatprep.mubr.bf16.mxu1 %v7241_v9 }
 0x160   : > { %v7245_v13 = vpack.c.bf16 %v611_v12, %v610_v11 }
 0x162   : > { %6215 = vmatmul.mubr.bf16.vlgmr.msra.gmra.mrb[0].mxu0 %v7245_v13  ;;  %6235 = vmatmul.mubr.bf16.vlgmr.msra.gmra.mrb[0].mxu1 %v7245_v13 }
 0x163   : > { %6239 = vmatpush3.bf16.msra.mxu0 %v6724_v40  ;;  %6254 = vmatprep.mubr.bf16.mxu0 %v7241_v9 }
 0x164   : > { %6240 = vmatprep.subr.bf16.mxu0 %v6725_v14  ;;  %6260 = vmatprep.mubr.msk.bf16.mxu1 %vm7064_vm0, %v7063_v21 }
 0x167   : > { %6241 = vmatpush3.bf16.msra.mxu0 %v6725_v14 }
 0x168   : > { %6242 = vmatprep.subr.bf16.mxu0 %v6726_v15 }
 0x16b   : > { %6243 = vmatpush3.bf16.msra.mxu0 %v6726_v15 }
 0x16c   : > { %6244 = vmatprep.subr.bf16.mxu0 %v6727_v16 }
 0x16f   : > { %6245 = vmatpush3.bf16.msra.mxu0 %v6727_v16 }
 0x170   : > { %6246 = vmatprep.subr.bf16.mxu0 %v6728_v17 }
 0x173   : > { %6247 = vmatpush3.bf16.msra.mxu0 %v6728_v17 }
 0x174   : > { %6248 = vmatprep.subr.bf16.mxu0 %v6729_v18 }
 0x177   : > { %6249 = vmatpush3.bf16.msra.mxu0 %v6729_v18 }
 0x178   : > { %6250 = vmatprep.subr.bf16.mxu0 %v6730_v19 }
 0x17b   : > { %6251 = vmatpush3.bf16.msra.mxu0 %v6730_v19 }
 0x17c   : > { %6252 = vmatprep.subr.bf16.mxu0 %v6731_v20 }
 0x17f   : > { %6253 = vmatpush3.bf16.msra.mxu0 %v6731_v20 }
 0x180   : > { %6294 = vmatprep.subr.bf16.mxu0 %v7063_v21 }
 0x182   : > { %6255 = vmatmul.mubr.bf16.vlgmr.msra.gmra.mrb[4].mxu0 %v7245_v13 }
 0x183   : > { %6296 = vmatprep.mubr.msk.bf16.mxu0 %vm7064_vm0, %v7063_v21 }
 0x235   : > { %v6216_v25 = vpop.f32.mrb[0].mxu0  ;;  %v6236_v26 = vpop.f32.mrb[0].mxu1 }
 0x236   : > { %v716_v27 = vpop.f32.mrb[1].mxu0  ;;  %v846_v28 = vpop.f32.mrb[1].mxu1  ;;  %v855_v41 = vadd.f32 %v6236_v26, %v763_v24  ;;  %v725_v48 = vadd.f32 %v6216_v25, %v633_v34 }
 0x237   : > { %v847_v29 = vadd.f32 %v846_v28, %v763_v24  ;;  %v6217_v30 = vpop.f32.mrb[2].mxu0  ;;  %v6237_v31 = vpop.f32.mrb[2].mxu1  ;;  %v717_v38 = vadd.f32 %v716_v27, %v633_v34 }
 0x238   : > { %v719_v32 = vpop.f32.mrb[3].mxu0  ;;  %v849_v33 = vpop.f32.mrb[3].mxu1  ;;  %v5891_v44 = vpack.c.bf16 %v855_v41, %v855_v41  ;;  %v858_v47 = vadd.f32 %v6237_v31, %v763_v24  ;;  %v5887_v52 = vpack.c.bf16 %v725_v48, %v725_v48  ;;  %v728_v56 = vadd.f32 %v6217_v30, %v633_v34 }
 0x239   : > { %v5889_v35 = vpack.c.bf16 %v847_v29, %v847_v29  ;;  %v850_v37 = vadd.f32 %v849_v33, %v763_v24  ;;  %v5885_v40 = vpack.c.bf16 %v717_v38, %v717_v38  ;;  %v720_v43 = vadd.f32 %v719_v32, %v633_v34 }
 0x23a   : > { %v1100_v46 = vsel %vm1003_vm1, %v5891_v44, 0  ;;  %v5892_v49 = vpack.c.bf16 %v858_v47, %v858_v47  ;;  %v5888_v2 = vpack.c.bf16 %v728_v56, %v728_v56 }
 0x23b   : > { %v1008_v36 = vsel %vm1003_vm1, %v5889_v35, 0  ;;  %v5890_v39 = vpack.c.bf16 %v850_v37, %v850_v37  ;;  %v5886_v45 = vpack.c.bf16 %v720_v43, %v720_v43 }
 0x23c   : > { %6259 = vmatpush3.bf16.xpose.msra.mxu1 %v1008_v36  ;;  %v1146_v54 = vsel %vm1003_vm1, %v5892_v49, 0 }
 0x23d   : > { %6264 = vmatprep.subr.bf16.mxu1 %v7063_v21  ;;  %v1054_v42 = vsel %vm1003_vm1, %v5890_v39, 0 }
 0x243   : > { %6261 = vmatmul.mubr.msk.bf16.vlgmr.msra.gmra.mrb[4].mxu1 %vm1003_vm1, %v5885_v40 }
 0x244   : > { %6265 = vmatpush3.bf16.xpose.msra.mxu1 %v1054_v42  ;;  %6266 = vmatprep.mubr.msk.bf16.mxu1 %vm7064_vm0, %v7063_v21 }
 0x245   : > { %6270 = vmatprep.subr.bf16.mxu1 %v7063_v21 }
 0x24b   : > { %6267 = vmatmul.mubr.msk.bf16.vlgmr.msra.gmra.mrb[8].mxu1 %vm1003_vm1, %v5886_v45 }
 0x24c   : > { %6271 = vmatpush3.bf16.xpose.msra.mxu1 %v1100_v46  ;;  %6272 = vmatprep.mubr.msk.bf16.mxu1 %vm7064_vm0, %v7063_v21 }
 0x24d   : > { %6276 = vmatprep.subr.bf16.mxu1 %v7063_v21 }
 0x253   : > { %6273 = vmatmul.mubr.msk.bf16.vlgmr.msra.gmra.mrb[12].mxu1 %vm1003_vm1, %v5887_v52 }
 0x254   : > { %6277 = vmatpush3.bf16.xpose.msra.mxu1 %v1146_v54  ;;  %6278 = vmatprep.mubr.msk.bf16.mxu1 %vm7064_vm0, %v7063_v21 }
 0x255   : > { %v6256_v57 = vpop.f32.mrb[4].mxu0  ;;  %6282 = vmatprep.subr.bf16.mxu1 %v7063_v21 }
 0x256   : > { %v985_v58 = vadd.f32 %v6256_v57, %v893_v53  ;;  %v976_v60 = vpop.f32.mrb[5].mxu0 }
 0x257   : > { %v977_v61 = vadd.f32 %v976_v60, %v893_v53  ;;  %v6257_v62 = vpop.f32.mrb[6].mxu0  ;;  %v6732_v60 = vld [vmem:[%s7163_s12 + $0x40] sm:$0xff]  }
 0x258   : > { %v5895_v63 = vpack.c.bf16 %v985_v58, %v985_v58  ;;  %v7295_v0 = vadd.f32 %v6257_v62, %v893_v53  ;;  %v979_v1 = vpop.f32.mrb[7].mxu0 }
 0x259   : > { %v5893_v3 = vpack.c.bf16 %v977_v61, %v977_v61  ;;  %v7297_v4 = vadd.f32 %v979_v1, %v893_v53 }
 0x25a   : > { %v1338_v5 = vsel %vm1244_vm2, %v5895_v63, 0 }
 0x25b   : > { %v1246_v6 = vsel %vm1244_vm2, %v5893_v3, 0  ;;  %6295 = vmatpush3.bf16.msra.mxu0 %v1338_v5  ;;  %6279 = vmatmul.mubr.msk.bf16.vlgmr.msra.gmra.mrb[16].mxu1 %vm1003_vm1, %v5888_v2  ;;  %v5894_v1 = vpack.c.bf16 %v7297_v4, %v7297_v4 }
 0x25c   : > { %6283 = vmatpush3.bf16.msra.mxu1 %v1246_v6  ;;  %6284 = vmatprep.mubr.msk.bf16.mxu1 %vm7064_vm0, %v7063_v21 }
 0x25d   : > { %6288 = vmatprep.subr.bf16.mxu1 %v7063_v21  ;;  %6306 = vmatprep.subr.bf16.mxu0 %v6732_v60  ;;  %v1292_v5 = vsel %vm1244_vm2, %v5894_v1, 0 }
 0x316   : > { %v1044_v7 = vpop.f32.mrb[4].mxu1 }
 0x317   : > { %v1188_v8 = vmul.f32 0.17677669, %v1044_v7  ;;  %v6262_v10 = vpop.f32.mrb[5].mxu1 }
 0x318   : > { %v1047_v11 = vpop.f32.mrb[6].mxu1 }
 0x319   : > { %v6263_v12 = vpop.f32.mrb[7].mxu1  ;;  %v1193_v14 = vsel %vm1192_vm3, %v1188_v8, -inf  ;;  %v6735_v11 = vld [vmem:[%s7163_s12 + $0x140] sm:$0xff]  }
 0x31a   : > { %1194 = vmax.xlane.f32.xlu0 %v1193_v14 }
 0x31e   : > { %v1090_v15 = vpop.f32.mrb[8].mxu1 }
 0x31f   : > { %v1189_v16 = vmul.f32 0.17677669, %v1090_v15  ;;  %v6268_v17 = vpop.f32.mrb[9].mxu1 }
 0x320   : > { %v1093_v18 = vpop.f32.mrb[10].mxu1  ;;  %v6733_v17 = vld [vmem:[%s7163_s12 + $0x48] sm:$0xff]  }
 0x321   : > { %v6269_v19 = vpop.f32.mrb[11].mxu1  ;;  %v1196_v20 = vsel %vm1192_vm3, %v1189_v16, -inf  ;;  %v6734_v18 = vld [vmem:[%s7163_s12 + $0x50] sm:$0xff]  }
 0x322   : > { %1197 = vmax.xlane.f32.xlu1 %v1196_v20 }
 0x326   : > { %v1136_v24 = vpop.f32.mrb[12].mxu1 }
 0x327   : > { %v1190_v25 = vmul.f32 0.17677669, %v1136_v24  ;;  %v6274_v26 = vpop.f32.mrb[13].mxu1 }
 0x328   : > { %v1139_v27 = vpop.f32.mrb[14].mxu1  ;;  %v6737_v26 = vld [vmem:[%s7163_s12 + $0x148] sm:$0xff]  }
 0x329   : > { %v6275_v28 = vpop.f32.mrb[15].mxu1  ;;  %v1199_v29 = vsel %vm1192_vm3, %v1190_v25, -inf  ;;  %v6738_v27 = vld [vmem:[%s7163_s12 + $0x60] sm:$0xff]  }
 0x32a   : > { %1200 = vmax.xlane.f32.xlu1 %v1199_v29  ;;  %v6739_v28 = vld [vmem:[%s7163_s12 + $0x150] sm:$0xff]   ;;  %v6740_v29 = vld [vmem:[%s7163_s12 + $0x68] sm:$0xff]  }
 0x32e   : > { %v1182_v30 = vpop.f32.mrb[16].mxu1 }
 0x32f   : > { %v1191_v31 = vmul.f32 0.17677669, %v1182_v30  ;;  %v6280_v32 = vpop.f32.mrb[17].mxu1  ;;  %v6741_v30 = vld [vmem:[%s7163_s12 + $0x158] sm:$0xff]  }
 0x330   : > { %v1185_v33 = vpop.f32.mrb[18].mxu1  ;;  %v6743_v32 = vld [vmem:[%s7163_s12 + $0x160] sm:$0xff]  }
 0x331   : > { %v6281_v34 = vpop.f32.mrb[19].mxu1  ;;  %v1202_v35 = vsel %vm1192_vm3, %v1191_v31, -inf  ;;  %v6744_v33 = vld [vmem:[%s7163_s12 + $0x78] sm:$0xff]  }
 0x332   : > { %1203 = vmax.xlane.f32.xlu0 %v1202_v35  ;;  %v6745_v34 = vld [vmem:[%s7163_s12 + $0x168] sm:$0xff]   ;;  %v6746_v35 = vld [vmem:[%s7163_s12 + $0x170] sm:$0xff]  }
 0x3a7   : > { %v1195_v36 = vpop.xlane.xlu0 %1194 }
 0x3a8   : > { %v1205_v37 = vsub.f32 %v1188_v8, %v1195_v36  ;;  %v5896_v8 = vpack.c.bf16 %v7295_v0, %v7295_v0  ;;  %v6747_v36 = vld [vmem:[%s7163_s12 + $0x240] sm:$0xff]  }
 0x3aa   : > { %v1209_v38 = vmul.f32 1.442695, %v1205_v37  ;;  %v1384_v12 = vsel %vm1244_vm2, %v5896_v8, 0  ;;  %v6748_v37 = vld [vmem:[%s7163_s12 + $0x178] sm:$0xff]   ;;  %v1581_v8 = vsub.s32 5, %v7226_v51 }
 0x3ac   : > { %6900 = vpow2.f32 %v1209_v38  ;;  %v6749_v38 = vld [vmem:[%s7163_s12 + $0x248] sm:$0xff]  }
 0x3af   : > { %v1198_v39 = vpop.xlane.xlu1 %1197 }
 0x3b0   : > { %v1206_v40 = vsub.f32 %v1189_v16, %v1198_v39  ;;  %v6750_v39 = vld [vmem:[%s7163_s12 + $0x250] sm:$0xff]  }
 0x3b2   : > { %v1211_v41 = vmul.f32 1.442695, %v1206_v40  ;;  %v6751_v40 = vld [vmem:[%s7163_s12 + $0x258] sm:$0xff]  }
 0x3b4   : > { %6902 = vpow2.f32 %v1211_v41  ;;  %v6752_v41 = vld [vmem:[%s7163_s12 + $0x260] sm:$0xff]  }
 0x3b6   : > { %v6901_v42 = vpop.eup %6900 }
 0x3b7   : > { %v1201_v43 = vpop.xlane.xlu1 %1200  ;;  %v1217_v44 = vsel %vm1192_vm3, %v6901_v42, 0.0 }
 0x3b8   : > { %v1207_v45 = vsub.f32 %v1190_v25, %v1201_v43  ;;  %1218 = vadd.xlane.f32.xlu0 %v1217_v44  ;;  %v6736_v25 = vld [vmem:[%s7163_s12 + $0x58] sm:$0xff]   ;;  %v6754_v43 = vld [vmem:[%s7163_s12 + $0x270] sm:$0xff]  }
 0x3b9   : > { %v6755_v44 = vld [vmem:[%s7163_s12 + $0x278] sm:$0xff]  }
 0x3ba   : > { %v1213_v46 = vmul.f32 1.442695, %v1207_v45 }
 0x3bc   : > { %6904 = vpow2.f32 %v1213_v46 }
 0x3be   : > { %v6903_v47 = vpop.eup %6902 }
 0x3bf   : > { %v1204_v48 = vpop.xlane.xlu0 %1203  ;;  %v1220_v49 = vsel %vm1192_vm3, %v6903_v47, 0.0 }
 0x3c0   : > { %v1208_v52 = vsub.f32 %v1191_v31, %v1204_v48  ;;  %1221 = vadd.xlane.f32.xlu1 %v1220_v49  ;;  %v6742_v31 = vld [vmem:[%s7163_s12 + $0x70] sm:$0xff]  }
 0x3c2   : > { %v1215_v53 = vmul.f32 1.442695, %v1208_v52 }
 0x3c4   : > { %6906 = vpow2.f32 %v1215_v53 }
 0x3c6   : > { %v6905_v54 = vpop.eup %6904 }
 0x3c7   : > { %v1223_v56 = vsel %vm1192_vm3, %v6905_v54, 0.0 }
 0x3c8   : > { %1224 = vadd.xlane.f32.xlu1 %v1223_v56 }
 0x3ce   : > { %v6907_v57 = vpop.eup %6906 }
 0x3cf   : > { %v1226_v58 = vsel %vm1192_vm3, %v6907_v57, 0.0 }
 0x3d0   : > { %1227 = vadd.xlane.f32.xlu0 %v1226_v58 }
 0x445   : > { %v1219_v61 = vpop.xlane.xlu0 %1218 }
 0x446   : > { %6908 = vrcp.f32 %v1219_v61 }
 0x44d   : > { %v1222_v62 = vpop.xlane.xlu1 %1221 }
 0x44e   : > { %6910 = vrcp.f32 %v1222_v62 }
 0x450   : > { %v6909_v63 = vpop.eup %6908 }
 0x451   : > { %v1233_v2 = vmul.f32 %v6909_v63, %v6901_v42  ;;  %v6753_v42 = vld [vmem:[%s7163_s12 + $0x268] sm:$0xff]  }
 0x453   : > { %v1237_v3 = vpack.c.bf16 %v1233_v2, %v1233_v2 }
 0x455   : > { %v1225_v6 = vpop.xlane.xlu1 %1224  ;;  %6285 = vmatmul.mubr.msk.bf16.vlgmr.msra.gmra.mrb[20].mxu1 %vm1192_vm3, %v1237_v3 }
 0x456   : > { %6912 = vrcp.f32 %v1225_v6  ;;  %6289 = vmatpush3.bf16.msra.mxu1 %v1292_v5  ;;  %6290 = vmatprep.mubr.msk.bf16.mxu1 %vm7064_vm0, %v7063_v21 }
 0x457   : > { %6300 = vmatprep.subr.bf16.mxu1 %v7063_v21 }
 0x458   : > { %v6911_v7 = vpop.eup %6910 }
 0x459   : > { %v1234_v4 = vmul.f32 %v6911_v7, %v6903_v47 }
 0x45b   : > { %v1238_v10 = vpack.c.bf16 %v1234_v4, %v1234_v4 }
 0x45d   : > { %6291 = vmatmul.mubr.msk.bf16.vlgmr.msra.gmra.mrb[24].mxu1 %vm1192_vm3, %v1238_v10  ;;  %v1228_v14 = vpop.xlane.xlu0 %1227  ;;  %v1582_v10 = vrot.slane %v7266_v23, %v1581_v8 }
 0x45e   : > { %6301 = vmatpush3.bf16.msra.mxu1 %v1384_v12  ;;  %6914 = vrcp.f32 %v1228_v14  ;;  %6302 = vmatprep.mubr.msk.bf16.mxu1 %vm7064_vm0, %v7063_v21 }
 0x45f   : > { %6326 = vmatprep.subr.bf16.mxu1 %v6735_v11 }
 0x460   : > { %v6913_v15 = vpop.eup %6912 }
 0x461   : > { %v1235_v16 = vmul.f32 %v6913_v15, %v6905_v54 }
 0x463   : > { %v1239_v0 = vpack.c.bf16 %v1235_v16, %v1235_v16 }
 0x465   : > { %6297 = vmatmul.mubr.msk.bf16.vlgmr.msra.gmra.mrb[8].mxu0 %vm1192_vm3, %v1239_v0  ;;  %v1452_v0 = vrot.slane %v7266_v23, %v7234_v59 }
 0x466   : > { %6307 = vmatpush3.bf16.msra.mxu0 %v6732_v60  ;;  %6322 = vmatprep.mubr.bf16.mxu0 %v7241_v9 }
 0x467   : > { %6308 = vmatprep.subr.bf16.mxu0 %v6733_v17 }
 0x468   : > { %v6915_v19 = vpop.eup %6914 }
 0x469   : > { %v1236_v20 = vmul.f32 %v6915_v19, %v6907_v57 }
 0x46a   : > { %6309 = vmatpush3.bf16.msra.mxu0 %v6733_v17 }
 0x46b   : > { %6310 = vmatprep.subr.bf16.mxu0 %v6734_v18  ;;  %v1240_v24 = vpack.c.bf16 %v1236_v20, %v1236_v20 }
 0x46d   : > { %6303 = vmatmul.mubr.msk.bf16.vlgmr.msra.gmra.mrb[28].mxu1 %vm1192_vm3, %v1240_v24 }
 0x46e   : > { %6311 = vmatpush3.bf16.msra.mxu0 %v6734_v18  ;;  %6327 = vmatpush3.bf16.msra.mxu1 %v6735_v11 }
 0x46f   : > { %6342 = vmatprep.mubr.bf16.mxu1 %v7241_v9  ;;  %6312 = vmatprep.subr.bf16.mxu0 %v6736_v25 }
 0x470   : > { %6328 = vmatprep.subr.bf16.mxu1 %v6737_v26 }
 0x472   : > { %6313 = vmatpush3.bf16.msra.mxu0 %v6736_v25  ;;  %6329 = vmatpush3.bf16.msra.mxu1 %v6737_v26 }
 0x473   : > { %6314 = vmatprep.subr.bf16.mxu0 %v6738_v27  ;;  %6330 = vmatprep.subr.bf16.mxu1 %v6739_v28 }
 0x476   : > { %6315 = vmatpush3.bf16.msra.mxu0 %v6738_v27  ;;  %6331 = vmatpush3.bf16.msra.mxu1 %v6739_v28 }
 0x477   : > { %6316 = vmatprep.subr.bf16.mxu0 %v6740_v29  ;;  %6332 = vmatprep.subr.bf16.mxu1 %v6741_v30 }
 0x47a   : > { %6317 = vmatpush3.bf16.msra.mxu0 %v6740_v29  ;;  %6333 = vmatpush3.bf16.msra.mxu1 %v6741_v30  ;;  %v1712_v30 = vrot.slane %v7286_v50, %v7234_v59 }
 0x47b   : > { %6318 = vmatprep.subr.bf16.mxu0 %v6742_v31  ;;  %6334 = vmatprep.subr.bf16.mxu1 %v6743_v32 }
 0x47e   : > { %6319 = vmatpush3.bf16.msra.mxu0 %v6742_v31  ;;  %6335 = vmatpush3.bf16.msra.mxu1 %v6743_v32 }
 0x47f   : > { %6320 = vmatprep.subr.bf16.mxu0 %v6744_v33  ;;  %6336 = vmatprep.subr.bf16.mxu1 %v6745_v34 }
 0x482   : > { %6321 = vmatpush3.bf16.msra.mxu0 %v6744_v33  ;;  %6337 = vmatpush3.bf16.msra.mxu1 %v6745_v34 }
 0x483   : > { %6338 = vmatprep.subr.bf16.mxu1 %v6746_v35  ;;  %6346 = vmatprep.subr.bf16.mxu0 %v6747_v36 }
 0x485   : > { %6323 = vmatmul.mubr.bf16.vlgmr.msra.gmra.mrb[12].mxu0 %v7245_v13 }
 0x486   : > { %6339 = vmatpush3.bf16.msra.mxu1 %v6746_v35  ;;  %6347 = vmatpush3.bf16.msra.mxu0 %v6747_v36 }
 0x487   : > { %6362 = vmatprep.mubr.bf16.mxu0 %v7241_v9  ;;  %6340 = vmatprep.subr.bf16.mxu1 %v6748_v37 }
 0x488   : > { %6348 = vmatprep.subr.bf16.mxu0 %v6749_v38 }
 0x48a   : > { %6341 = vmatpush3.bf16.msra.mxu1 %v6748_v37  ;;  %6349 = vmatpush3.bf16.msra.mxu0 %v6749_v38 }
 0x48b   : > { %6350 = vmatprep.subr.bf16.mxu0 %v6750_v39  ;;  %6366 = vmatprep.subr.bf16.mxu1 %v7063_v21 }
 0x48d   : > { %6343 = vmatmul.mubr.bf16.vlgmr.msra.gmra.mrb[32].mxu1 %v7245_v13 }
 0x48e   : > { %6351 = vmatpush3.bf16.msra.mxu0 %v6750_v39  ;;  %6368 = vmatprep.mubr.msk.bf16.mxu1 %vm7064_vm0, %v7063_v21 }
 0x48f   : > { %6352 = vmatprep.subr.bf16.mxu0 %v6751_v40 }
 0x492   : > { %6353 = vmatpush3.bf16.msra.mxu0 %v6751_v40 }
 0x493   : > { %6354 = vmatprep.subr.bf16.mxu0 %v6752_v41 }
 0x496   : > { %6355 = vmatpush3.bf16.msra.mxu0 %v6752_v41 }
 0x497   : > { %6356 = vmatprep.subr.bf16.mxu0 %v6753_v42 }
 0x49a   : > { %6357 = vmatpush3.bf16.msra.mxu0 %v6753_v42 }
 0x49b   : > { %6358 = vmatprep.subr.bf16.mxu0 %v6754_v43 }
 0x49e   : > { %6359 = vmatpush3.bf16.msra.mxu0 %v6754_v43 }
 0x49f   : > { %6360 = vmatprep.subr.bf16.mxu0 %v6755_v44 }
 0x4a2   : > { %6361 = vmatpush3.bf16.msra.mxu0 %v6755_v44 }
 0x4a3   : > { %6390 = vmatprep.subr.bf16.mxu0 %v7063_v21 }
 0x4a5   : > { %6363 = vmatmul.mubr.bf16.vlgmr.msra.gmra.mrb[16].mxu0 %v7245_v13 }
 0x4a6   : > { %6392 = vmatprep.mubr.msk.bf16.mxu0 %vm7064_vm0, %v7063_v21 }
 0x528   : > { %v7364_v45 = vpop.f32.mrb[20].mxu1 }
 0x529   : > { %v6286_v46 = vpop.f32.mrb[21].mxu1 }
 0x52a   : > { %v1285_v47 = vpop.f32.mrb[22].mxu1 }
 0x52b   : > { %v6287_v48 = vpop.f32.mrb[23].mxu1 }
 0x530   : > { %v7366_v49 = vpop.f32.mrb[24].mxu1 }
 0x531   : > { %v1426_v52 = vpack.c.bf16 %v7366_v49, %v7364_v45  ;;  %v6292_v53 = vpop.f32.mrb[25].mxu1  ;;  %v6778_v45 = vld [vmem:[%s7163_s12 + $0x190] sm:$0xff]   ;;  %v6779_v49 = vld [vmem:[%s7163_s12 + $0x198] sm:$0xff]  }
 0x532   : > { %v1331_v54 = vpop.f32.mrb[26].mxu1 }
 0x533   : > { %v6293_v56 = vpop.f32.mrb[27].mxu1 }
 0x538   : > { %v7370_v57 = vpop.f32.mrb[8].mxu0 }
 0x539   : > { %v6298_v58 = vpop.f32.mrb[9].mxu0 }
 0x53a   : > { %v1377_v60 = vpop.f32.mrb[10].mxu0 }
 0x53b   : > { %v6299_v61 = vpop.f32.mrb[11].mxu0 }
 0x540   : > { %v7372_v62 = vpop.f32.mrb[28].mxu1 }
 0x541   : > { %v1427_v63 = vpack.c.bf16 %v7372_v62, %v7370_v57  ;;  %v6304_v1 = vpop.f32.mrb[29].mxu1  ;;  %v6782_v62 = vld [vmem:[%s7163_s12 + $0x1b0] sm:$0xff]  }
 0x542   : > { %v1423_v2 = vpop.f32.mrb[30].mxu1 }
 0x543   : > { %v6305_v3 = vpop.f32.mrb[31].mxu1 }
 0x558   : > { %v6324_v5 = vpop.f32.mrb[12].mxu0 }
 0x559   : > { %v1535_v6 = vpop.f32.mrb[13].mxu0  ;;  %v1544_v33 = vadd.f32 %v6324_v5, %v1452_v0 }
 0x55a   : > { %v6325_v7 = vpop.f32.mrb[14].mxu0  ;;  %v1536_v20 = vadd.f32 %v1535_v6, %v1452_v0 }
 0x55b   : > { %v1538_v4 = vpop.f32.mrb[15].mxu0  ;;  %v5899_v42 = vpack.c.bf16 %v1544_v33, %v1544_v33  ;;  %v1547_v48 = vadd.f32 %v6325_v7, %v1452_v0 }
 0x55c   : > { %v5897_v25 = vpack.c.bf16 %v1536_v20, %v1536_v20  ;;  %v1539_v23 = vadd.f32 %v1538_v4, %v1452_v0 }
 0x55d   : > { %v5900_v54 = vpack.c.bf16 %v1547_v48, %v1547_v48 }
 0x55e   : > { %v5898_v29 = vpack.c.bf16 %v1539_v23, %v1539_v23 }
 0x560   : > { %v6344_v11 = vpop.f32.mrb[32].mxu1 }
 0x561   : > { %v1665_v12 = vpop.f32.mrb[33].mxu1  ;;  %v1674_v26 = vadd.f32 %v6344_v11, %v1582_v10 }
 0x562   : > { %v1666_v14 = vadd.f32 %v1665_v12, %v1582_v10  ;;  %v6345_v15 = vpop.f32.mrb[34].mxu1 }
 0x563   : > { %v1668_v16 = vpop.f32.mrb[35].mxu1  ;;  %v5903_v28 = vpack.c.bf16 %v1674_v26, %v1674_v26  ;;  %v1677_v32 = vadd.f32 %v6345_v15, %v1582_v10 }
 0x564   : > { %v5901_v17 = vpack.c.bf16 %v1666_v14, %v1666_v14  ;;  %v1669_v19 = vadd.f32 %v1668_v16, %v1582_v10 }
 0x565   : > { %v1918_v31 = vsel %vm1003_vm1, %v5903_v28, 0  ;;  %v5904_v37 = vpack.c.bf16 %v1677_v32, %v1677_v32 }
 0x566   : > { %v1826_v18 = vsel %vm1003_vm1, %v5901_v17, 0  ;;  %v5902_v24 = vpack.c.bf16 %v1669_v19, %v1669_v19 }
 0x567   : > { %6367 = vmatpush3.bf16.xpose.msra.mxu1 %v1826_v18  ;;  %v1964_v44 = vsel %vm1003_vm1, %v5904_v37, 0 }
 0x568   : > { %6372 = vmatprep.subr.bf16.mxu1 %v7063_v21  ;;  %v1872_v27 = vsel %vm1003_vm1, %v5902_v24, 0 }
 0x56e   : > { %6369 = vmatmul.mubr.msk.bf16.vlgmr.msra.gmra.mrb[36].mxu1 %vm1003_vm1, %v5897_v25 }
 0x56f   : > { %6373 = vmatpush3.bf16.xpose.msra.mxu1 %v1872_v27  ;;  %6374 = vmatprep.mubr.msk.bf16.mxu1 %vm7064_vm0, %v7063_v21 }
 0x570   : > { %6378 = vmatprep.subr.bf16.mxu1 %v7063_v21 }
 0x576   : > { %6375 = vmatmul.mubr.msk.bf16.vlgmr.msra.gmra.mrb[40].mxu1 %vm1003_vm1, %v5898_v29 }
 0x577   : > { %6379 = vmatpush3.bf16.xpose.msra.mxu1 %v1918_v31  ;;  %6380 = vmatprep.mubr.msk.bf16.mxu1 %vm7064_vm0, %v7063_v21 }
 0x578   : > { %v6364_v34 = vpop.f32.mrb[16].mxu0  ;;  %6384 = vmatprep.subr.bf16.mxu1 %v7063_v21 }
 0x579   : > { %v7396_v35 = vadd.f32 %v6364_v34, %v1712_v30  ;;  %v1795_v36 = vpop.f32.mrb[17].mxu0 }
 0x57a   : > { %v1796_v38 = vadd.f32 %v1795_v36, %v1712_v30  ;;  %v6365_v39 = vpop.f32.mrb[18].mxu0 }
 0x57b   : > { %v7398_v40 = vadd.f32 %v6365_v39, %v1712_v30  ;;  %v1798_v41 = vpop.f32.mrb[19].mxu0 }
 0x57c   : > { %v5905_v43 = vpack.c.bf16 %v1796_v38, %v1796_v38  ;;  %v1799_v47 = vadd.f32 %v1798_v41, %v1712_v30 }
 0x57e   : > { %v2062_v46 = vsel %vm1244_vm2, %v5905_v43, 0  ;;  %6381 = vmatmul.mubr.msk.bf16.vlgmr.msra.gmra.mrb[44].mxu1 %vm1003_vm1, %v5899_v42  ;;  %v5906_v53 = vpack.c.bf16 %v1799_v47, %v1799_v47 }
 0x57f   : > { %6385 = vmatpush3.bf16.xpose.msra.mxu1 %v1964_v44  ;;  %6391 = vmatpush3.bf16.msra.mxu0 %v2062_v46 }
 0x580   : > { %6386 = vmatprep.mubr.msk.bf16.mxu1 %vm7064_vm0, %v7063_v21  ;;  %6396 = vmatprep.subr.bf16.mxu1 %v7063_v21  ;;  %v2108_v56 = vsel %vm1244_vm2, %v5906_v53, 0 }
 0x581   : > { %6402 = vmatprep.subr.bf16.mxu0 %v7063_v21 }
 0x586   : > { %6387 = vmatmul.mubr.msk.bf16.vlgmr.msra.gmra.mrb[48].mxu1 %vm1003_vm1, %v5900_v54 }
 0x587   : > { %6397 = vmatpush3.bf16.msra.mxu1 %v2108_v56  ;;  %6398 = vmatprep.mubr.msk.bf16.mxu1 %vm7064_vm0, %v7063_v21 }
 0x588   : > { %6408 = vmatprep.subr.bf16.mxu1 %v7063_v21 }
 0x641   : > { %v1862_v58 = vpop.f32.mrb[36].mxu1 }
 0x642   : > { %v2006_v60 = vmul.f32 0.17677669, %v1862_v58  ;;  %v6370_v61 = vpop.f32.mrb[37].mxu1  ;;  %v5907_v58 = vpack.c.bf16 %v7396_v35, %v7396_v35  ;;  %v6756_v35 = vld [vmem:[%s7163_s12 + $0x80] sm:$0xff]  }
 0x643   : > { %v1865_v1 = vpop.f32.mrb[38].mxu1 }
 0x644   : > { %v6371_v2 = vpop.f32.mrb[39].mxu1  ;;  %v2010_v3 = vsel %vm1192_vm3, %v2006_v60, -inf  ;;  %v2154_v1 = vsel %vm1244_vm2, %v5907_v58, 0 }
 0x645   : > { %2011 = vmax.xlane.f32.xlu0 %v2010_v3 }
 0x649   : > { %v1908_v5 = vpop.f32.mrb[40].mxu1 }
 0x64a   : > { %v2007_v6 = vmul.f32 0.17677669, %v1908_v5  ;;  %v6376_v7 = vpop.f32.mrb[41].mxu1  ;;  %v5908_v5 = vpack.c.bf16 %v7398_v40, %v7398_v40 }
 0x64b   : > { %v1911_v4 = vpop.f32.mrb[42].mxu1 }
 0x64c   : > { %v6377_v10 = vpop.f32.mrb[43].mxu1  ;;  %v2013_v11 = vsel %vm1192_vm3, %v2007_v6, -inf  ;;  %v2200_v4 = vsel %vm1244_vm2, %v5908_v5, 0  ;;  %v6776_v5 = vld [vmem:[%s7163_s12 + $0x180] sm:$0xff]  }
 0x64d   : > { %2014 = vmax.xlane.f32.xlu1 %v2013_v11 }
 0x651   : > { %v1954_v12 = vpop.f32.mrb[44].mxu1 }
 0x652   : > { %v2008_v14 = vmul.f32 0.17677669, %v1954_v12  ;;  %v6382_v15 = vpop.f32.mrb[45].mxu1 }
 0x653   : > { %v1957_v16 = vpop.f32.mrb[46].mxu1 }
 0x654   : > { %v6383_v0 = vpop.f32.mrb[47].mxu1  ;;  %v2016_v17 = vsel %vm1192_vm3, %v2008_v14, -inf }
 0x655   : > { %2017 = vmax.xlane.f32.xlu0 %v2016_v17  ;;  %v6757_v0 = vld [vmem:[%s7163_s12 + $0x88] sm:$0xff]   ;;  %v6758_v17 = vld [vmem:[%s7163_s12 + $0x90] sm:$0xff]  }
 0x659   : > { %v2000_v18 = vpop.f32.mrb[48].mxu1 }
 0x65a   : > { %v2009_v19 = vmul.f32 0.17677669, %v2000_v18  ;;  %v6388_v20 = vpop.f32.mrb[49].mxu1  ;;  %v6759_v18 = vld [vmem:[%s7163_s12 + $0x98] sm:$0xff]  }
 0x65b   : > { %v2003_v24 = vpop.f32.mrb[50].mxu1  ;;  %v6761_v20 = vld [vmem:[%s7163_s12 + $0xa8] sm:$0xff]  }
 0x65c   : > { %v6389_v25 = vpop.f32.mrb[51].mxu1  ;;  %v2019_v26 = vsel %vm1192_vm3, %v2009_v19, -inf  ;;  %v6762_v24 = vld [vmem:[%s7163_s12 + $0xb0] sm:$0xff]  }
 0x65d   : > { %2020 = vmax.xlane.f32.xlu1 %v2019_v26  ;;  %v6763_v25 = vld [vmem:[%s7163_s12 + $0xb8] sm:$0xff]   ;;  %v6764_v26 = vld [vmem:[%s7163_s12 + $0x280] sm:$0xff]  }
 0x6d2   : > { %v2012_v27 = vpop.xlane.xlu0 %2011 }
 0x6d3   : > { %v2022_v23 = vsub.f32 %v2006_v60, %v2012_v27  ;;  %v6765_v27 = vld [vmem:[%s7163_s12 + $0x288] sm:$0xff]  }
 0x6d5   : > { %v2026_v28 = vmul.f32 1.442695, %v2022_v23  ;;  %v6766_v23 = vld [vmem:[%s7163_s12 + $0x290] sm:$0xff]  }
 0x6d7   : > { %6916 = vpow2.f32 %v2026_v28  ;;  %v6767_v28 = vld [vmem:[%s7163_s12 + $0x298] sm:$0xff]  }
 0x6da   : > { %v2015_v29 = vpop.xlane.xlu1 %2014 }
 0x6db   : > { %v2023_v30 = vsub.f32 %v2007_v6, %v2015_v29  ;;  %v6768_v29 = vld [vmem:[%s7163_s12 + $0x2a0] sm:$0xff]  }
 0x6dd   : > { %v2028_v31 = vmul.f32 1.442695, %v2023_v30  ;;  %v6769_v30 = vld [vmem:[%s7163_s12 + $0x2a8] sm:$0xff]  }
 0x6df   : > { %6918 = vpow2.f32 %v2028_v31  ;;  %v6770_v31 = vld [vmem:[%s7163_s12 + $0x2b0] sm:$0xff]  }
 0x6e1   : > { %v6917_v32 = vpop.eup %6916 }
 0x6e2   : > { %v2018_v33 = vpop.xlane.xlu0 %2017  ;;  %v2034_v34 = vsel %vm1192_vm3, %v6917_v32, 0.0 }
 0x6e3   : > { %v2024_v36 = vsub.f32 %v2008_v14, %v2018_v33  ;;  %2035 = vadd.xlane.f32.xlu0 %v2034_v34  ;;  %v6772_v33 = vld [vmem:[%s7168_s27 + $0x10] sm:$0xff]   ;;  %v6773_v34 = vld [vmem:[%s7168_s27 + $0x18] sm:$0xff]  }
 0x6e5   : > { %v2030_v37 = vmul.f32 1.442695, %v2024_v36  ;;  %v6774_v36 = vld [vmem:[%s7168_s27] sm:$0xff]  }
 0x6e7   : > { %6920 = vpow2.f32 %v2030_v37 }
 0x6e9   : > { %v6919_v38 = vpop.eup %6918 }
 0x6ea   : > { %v2021_v39 = vpop.xlane.xlu1 %2020  ;;  %v2037_v41 = vsel %vm1192_vm3, %v6919_v38, 0.0 }
 0x6eb   : > { %v2025_v42 = vsub.f32 %v2009_v19, %v2021_v39  ;;  %2038 = vadd.xlane.f32.xlu1 %v2037_v41  ;;  %v6760_v19 = vld [vmem:[%s7163_s12 + $0xa0] sm:$0xff]  }
 0x6ed   : > { %v2032_v43 = vmul.f32 1.442695, %v2025_v42 }
 0x6ef   : > { %6922 = vpow2.f32 %v2032_v43 }
 0x6f1   : > { %v6921_v44 = vpop.eup %6920 }
 0x6f2   : > { %v2040_v46 = vsel %vm1192_vm3, %v6921_v44, 0.0 }
 0x6f3   : > { %2041 = vadd.xlane.f32.xlu0 %v2040_v46 }
 0x6f9   : > { %v6923_v47 = vpop.eup %6922 }
 0x6fa   : > { %v2043_v48 = vsel %vm1192_vm3, %v6923_v47, 0.0 }
 0x6fb   : > { %2044 = vadd.xlane.f32.xlu1 %v2043_v48 }
 0x770   : > { %v2036_v53 = vpop.xlane.xlu0 %2035 }
 0x771   : > { %6924 = vrcp.f32 %v2036_v53 }
 0x778   : > { %v2039_v54 = vpop.xlane.xlu1 %2038 }
 0x779   : > { %6926 = vrcp.f32 %v2039_v54 }
 0x77b   : > { %v6925_v56 = vpop.eup %6924 }
 0x77c   : > { %v2050_v60 = vmul.f32 %v6925_v56, %v6917_v32  ;;  %v6771_v32 = vld [vmem:[%s7163_s12 + $0x2b8] sm:$0xff]  }
 0x77e   : > { %v2054_v61 = vpack.c.bf16 %v2050_v60, %v2050_v60 }
 0x780   : > { %6393 = vmatmul.mubr.msk.bf16.vlgmr.msra.gmra.mrb[20].mxu0 %vm1192_vm3, %v2054_v61  ;;  %v2042_v2 = vpop.xlane.xlu0 %2041 }
 0x781   : > { %6403 = vmatpush3.bf16.msra.mxu0 %v2154_v1  ;;  %6928 = vrcp.f32 %v2042_v2  ;;  %6404 = vmatprep.mubr.msk.bf16.mxu0 %vm7064_vm0, %v7063_v21  ;;  %v6775_v1 = vld [vmem:[%s7168_s27 + $0x8] sm:$0xff]  }
 0x782   : > { %6414 = vmatprep.subr.bf16.mxu0 %v6772_v33 }
 0x783   : > { %v6927_v3 = vpop.eup %6926 }
 0x784   : > { %v2051_v6 = vmul.f32 %v6927_v3, %v6919_v38 }
 0x786   : > { %v2055_v7 = vpack.c.bf16 %v2051_v6, %v2051_v6  ;;  %v6777_v6 = vld [vmem:[%s7163_s12 + $0x188] sm:$0xff]  }
 0x788   : > { %6399 = vmatmul.mubr.msk.bf16.vlgmr.msra.gmra.mrb[52].mxu1 %vm1192_vm3, %v2055_v7  ;;  %v2045_v10 = vpop.xlane.xlu1 %2044  ;;  %v6781_v7 = vld [vmem:[%s7163_s12 + $0x1a8] sm:$0xff]  }
 0x789   : > { %6409 = vmatpush3.bf16.msra.mxu1 %v2200_v4  ;;  %6930 = vrcp.f32 %v2045_v10  ;;  %6410 = vmatprep.mubr.msk.bf16.mxu1 %vm7064_vm0, %v7063_v21  ;;  %v6783_v10 = vld [vmem:[%s7163_s12 + $0x1b8] sm:$0xff]  }
 0x78a   : > { %6430 = vmatprep.subr.bf16.mxu1 %v6756_v35 }
 0x78b   : > { %v6929_v11 = vpop.eup %6928 }
 0x78c   : > { %v2052_v12 = vmul.f32 %v6929_v11, %v6921_v44  ;;  %v7487_v11 = vsub.s32 2, %v7226_v51 }
 0x78e   : > { %v2056_v40 = vpack.c.bf16 %v2052_v12, %v2052_v12  ;;  %v2663_v12 = vrot.slane %v7286_v50, %v7487_v11 }
 0x790   : > { %6405 = vmatmul.mubr.msk.bf16.vlgmr.msra.gmra.mrb[24].mxu0 %vm1192_vm3, %v2056_v40 }
 0x791   : > { %6415 = vmatpush3.bf16.msra.mxu0 %v6772_v33 }
 0x792   : > { %6416 = vmatprep.subr.bf16.mxu0 %v6773_v34 }
 0x793   : > { %v6931_v14 = vpop.eup %6930 }
 0x794   : > { %v2053_v15 = vmul.f32 %v6931_v14, %v6923_v47 }
 0x795   : > { %6417 = vmatpush3.bf16.msra.mxu0 %v6773_v34 }
 0x796   : > { %v2057_v16 = vpack.c.bf16 %v2053_v15, %v2053_v15  ;;  %6422 = vmatprep.subr.bf16.mxu0 %v6774_v36 }
 0x798   : > { %6411 = vmatmul.mubr.msk.bf16.vlgmr.msra.gmra.mrb[56].mxu1 %vm1192_vm3, %v2057_v16 }
 0x799   : > { %6431 = vmatpush3.bf16.msra.mxu1 %v6756_v35  ;;  %6446 = vmatprep.mubr.bf16.mxu1 %v7241_v9 }
 0x79a   : > { %6432 = vmatprep.subr.bf16.mxu1 %v6757_v0 }
 0x79d   : > { %6433 = vmatpush3.bf16.msra.mxu1 %v6757_v0 }
 0x79e   : > { %6434 = vmatprep.subr.bf16.mxu1 %v6758_v17 }
 0x7a1   : > { %6435 = vmatpush3.bf16.msra.mxu1 %v6758_v17 }
 0x7a2   : > { %6436 = vmatprep.subr.bf16.mxu1 %v6759_v18 }
 0x7a5   : > { %6437 = vmatpush3.bf16.msra.mxu1 %v6759_v18  ;;  %v2532_v18 = vsub.s32 6, %v7226_v51 }
 0x7a6   : > { %6438 = vmatprep.subr.bf16.mxu1 %v6760_v19 }
 0x7a9   : > { %6439 = vmatpush3.bf16.msra.mxu1 %v6760_v19  ;;  %v7497_v19 = vld [vmem:[%s7153_s13] sm:$0xff] }
 0x7aa   : > { %6440 = vmatprep.subr.bf16.mxu1 %v6761_v20 }
 0x7ad   : > { %6441 = vmatpush3.bf16.msra.mxu1 %v6761_v20  ;;  %v2533_v20 = vrot.slane %v7497_v19, %v2532_v18 }
 0x7ae   : > { %6442 = vmatprep.subr.bf16.mxu1 %v6762_v24 }
 0x7b1   : > { %6443 = vmatpush3.bf16.msra.mxu1 %v6762_v24 }
 0x7b2   : > { %6444 = vmatprep.subr.bf16.mxu1 %v6763_v25 }
 0x7b5   : > { %6445 = vmatpush3.bf16.msra.mxu1 %v6763_v25 }
 0x7b6   : > { %6470 = vmatprep.subr.bf16.mxu1 %v6764_v26 }
 0x7b8   : > { %6447 = vmatmul.mubr.bf16.vlgmr.msra.gmra.mrb[60].mxu1 %v7245_v13 }
 0x7b9   : > { %6471 = vmatpush3.bf16.msra.mxu1 %v6764_v26  ;;  %6486 = vmatprep.mubr.bf16.mxu1 %v7241_v9 }
 0x7ba   : > { %6472 = vmatprep.subr.bf16.mxu1 %v6765_v27 }
 0x7bd   : > { %6473 = vmatpush3.bf16.msra.mxu1 %v6765_v27 }
 0x7be   : > { %6474 = vmatprep.subr.bf16.mxu1 %v6766_v23 }
 0x7c1   : > { %6475 = vmatpush3.bf16.msra.mxu1 %v6766_v23 }
 0x7c2   : > { %6476 = vmatprep.subr.bf16.mxu1 %v6767_v28 }
 0x7c5   : > { %6477 = vmatpush3.bf16.msra.mxu1 %v6767_v28  ;;  %v2403_v28 = vrot.slane %v7497_v19, %v7487_v11 }
 0x7c6   : > { %6478 = vmatprep.subr.bf16.mxu1 %v6768_v29 }
 0x7c9   : > { %6479 = vmatpush3.bf16.msra.mxu1 %v6768_v29 }
 0x7ca   : > { %6480 = vmatprep.subr.bf16.mxu1 %v6769_v30 }
 0x7cd   : > { %6481 = vmatpush3.bf16.msra.mxu1 %v6769_v30 }
 0x7ce   : > { %6482 = vmatprep.subr.bf16.mxu1 %v6770_v31 }
 0x7d1   : > { %6483 = vmatpush3.bf16.msra.mxu1 %v6770_v31 }
 0x7d2   : > { %6484 = vmatprep.subr.bf16.mxu1 %v6771_v32 }
 0x7d5   : > { %6485 = vmatpush3.bf16.msra.mxu1 %v6771_v32 }
 0x7d6   : > { %6508 = vmatprep.subr.bf16.mxu1 %v7063_v21 }
 0x7d8   : > { %6487 = vmatmul.mubr.bf16.vlgmr.msra.gmra.mrb[64].mxu1 %v7245_v13 }
 0x7d9   : > { %6510 = vmatprep.mubr.msk.bf16.mxu1 %vm7064_vm0, %v7063_v21 }
 0x853   : > { %v2098_v37 = vpop.f32.mrb[20].mxu0 }
 0x854   : > { %v6394_v38 = vpop.f32.mrb[21].mxu0 }
 0x855   : > { %v2101_v39 = vpop.f32.mrb[22].mxu0 }
 0x856   : > { %v6395_v41 = vpop.f32.mrb[23].mxu0 }
 0x85b   : > { %v2144_v42 = vpop.f32.mrb[52].mxu1 }
 0x85c   : > { %v2242_v43 = vpack.c.bf16 %v2144_v42, %v2098_v37  ;;  %v6400_v44 = vpop.f32.mrb[53].mxu1 }
 0x85d   : > { %v2147_v46 = vpop.f32.mrb[54].mxu1 }
 0x85e   : > { %v6401_v47 = vpop.f32.mrb[55].mxu1  ;;  %6418 = vmatprep.mubr.msk.bf16.mxu0 %vm1003_vm1, %v2242_v43 }
 0x863   : > { %v2190_v48 = vpop.f32.mrb[24].mxu0 }
 0x864   : > { %v6406_v53 = vpop.f32.mrb[25].mxu0 }
 0x865   : > { %v2193_v54 = vpop.f32.mrb[26].mxu0 }
 0x866   : > { %v6407_v56 = vpop.f32.mrb[27].mxu0 }
 0x86b   : > { %v2236_v58 = vpop.f32.mrb[56].mxu1 }
 0x86c   : > { %v2243_v60 = vpack.c.bf16 %v2236_v58, %v2190_v48  ;;  %v6412_v61 = vpop.f32.mrb[57].mxu1 }
 0x86d   : > { %v2239_v2 = vpop.f32.mrb[58].mxu1 }
 0x86e   : > { %v6413_v3 = vpop.f32.mrb[59].mxu1  ;;  %6419 = vmatmul.mubr.msk.bf16.vlgmr.msra.gmra.mrb[28].mxu0 %vm1003_vm1, %v2243_v60 }
 0x86f   : > { %6423 = vmatpush3.bf16.msra.mxu0 %v6774_v36  ;;  %6426 = vmatprep.mubr.msk.bf16.mxu0 %vm1003_vm1, %v1426_v52  ;;  %v6780_v52 = vld [vmem:[%s7163_s12 + $0x1a0] sm:$0xff]  }
 0x870   : > { %6424 = vmatprep.subr.bf16.mxu0 %v6775_v1 }
 0x873   : > { %6425 = vmatpush3.bf16.msra.mxu0 %v6775_v1 }
 0x874   : > { %6450 = vmatprep.subr.bf16.mxu0 %v6776_v5 }
 0x87a   : > { %6427 = vmatmul.mubr.msk.bf16.vlgmr.msra.gmra.mrb[28].mxu0 %vm1003_vm1, %v1427_v63 }
 0x87b   : > { %6451 = vmatpush3.bf16.msra.mxu0 %v6776_v5  ;;  %6466 = vmatprep.mubr.bf16.mxu0 %v7241_v9 }
 0x87c   : > { %6452 = vmatprep.subr.bf16.mxu0 %v6777_v6 }
 0x87f   : > { %6453 = vmatpush3.bf16.msra.mxu0 %v6777_v6 }
 0x880   : > { %6454 = vmatprep.subr.bf16.mxu0 %v6778_v45 }
 0x883   : > { %6455 = vmatpush3.bf16.msra.mxu0 %v6778_v45 }
 0x884   : > { %6456 = vmatprep.subr.bf16.mxu0 %v6779_v49 }
 0x887   : > { %6457 = vmatpush3.bf16.msra.mxu0 %v6779_v49 }
 0x888   : > { %6458 = vmatprep.subr.bf16.mxu0 %v6780_v52 }
 0x88b   : > { %v7478_v35 = vpop.f32.mrb[60].mxu1  ;;  %6459 = vmatpush3.bf16.msra.mxu0 %v6780_v52 }
 0x88c   : > { %v2486_v57 = vpop.f32.mrb[61].mxu1  ;;  %6460 = vmatprep.subr.bf16.mxu0 %v6781_v7  ;;  %v2495_v58 = vadd.f32 %v7478_v35, %v2403_v28 }
 0x88d   : > { %v6449_v63 = vpop.f32.mrb[62].mxu1  ;;  %v2487_v36 = vadd.f32 %v2486_v57, %v2403_v28 }
 0x88e   : > { %v2489_v4 = vpop.f32.mrb[63].mxu1  ;;  %v2498_v37 = vadd.f32 %v6449_v63, %v2403_v28  ;;  %v5911_v61 = vpack.c.bf16 %v2495_v58, %v2495_v58 }
 0x88f   : > { %6461 = vmatpush3.bf16.msra.mxu0 %v6781_v7  ;;  %v5909_v41 = vpack.c.bf16 %v2487_v36, %v2487_v36  ;;  %v2490_v47 = vadd.f32 %v2489_v4, %v2403_v28 }
 0x890   : > { %6462 = vmatprep.subr.bf16.mxu0 %v6782_v62  ;;  %v5912_v42 = vpack.c.bf16 %v2498_v37, %v2498_v37 }
 0x891   : > { %v5910_v53 = vpack.c.bf16 %v2490_v47, %v2490_v47 }
 0x893   : > { %6463 = vmatpush3.bf16.msra.mxu0 %v6782_v62 }
 0x894   : > { %6464 = vmatprep.subr.bf16.mxu0 %v6783_v10 }
 0x897   : > { %6465 = vmatpush3.bf16.msra.mxu0 %v6783_v10 }
 0x898   : > { %6490 = vmatprep.subr.bf16.mxu0 %v7063_v21 }
 0x89a   : > { %6467 = vmatmul.mubr.bf16.vlgmr.msra.gmra.mrb[32].mxu0 %v7245_v13 }
 0x89b   : > { %6492 = vmatprep.mubr.msk.bf16.mxu0 %vm7064_vm0, %v7063_v21 }
 0x8ab   : > { %v6488_v40 = vpop.f32.mrb[64].mxu1 }
 0x8ac   : > { %v7491_v14 = vadd.f32 %v6488_v40, %v2663_v12  ;;  %v2746_v15 = vpop.f32.mrb[65].mxu1 }
 0x8ad   : > { %v6489_v16 = vpop.f32.mrb[66].mxu1  ;;  %v2747_v54 = vadd.f32 %v2746_v15, %v2663_v12 }
 0x8ae   : > { %v7493_v0 = vadd.f32 %v6489_v16, %v2663_v12  ;;  %v2749_v17 = vpop.f32.mrb[67].mxu1 }
 0x8af   : > { %v2750_v33 = vadd.f32 %v2749_v17, %v2663_v12  ;;  %v5917_v60 = vpack.c.bf16 %v2747_v54, %v2747_v54 }
 0x8b1   : > { %v5918_v39 = vpack.c.bf16 %v2750_v33, %v2750_v33  ;;  %v3013_v1 = vsel %vm1244_vm2, %v5917_v60, 0 }
 0x8b3   : > { %v3059_v46 = vsel %vm1244_vm2, %v5918_v39, 0 }
 0x96d   : > { %v6468_v24 = vpop.f32.mrb[32].mxu0 }
 0x96e   : > { %v2616_v25 = vpop.f32.mrb[33].mxu0  ;;  %v2625_v43 = vadd.f32 %v6468_v24, %v2533_v20 }
 0x96f   : > { %v2617_v26 = vadd.f32 %v2616_v25, %v2533_v20  ;;  %v6469_v27 = vpop.f32.mrb[34].mxu0 }
 0x970   : > { %v2628_v23 = vadd.f32 %v6469_v27, %v2533_v20  ;;  %v2619_v50 = vpop.f32.mrb[35].mxu0  ;;  %v5915_v48 = vpack.c.bf16 %v2625_v43, %v2625_v43 }
 0x971   : > { %v5913_v29 = vpack.c.bf16 %v2617_v26, %v2617_v26  ;;  %v2620_v32 = vadd.f32 %v2619_v50, %v2533_v20 }
 0x972   : > { %v5916_v30 = vpack.c.bf16 %v2628_v23, %v2628_v23  ;;  %v2869_v56 = vsel %vm1003_vm1, %v5915_v48, 0 }
 0x973   : > { %v2777_v31 = vsel %vm1003_vm1, %v5913_v29, 0  ;;  %v5914_v38 = vpack.c.bf16 %v2620_v32, %v2620_v32 }
 0x974   : > { %v2915_v34 = vsel %vm1003_vm1, %v5916_v30, 0  ;;  %6491 = vmatpush3.bf16.xpose.msra.mxu0 %v2777_v31 }
 0x975   : > { %6509 = vmatpush3.bf16.xpose.msra.mxu1 %v2915_v34  ;;  %6496 = vmatprep.subr.bf16.mxu0 %v7063_v21  ;;  %v2823_v44 = vsel %vm1003_vm1, %v5914_v38, 0 }
 0x976   : > { %6520 = vmatprep.subr.bf16.mxu1 %v7063_v21 }
 0x97b   : > { %6493 = vmatmul.mubr.msk.bf16.vlgmr.msra.gmra.mrb[36].mxu0 %vm1003_vm1, %v5909_v41 }
 0x97c   : > { %6497 = vmatpush3.bf16.xpose.msra.mxu0 %v2823_v44  ;;  %6511 = vmatmul.mubr.msk.bf16.vlgmr.msra.gmra.mrb[68].mxu1 %vm1003_vm1, %v5912_v42 }
 0x97d   : > { %6521 = vmatpush3.bf16.msra.mxu1 %v3059_v46  ;;  %6498 = vmatprep.mubr.msk.bf16.mxu0 %vm7064_vm0, %v7063_v21 }
 0x97e   : > { %6502 = vmatprep.subr.bf16.mxu0 %v7063_v21  ;;  %6522 = vmatprep.mubr.msk.bf16.mxu1 %vm7064_vm0, %v7063_v21 }
 0x97f   : > { %6532 = vmatprep.subr.bf16.mxu1 %v7063_v21 }
 0x983   : > { %6499 = vmatmul.mubr.msk.bf16.vlgmr.msra.gmra.mrb[40].mxu0 %vm1003_vm1, %v5910_v53 }
 0x984   : > { %6503 = vmatpush3.bf16.xpose.msra.mxu0 %v2869_v56  ;;  %6504 = vmatprep.mubr.msk.bf16.mxu0 %vm7064_vm0, %v7063_v21  ;;  %v5919_v56 = vpack.c.bf16 %v7491_v14, %v7491_v14 }
 0x985   : > { %6514 = vmatprep.subr.bf16.mxu0 %v7063_v21 }
 0x98b   : > { %6505 = vmatmul.mubr.msk.bf16.vlgmr.msra.gmra.mrb[44].mxu0 %vm1003_vm1, %v5911_v61 }
 0x98c   : > { %6515 = vmatpush3.bf16.msra.mxu0 %v3013_v1  ;;  %6516 = vmatprep.mubr.msk.bf16.mxu0 %vm7064_vm0, %v7063_v21  ;;  %v3105_v1 = vsel %vm1244_vm2, %v5919_v56, 0 }
 0x98d   : > { %6526 = vmatprep.subr.bf16.mxu0 %v7063_v21 }
 0xa4e   : > { %v2813_v2 = vpop.f32.mrb[36].mxu0 }
 0xa4f   : > { %v2957_v3 = vmul.f32 0.17677669, %v2813_v2  ;;  %v6494_v5 = vpop.f32.mrb[37].mxu0  ;;  %v2951_v6 = vpop.f32.mrb[68].mxu1 }
 0xa50   : > { %v2816_v45 = vpop.f32.mrb[38].mxu0  ;;  %v6512_v49 = vpop.f32.mrb[69].mxu1  ;;  %v2960_v12 = vmul.f32 0.17677669, %v2951_v6  ;;  %v5920_v5 = vpack.c.bf16 %v7493_v0, %v7493_v0 }
 0xa51   : > { %v6495_v52 = vpop.f32.mrb[39].mxu0  ;;  %v2954_v7 = vpop.f32.mrb[70].mxu1  ;;  %v2961_v35 = vsel %vm1192_vm3, %v2957_v3, -inf  ;;  %v6784_v45 = vld [vmem:[%s7163_s12 + $0xc0] sm:$0xff]  }
 0xa52   : > { %v6513_v57 = vpop.f32.mrb[71].mxu1  ;;  %2962 = vmax.xlane.f32.xlu0 %v2961_v35  ;;  %v2970_v16 = vsel %vm1192_vm3, %v2960_v12, -inf  ;;  %v3151_v52 = vsel %vm1244_vm2, %v5920_v5, 0 }
 0xa56   : > { %v2859_v62 = vpop.f32.mrb[40].mxu0 }
 0xa57   : > { %v2958_v63 = vmul.f32 0.17677669, %v2859_v62  ;;  %v6500_v4 = vpop.f32.mrb[41].mxu0 }
 0xa58   : > { %v2862_v10 = vpop.f32.mrb[42].mxu0  ;;  %v6786_v4 = vld [vmem:[%s7163_s12 + $0xd0] sm:$0xff]  }
 0xa59   : > { %v6501_v40 = vpop.f32.mrb[43].mxu0  ;;  %v2964_v15 = vsel %vm1192_vm3, %v2958_v63, -inf  ;;  %v6787_v10 = vld [vmem:[%s7163_s12 + $0xd8] sm:$0xff]  }
 0xa5a   : > { %2965 = vmax.xlane.f32.xlu1 %v2964_v15  ;;  %v6789_v40 = vld [vmem:[%s7163_s12 + $0xe8] sm:$0xff]   ;;  %v6790_v15 = vld [vmem:[%s7163_s12 + $0xf0] sm:$0xff]  }
 0xa5e   : > { %2971 = vmax.xlane.f32.xlu1 %v2970_v16  ;;  %v2905_v17 = vpop.f32.mrb[44].mxu0  ;;  %v6791_v16 = vld [vmem:[%s7163_s12 + $0xf8] sm:$0xff]  }
 0xa5f   : > { %v2959_v18 = vmul.f32 0.17677669, %v2905_v17  ;;  %v6506_v20 = vpop.f32.mrb[45].mxu0  ;;  %v6792_v17 = vld [vmem:[%s7163_s12 + $0x2c0] sm:$0xff]  }
 0xa60   : > { %v2908_v24 = vpop.f32.mrb[46].mxu0  ;;  %v6794_v20 = vld [vmem:[%s7163_s12 + $0x2d0] sm:$0xff]  }
 0xa61   : > { %v6507_v25 = vpop.f32.mrb[47].mxu0  ;;  %v2967_v26 = vsel %vm1192_vm3, %v2959_v18, -inf  ;;  %v6795_v24 = vld [vmem:[%s7163_s12 + $0x2d8] sm:$0xff]  }
 0xa62   : > { %2968 = vmax.xlane.f32.xlu0 %v2967_v26  ;;  %v6796_v25 = vld [vmem:[%s7163_s12 + $0x2e0] sm:$0xff]   ;;  %v6797_v26 = vld [vmem:[%s7163_s12 + $0x2e8] sm:$0xff]  }
 0xadf   : > { %v2963_v27 = vpop.xlane.xlu0 %2962 }
 0xae0   : > { %v2973_v23 = vsub.f32 %v2957_v3, %v2963_v27  ;;  %v6798_v27 = vld [vmem:[%s7163_s12 + $0x2f0] sm:$0xff]  }
 0xae2   : > { %v2977_v50 = vmul.f32 1.442695, %v2973_v23  ;;  %v6799_v23 = vld [vmem:[%s7163_s12 + $0x2f8] sm:$0xff]  }
 0xae4   : > { %6932 = vpow2.f32 %v2977_v50  ;;  %v6800_v50 = vld [vmem:[%s7168_s27 + $0x20] sm:$0xff]  }
 0xae7   : > { %v2966_v28 = vpop.xlane.xlu1 %2965 }
 0xae8   : > { %v2974_v29 = vsub.f32 %v2958_v63, %v2966_v28  ;;  %v6785_v63 = vld [vmem:[%s7163_s12 + $0xc8] sm:$0xff]  }
 0xae9   : > { %v6801_v28 = vld [vmem:[%s7168_s27 + $0x28] sm:$0xff]  }
 0xaea   : > { %v2979_v30 = vmul.f32 1.442695, %v2974_v29  ;;  %v6802_v29 = vld [vmem:[%s7163_s12 + $0x1c0] sm:$0xff]  }
 0xaeb   : > { %v2972_v31 = vpop.xlane.xlu1 %2971 }
 0xaec   : > { %6934 = vpow2.f32 %v2979_v30  ;;  %v2976_v32 = vsub.f32 %v2960_v12, %v2972_v31  ;;  %v6788_v12 = vld [vmem:[%s7163_s12 + $0xe0] sm:$0xff]  }
 0xaee   : > { %v6933_v33 = vpop.eup %6932  ;;  %v2983_v34 = vmul.f32 1.442695, %v2976_v32 }
 0xaef   : > { %v2969_v36 = vpop.xlane.xlu0 %2968  ;;  %v2985_v37 = vsel %vm1192_vm3, %v6933_v33, 0.0 }
 0xaf0   : > { %6936 = vpow2.f32 %v2983_v34  ;;  %v2975_v38 = vsub.f32 %v2959_v18, %v2969_v36  ;;  %2986 = vadd.xlane.f32.xlu0 %v2985_v37  ;;  %v6793_v18 = vld [vmem:[%s7163_s12 + $0x2c8] sm:$0xff]  }
 0xaf2   : > { %v2981_v39 = vmul.f32 1.442695, %v2975_v38 }
 0xaf4   : > { %6938 = vpow2.f32 %v2981_v39 }
 0xaf6   : > { %v6935_v41 = vpop.eup %6934 }
 0xaf7   : > { %v2988_v42 = vsel %vm1192_vm3, %v6935_v41, 0.0 }
 0xaf8   : > { %2989 = vadd.xlane.f32.xlu1 %v2988_v42 }
 0xafa   : > { %v6937_v43 = vpop.eup %6936 }
 0xafb   : > { %v2994_v44 = vsel %vm1192_vm3, %v6937_v43, 0.0 }
 0xafc   : > { %2995 = vadd.xlane.f32.xlu1 %v2994_v44 }
 0xafe   : > { %v6939_v46 = vpop.eup %6938 }
 0xaff   : > { %v2991_v47 = vsel %vm1192_vm3, %v6939_v46, 0.0 }
 0xb00   : > { %2992 = vadd.xlane.f32.xlu0 %v2991_v47  ;;  %v6803_v47 = vld [vmem:[%s7163_s12 + $0x1c8] sm:$0xff]  }
 0xb7d   : > { %v2987_v48 = vpop.xlane.xlu0 %2986 }
 0xb7e   : > { %6940 = vrcp.f32 %v2987_v48 }
 0xb85   : > { %v2990_v53 = vpop.xlane.xlu1 %2989 }
 0xb86   : > { %6942 = vrcp.f32 %v2990_v53 }
 0xb88   : > { %v6941_v54 = vpop.eup %6940 }
 0xb89   : > { %v3001_v58 = vmul.f32 %v6941_v54, %v6933_v33  ;;  %v2996_v60 = vpop.xlane.xlu1 %2995 }
 0xb8a   : > { %6944 = vrcp.f32 %v2996_v60  ;;  %v6805_v60 = vld [vmem:[%s7163_s12 + $0x1d8] sm:$0xff]  }
 0xb8b   : > { %v3005_v61 = vpack.c.bf16 %v3001_v58, %v3001_v58  ;;  %v6804_v58 = vld [vmem:[%s7163_s12 + $0x1d0] sm:$0xff]  }
 0xb8d   : > { %6517 = vmatmul.mubr.msk.bf16.vlgmr.msra.gmra.mrb[48].mxu0 %vm1192_vm3, %v3005_v61  ;;  %v2993_v2 = vpop.xlane.xlu0 %2992  ;;  %v6806_v61 = vld [vmem:[%s7163_s12 + $0x1e0] sm:$0xff]  }
 0xb8e   : > { %6527 = vmatpush3.bf16.msra.mxu0 %v3105_v1  ;;  %6946 = vrcp.f32 %v2993_v2  ;;  %6528 = vmatprep.mubr.msk.bf16.mxu0 %vm7064_vm0, %v7063_v21  ;;  %v6807_v1 = vld [vmem:[%s7163_s12 + $0x1e8] sm:$0xff]   ;;  %v6808_v2 = vld [vmem:[%s7163_s12 + $0x1f0] sm:$0xff]  }
 0xb8f   : > { %6538 = vmatprep.subr.bf16.mxu0 %v6800_v50 }
 0xb90   : > { %v6943_v3 = vpop.eup %6942 }
 0xb91   : > { %v3002_v14 = vmul.f32 %v6943_v3, %v6935_v41  ;;  %v6809_v3 = vld [vmem:[%s7163_s12 + $0x1f8] sm:$0xff]  }
 0xb93   : > { %v3006_v6 = vpack.c.bf16 %v3002_v14, %v3002_v14 }
 0xb94   : > { %v6945_v49 = vpop.eup %6944 }
 0xb95   : > { %6523 = vmatmul.mubr.msk.bf16.vlgmr.msra.gmra.mrb[72].mxu1 %vm1192_vm3, %v3006_v6  ;;  %v3004_v7 = vmul.f32 %v6945_v49, %v6937_v43  ;;  %v7037_v49 = vld [vmem:[%s7153_s13 + $0x8] sm:$0xf]  ;;  %s7925_s13 = sld [smem:[#allocation8_spill]] (!%p5866_p5) }
 0xb96   : > { %6533 = vmatpush3.bf16.msra.mxu1 %v3151_v52  ;;  %6534 = vmatprep.mubr.msk.bf16.mxu1 %vm7064_vm0, %v7063_v21 }
 0xb97   : > { %6546 = vmatprep.subr.bf16.mxu1 %v6784_v45  ;;  %v3008_v62 = vpack.c.bf16 %v3004_v7, %v3004_v7 }
 0xb98   : > { %v6947_v35 = vpop.eup %6946 }
 0xb99   : > { %v3003_v57 = vmul.f32 %v6947_v35, %v6939_v46 }
 0xb9b   : > { %v3007_v0 = vpack.c.bf16 %v3003_v57, %v3003_v57 }
 0xb9d   : > { %6529 = vmatmul.mubr.msk.bf16.vlgmr.msra.gmra.mrb[52].mxu0 %vm1192_vm3, %v3007_v0  ;;  %6535 = vmatmul.mubr.msk.bf16.vlgmr.msra.gmra.mrb[76].mxu1 %vm1192_vm3, %v3008_v62 }
 0xb9e   : > { %6547 = vmatpush3.bf16.msra.mxu1 %v6784_v45  ;;  %6562 = vmatprep.mubr.bf16.mxu1 %v7241_v9  ;;  %v7590_v45 = vsub.s32 3, %v7226_v51 }
 0xb9f   : > { %6548 = vmatprep.subr.bf16.mxu1 %v6785_v63  ;;  %6539 = vmatpush3.bf16.msra.mxu0 %v6800_v50 }
 0xba0   : > { %6540 = vmatprep.subr.bf16.mxu0 %v6801_v28  ;;  %v3551_v52 = vrot.slane %v7037_v49, %v7590_v45 }
 0xba2   : > { %6549 = vmatpush3.bf16.msra.mxu1 %v6785_v63 }
 0xba3   : > { %6550 = vmatprep.subr.bf16.mxu1 %v6786_v4  ;;  %6541 = vmatpush3.bf16.msra.mxu0 %v6801_v28 }
 0xba4   : > { %6566 = vmatprep.subr.bf16.mxu0 %v6802_v29 }
 0xba6   : > { %6551 = vmatpush3.bf16.msra.mxu1 %v6786_v4 }
 0xba7   : > { %6552 = vmatprep.subr.bf16.mxu1 %v6787_v10 }
 0xbaa   : > { %6553 = vmatpush3.bf16.msra.mxu1 %v6787_v10 }
 0xbab   : > { %6554 = vmatprep.subr.bf16.mxu1 %v6788_v12 }
 0xbae   : > { %6555 = vmatpush3.bf16.msra.mxu1 %v6788_v12 }
 0xbaf   : > { %6556 = vmatprep.subr.bf16.mxu1 %v6789_v40 }
 0xbb2   : > { %6557 = vmatpush3.bf16.msra.mxu1 %v6789_v40  ;;  %v3420_v40 = vsub.s32 7, %v7226_v51 }
 0xbb3   : > { %6558 = vmatprep.subr.bf16.mxu1 %v6790_v15 }
 0xbb6   : > { %6559 = vmatpush3.bf16.msra.mxu1 %v6790_v15  ;;  %v3421_v15 = vrot.slane %v7497_v19, %v3420_v40 }
 0xbb7   : > { %6560 = vmatprep.subr.bf16.mxu1 %v6791_v16 }
 0xbba   : > { %6561 = vmatpush3.bf16.msra.mxu1 %v6791_v16 }
 0xbbb   : > { %6586 = vmatprep.subr.bf16.mxu1 %v6792_v17 }
 0xbbd   : > { %6563 = vmatmul.mubr.bf16.vlgmr.msra.gmra.mrb[80].mxu1 %v7245_v13 }
 0xbbe   : > { %6587 = vmatpush3.bf16.msra.mxu1 %v6792_v17  ;;  %6602 = vmatprep.mubr.bf16.mxu1 %v7241_v9 }
 0xbbf   : > { %6588 = vmatprep.subr.bf16.mxu1 %v6793_v18 }
 0xbc2   : > { %6589 = vmatpush3.bf16.msra.mxu1 %v6793_v18 }
 0xbc3   : > { %6590 = vmatprep.subr.bf16.mxu1 %v6794_v20 }
 0xbc6   : > { %6591 = vmatpush3.bf16.msra.mxu1 %v6794_v20 }
 0xbc7   : > { %6592 = vmatprep.subr.bf16.mxu1 %v6795_v24 }
 0xbca   : > { %6593 = vmatpush3.bf16.msra.mxu1 %v6795_v24 }
 0xbcb   : > { %6594 = vmatprep.subr.bf16.mxu1 %v6796_v25 }
 0xbce   : > { %6595 = vmatpush3.bf16.msra.mxu1 %v6796_v25  ;;  %v3291_v25 = vrot.slane %v7497_v19, %v7590_v45 }
 0xbcf   : > { %6596 = vmatprep.subr.bf16.mxu1 %v6797_v26 }
 0xbd2   : > { %6597 = vmatpush3.bf16.msra.mxu1 %v6797_v26 }
 0xbd3   : > { %6598 = vmatprep.subr.bf16.mxu1 %v6798_v27 }
 0xbd6   : > { %6599 = vmatpush3.bf16.msra.mxu1 %v6798_v27 }
 0xbd7   : > { %6600 = vmatprep.subr.bf16.mxu1 %v6799_v23 }
 0xbda   : > { %6601 = vmatpush3.bf16.msra.mxu1 %v6799_v23 }
 0xbdb   : > { %6630 = vmatprep.subr.bf16.mxu1 %v7063_v21 }
 0xbdd   : > { %6603 = vmatmul.mubr.bf16.vlgmr.msra.gmra.mrb[84].mxu1 %v7245_v13 }
 0xbde   : > { %6632 = vmatprep.mubr.msk.bf16.mxu1 %vm7064_vm0, %v7063_v21 }
 0xc60   : > { %v3049_v30 = vpop.f32.mrb[48].mxu0 }
 0xc61   : > { %v6518_v31 = vpop.f32.mrb[49].mxu0 }
 0xc62   : > { %v3052_v32 = vpop.f32.mrb[50].mxu0 }
 0xc63   : > { %v6519_v33 = vpop.f32.mrb[51].mxu0 }
 0xc68   : > { %v3095_v34 = vpop.f32.mrb[72].mxu1 }
 0xc69   : > { %v3193_v36 = vpack.c.bf16 %v3095_v34, %v3049_v30  ;;  %v6524_v37 = vpop.f32.mrb[73].mxu1 }
 0xc6a   : > { %v3098_v38 = vpop.f32.mrb[74].mxu1 }
 0xc6b   : > { %v6525_v39 = vpop.f32.mrb[75].mxu1  ;;  %6542 = vmatprep.mubr.msk.bf16.mxu0 %vm1003_vm1, %v3193_v36 }
 0xc70   : > { %v3141_v41 = vpop.f32.mrb[52].mxu0  ;;  %v3187_v42 = vpop.f32.mrb[76].mxu1 }
 0xc71   : > { %v3194_v43 = vpack.c.bf16 %v3187_v42, %v3141_v41  ;;  %v6530_v44 = vpop.f32.mrb[53].mxu0  ;;  %v6536_v46 = vpop.f32.mrb[77].mxu1 }
 0xc72   : > { %v3144_v48 = vpop.f32.mrb[54].mxu0  ;;  %v3190_v53 = vpop.f32.mrb[78].mxu1 }
 0xc73   : > { %v6531_v54 = vpop.f32.mrb[55].mxu0  ;;  %v6537_v56 = vpop.f32.mrb[79].mxu1  ;;  %6543 = vmatmul.mubr.msk.bf16.vlgmr.msra.gmra.mrb[28].mxu0 %vm1003_vm1, %v3194_v43 }
 0xc74   : > { %6567 = vmatpush3.bf16.msra.mxu0 %v6802_v29  ;;  %6582 = vmatprep.mubr.bf16.mxu0 %v7241_v9 }
 0xc75   : > { %6568 = vmatprep.subr.bf16.mxu0 %v6803_v47 }
 0xc78   : > { %6569 = vmatpush3.bf16.msra.mxu0 %v6803_v47 }
 0xc79   : > { %6570 = vmatprep.subr.bf16.mxu0 %v6804_v58 }
 0xc7c   : > { %6571 = vmatpush3.bf16.msra.mxu0 %v6804_v58 }
 0xc7d   : > { %6572 = vmatprep.subr.bf16.mxu0 %v6805_v60 }
 0xc80   : > { %6573 = vmatpush3.bf16.msra.mxu0 %v6805_v60 }
 0xc81   : > { %6574 = vmatprep.subr.bf16.mxu0 %v6806_v61 }
 0xc84   : > { %6575 = vmatpush3.bf16.msra.mxu0 %v6806_v61 }
 0xc85   : > { %6576 = vmatprep.subr.bf16.mxu0 %v6807_v1 }
 0xc88   : > { %6577 = vmatpush3.bf16.msra.mxu0 %v6807_v1 }
 0xc89   : > { %6578 = vmatprep.subr.bf16.mxu0 %v6808_v2 }
 0xc8c   : > { %6579 = vmatpush3.bf16.msra.mxu0 %v6808_v2 }
 0xc8d   : > { %6580 = vmatprep.subr.bf16.mxu0 %v6809_v3 }
 0xc90   : > { %v6564_v9 = vpop.f32.mrb[80].mxu1  ;;  %6581 = vmatpush3.bf16.msra.mxu0 %v6809_v3 }
 0xc91   : > { %v3374_v5 = vpop.f32.mrb[81].mxu1  ;;  %6606 = vmatprep.subr.bf16.mxu0 %v7063_v21  ;;  %v3383_v37 = vadd.f32 %v6564_v9, %v3291_v25 }
 0xc92   : > { %v6565_v14 = vpop.f32.mrb[82].mxu1  ;;  %v3375_v50 = vadd.f32 %v3374_v5, %v3291_v25 }
 0xc93   : > { %v3377_v6 = vpop.f32.mrb[83].mxu1  ;;  %6583 = vmatmul.mubr.bf16.vlgmr.msra.gmra.mrb[56].mxu0 %v7245_v13  ;;  %v5923_v39 = vpack.c.bf16 %v3383_v37, %v3383_v37  ;;  %v3386_v42 = vadd.f32 %v6565_v14, %v3291_v25 }
 0xc94   : > { %6608 = vmatprep.mubr.msk.bf16.mxu0 %vm7064_vm0, %v7063_v21  ;;  %v5921_v29 = vpack.c.bf16 %v3375_v50, %v3375_v50  ;;  %v3378_v19 = vadd.f32 %v3377_v6, %v3291_v25 }
 0xc95   : > { %v5924_v44 = vpack.c.bf16 %v3386_v42, %v3386_v42 }
 0xc96   : > { %v5922_v33 = vpack.c.bf16 %v3378_v19, %v3378_v19 }
 0xcb0   : > { %v6604_v7 = vpop.f32.mrb[84].mxu1 }
 0xcb1   : > { %v7594_v35 = vadd.f32 %v6604_v7, %v3551_v52  ;;  %v3634_v57 = vpop.f32.mrb[85].mxu1 }
 0xcb2   : > { %v3635_v0 = vadd.f32 %v3634_v57, %v3551_v52  ;;  %v6605_v62 = vpop.f32.mrb[86].mxu1 }
 0xcb3   : > { %v7596_v63 = vadd.f32 %v6605_v62, %v3551_v52  ;;  %v3637_v4 = vpop.f32.mrb[87].mxu1 }
 0xcb4   : > { %v5929_v10 = vpack.c.bf16 %v3635_v0, %v3635_v0  ;;  %v3638_v13 = vadd.f32 %v3637_v4, %v3551_v52 }
 0xcb6   : > { %v3901_v12 = vsel %vm1244_vm2, %v5929_v10, 0  ;;  %v5930_v43 = vpack.c.bf16 %v3638_v13, %v3638_v13 }
 0xcb7   : > { %6631 = vmatpush3.bf16.msra.mxu1 %v3901_v12 }
 0xcb8   : > { %6642 = vmatprep.subr.bf16.mxu1 %v7063_v21  ;;  %v3947_v46 = vsel %vm1244_vm2, %v5930_v43, 0 }
 0xd66   : > { %v6584_v16 = vpop.f32.mrb[56].mxu0 }
 0xd67   : > { %v3504_v17 = vpop.f32.mrb[57].mxu0  ;;  %v3513_v30 = vadd.f32 %v6584_v16, %v3421_v15 }
 0xd68   : > { %v3505_v18 = vadd.f32 %v3504_v17, %v3421_v15  ;;  %v6585_v20 = vpop.f32.mrb[58].mxu0 }
 0xd69   : > { %v3507_v24 = vpop.f32.mrb[59].mxu0  ;;  %v5927_v32 = vpack.c.bf16 %v3513_v30, %v3513_v30  ;;  %v3516_v36 = vadd.f32 %v6585_v20, %v3421_v15 }
 0xd6a   : > { %v5925_v26 = vpack.c.bf16 %v3505_v18, %v3505_v18  ;;  %v3508_v23 = vadd.f32 %v3507_v24, %v3421_v15 }
 0xd6b   : > { %v3757_v34 = vsel %vm1003_vm1, %v5927_v32, 0  ;;  %v5928_v38 = vpack.c.bf16 %v3516_v36, %v3516_v36 }
 0xd6c   : > { %v3665_v27 = vsel %vm1003_vm1, %v5925_v26, 0  ;;  %v5926_v28 = vpack.c.bf16 %v3508_v23, %v3508_v23 }
 0xd6d   : > { %6607 = vmatpush3.bf16.xpose.msra.mxu0 %v3665_v27  ;;  %v3803_v41 = vsel %vm1003_vm1, %v5928_v38, 0  ;;  %v5931_v38 = vpack.c.bf16 %v7594_v35, %v7594_v35 }
 0xd6e   : > { %6612 = vmatprep.subr.bf16.mxu0 %v7063_v21  ;;  %v3711_v31 = vsel %vm1003_vm1, %v5926_v28, 0 }
 0xd6f   : > { %v3993_v42 = vsel %vm1244_vm2, %v5931_v38, 0  ;;  %v6817_v38 = vld [vmem:[%s7173_s5 + $0xc] ss:$16 sps:$4 sm:$0xff]  }
 0xd74   : > { %6609 = vmatmul.mubr.msk.bf16.vlgmr.msra.gmra.mrb[60].mxu0 %vm1003_vm1, %v5921_v29 }
 0xd75   : > { %6613 = vmatpush3.bf16.xpose.msra.mxu0 %v3711_v31  ;;  %6614 = vmatprep.mubr.msk.bf16.mxu0 %vm7064_vm0, %v7063_v21 }
 0xd76   : > { %6618 = vmatprep.subr.bf16.mxu0 %v7063_v21 }
 0xd7c   : > { %6615 = vmatmul.mubr.msk.bf16.vlgmr.msra.gmra.mrb[64].mxu0 %vm1003_vm1, %v5922_v33 }
 0xd7d   : > { %6619 = vmatpush3.bf16.xpose.msra.mxu0 %v3757_v34  ;;  %6620 = vmatprep.mubr.msk.bf16.mxu0 %vm7064_vm0, %v7063_v21 }
 0xd7e   : > { %6624 = vmatprep.subr.bf16.mxu0 %v7063_v21 }
 0xd84   : > { %6621 = vmatmul.mubr.msk.bf16.vlgmr.msra.gmra.mrb[68].mxu0 %vm1003_vm1, %v5923_v39 }
 0xd85   : > { %6625 = vmatpush3.bf16.xpose.msra.mxu0 %v3803_v41  ;;  %6626 = vmatprep.mubr.msk.bf16.mxu0 %vm7064_vm0, %v7063_v21 }
 0xd86   : > { %6636 = vmatprep.subr.bf16.mxu0 %v7063_v21 }
 0xd8c   : > { %6627 = vmatmul.mubr.msk.bf16.vlgmr.msra.gmra.mrb[72].mxu0 %vm1003_vm1, %v5924_v44 }
 0xd8d   : > { %6637 = vmatpush3.bf16.msra.mxu0 %v3947_v46  ;;  %6638 = vmatprep.mubr.msk.bf16.mxu0 %vm7064_vm0, %v7063_v21  ;;  %v5932_v46 = vpack.c.bf16 %v7596_v63, %v7596_v63 }
 0xd8e   : > { %6648 = vmatprep.subr.bf16.mxu0 %v7063_v21 }
 0xd8f   : > { %v4039_v35 = vsel %vm1244_vm2, %v5932_v46, 0 }
 0xe47   : > { %v3701_v47 = vpop.f32.mrb[60].mxu0 }
 0xe48   : > { %v3845_v48 = vmul.f32 0.17677669, %v3701_v47  ;;  %v6610_v53 = vpop.f32.mrb[61].mxu0 }
 0xe49   : > { %v3704_v54 = vpop.f32.mrb[62].mxu0 }
 0xe4a   : > { %v6611_v56 = vpop.f32.mrb[63].mxu0  ;;  %v3849_v58 = vsel %vm1192_vm3, %v3845_v48, -inf }
 0xe4b   : > { %3850 = vmax.xlane.f32.xlu0 %v3849_v58 }
 0xe4f   : > { %v3747_v60 = vpop.f32.mrb[64].mxu0 }
 0xe50   : > { %v3846_v61 = vmul.f32 0.17677669, %v3747_v60  ;;  %v6616_v1 = vpop.f32.mrb[65].mxu0 }
 0xe51   : > { %v3750_v2 = vpop.f32.mrb[66].mxu0  ;;  %v6810_v1 = vld [vmem:[%s7168_s27 + $0x30] sm:$0xff]  }
 0xe52   : > { %v6617_v3 = vpop.f32.mrb[67].mxu0  ;;  %v3852_v9 = vsel %vm1192_vm3, %v3846_v61, -inf  ;;  %v6811_v2 = vld [vmem:[%s7168_s27 + $0x38] sm:$0xff]  }
 0xe53   : > { %3853 = vmax.xlane.f32.xlu1 %v3852_v9 }
 0xe57   : > { %v3793_v5 = vpop.f32.mrb[68].mxu0 }
 0xe58   : > { %v3847_v14 = vmul.f32 0.17677669, %v3793_v5  ;;  %v6622_v6 = vpop.f32.mrb[69].mxu0 }
 0xe59   : > { %v3796_v49 = vpop.f32.mrb[70].mxu0 }
 0xe5a   : > { %v6623_v52 = vpop.f32.mrb[71].mxu0  ;;  %v3855_v7 = vsel %vm1192_vm3, %v3847_v14, -inf }
 0xe5b   : > { %3856 = vmax.xlane.f32.xlu0 %v3855_v7 }
 0xe5f   : > { %v3839_v57 = vpop.f32.mrb[72].mxu0 }
 0xe60   : > { %v3848_v0 = vmul.f32 0.17677669, %v3839_v57  ;;  %v6628_v62 = vpop.f32.mrb[73].mxu0 }
 0xe61   : > { %v3842_v4 = vpop.f32.mrb[74].mxu0 }
 0xe62   : > { %v6629_v10 = vpop.f32.mrb[75].mxu0  ;;  %v3858_v13 = vsel %vm1192_vm3, %v3848_v0, -inf }
 0xe63   : > { %3859 = vmax.xlane.f32.xlu1 %v3858_v13 }
 0xed8   : > { %v3851_v12 = vpop.xlane.xlu0 %3850 }
 0xed9   : > { %v3861_v40 = vsub.f32 %v3845_v48, %v3851_v12 }
 0xedb   : > { %v3865_v15 = vmul.f32 1.442695, %v3861_v40 }
 0xedd   : > { %6948 = vpow2.f32 %v3865_v15 }
 0xee0   : > { %v3854_v16 = vpop.xlane.xlu1 %3853 }
 0xee1   : > { %v3862_v17 = vsub.f32 %v3846_v61, %v3854_v16 }
 0xee3   : > { %v3867_v18 = vmul.f32 1.442695, %v3862_v17  ;;  %v7653_v17 = vld [vmem:[%s7148_s28] sm:$0xff] }
 0xee5   : > { %6950 = vpow2.f32 %v3867_v18  ;;  %v4166_v18 = vrot.slane %v7653_v17, %v762_v22 }
 0xee7   : > { %v6949_v20 = vpop.eup %6948 }
 0xee8   : > { %v3857_v24 = vpop.xlane.xlu0 %3856  ;;  %v3873_v25 = vsel %vm1192_vm3, %v6949_v20, 0.0 }
 0xee9   : > { %v3863_v26 = vsub.f32 %v3847_v14, %v3857_v24  ;;  %3874 = vadd.xlane.f32.xlu0 %v3873_v25  ;;  %v7039_v24 = vld [vmem:[#allocation2] sm:$0xff] }
 0xeeb   : > { %v3869_v27 = vmul.f32 1.442695, %v3863_v26 }
 0xeed   : > { %6952 = vpow2.f32 %v3869_v27 }
 0xeef   : > { %v6951_v23 = vpop.eup %6950 }
 0xef0   : > { %v3860_v50 = vpop.xlane.xlu1 %3859  ;;  %v3876_v28 = vsel %vm1192_vm3, %v6951_v23, 0.0 }
 0xef1   : > { %v3864_v29 = vsub.f32 %v3848_v0, %v3860_v50  ;;  %3877 = vadd.xlane.f32.xlu1 %v3876_v28 }
 0xef3   : > { %v3871_v30 = vmul.f32 1.442695, %v3864_v29  ;;  %v7041_v29 = vld [vmem:[#allocation2 + $0x8] sm:$0xff] }
 0xef5   : > { %6954 = vpow2.f32 %v3871_v30 }
 0xef7   : > { %v6953_v31 = vpop.eup %6952 }
 0xef8   : > { %v3879_v19 = vsel %vm1192_vm3, %v6953_v31, 0.0 }
 0xef9   : > { %3880 = vadd.xlane.f32.xlu0 %v3879_v19 }
 0xeff   : > { %v6955_v32 = vpop.eup %6954 }
 0xf00   : > { %v3882_v33 = vsel %vm1192_vm3, %v6955_v32, 0.0 }
 0xf01   : > { %3883 = vadd.xlane.f32.xlu1 %v3882_v33 }
 0xf76   : > { %v3875_v34 = vpop.xlane.xlu0 %3874 }
 0xf77   : > { %6956 = vrcp.f32 %v3875_v34  ;;  %v6812_v34 = vld [vmem:[%s7173_s5] ss:$16 sps:$4 sm:$0xff]  }
 0xf7e   : > { %v3878_v36 = vpop.xlane.xlu1 %3877 }
 0xf7f   : > { %6958 = vrcp.f32 %v3878_v36  ;;  %v6814_v36 = vld [vmem:[%s7173_s5 + $0x4] ss:$16 sps:$4 sm:$0xff]  }
 0xf81   : > { %v6957_v37 = vpop.eup %6956 }
 0xf82   : > { %v3889_v39 = vmul.f32 %v6957_v37, %v6949_v20  ;;  %v6815_v37 = vld [vmem:[%s7173_s5 + $0x8] ss:$16 sps:$4 sm:$0xff]  }
 0xf84   : > { %v3893_v41 = vpack.c.bf16 %v3889_v39, %v3889_v39  ;;  %v6820_v39 = vld [vmem:[%s7173_s5 + $0x24] ss:$16 sps:$4 sm:$0xff]  }
 0xf86   : > { %6633 = vmatmul.mubr.msk.bf16.vlgmr.msra.gmra.mrb[88].mxu1 %vm1192_vm3, %v3893_v41  ;;  %v3881_v43 = vpop.xlane.xlu0 %3880  ;;  %v6823_v41 = vld [vmem:[%s7173_s5 + $0x2c] ss:$16 sps:$4 sm:$0xff]  }
 0xf87   : > { %6643 = vmatpush3.bf16.msra.mxu1 %v3993_v42  ;;  %6960 = vrcp.f32 %v3881_v43  ;;  %6644 = vmatprep.mubr.msk.bf16.mxu1 %vm7064_vm0, %v7063_v21  ;;  %v6818_v42 = vld [vmem:[%s7173_s5 + $0x20] ss:$16 sps:$4 sm:$0xff]   ;;  %v6821_v43 = vld [vmem:[%s7173_s5 + $0x28] ss:$16 sps:$4 sm:$0xff]  }
 0xf88   : > { %4447 = vmatprep.subr.bf16.mxu1 %v6814_v36 }
 0xf89   : > { %v6959_v44 = vpop.eup %6958 }
 0xf8a   : > { %v3890_v47 = vmul.f32 %v6959_v44, %v6951_v23  ;;  %v7040_v23 = vld [vmem:[#allocation2 + $0x10] sm:$0xff] }
 0xf8c   : > { %v3894_v48 = vpack.c.bf16 %v3890_v47, %v3890_v47 }
 0xf8e   : > { %6639 = vmatmul.mubr.msk.bf16.vlgmr.msra.gmra.mrb[76].mxu0 %vm1192_vm3, %v3894_v48  ;;  %v3884_v53 = vpop.xlane.xlu1 %3883 }
 0xf8f   : > { %6649 = vmatpush3.bf16.msra.mxu0 %v4039_v35  ;;  %6962 = vrcp.f32 %v3884_v53  ;;  %6650 = vmatprep.mubr.msk.bf16.mxu0 %vm7064_vm0, %v7063_v21 }
 0xf90   : > { %6654 = vmatprep.subr.bf16.mxu0 %v6810_v1 }
 0xf91   : > { %v6961_v54 = vpop.eup %6960 }
 0xf92   : > { %v3891_v56 = vmul.f32 %v6961_v54, %v6953_v31  ;;  %v7042_v31 = vld [vmem:[#allocation2 + $0x18] sm:$0xff] }
 0xf94   : > { %v3895_v58 = vpack.c.bf16 %v3891_v56, %v3891_v56 }
 0xf96   : > { %6645 = vmatmul.mubr.msk.bf16.vlgmr.msra.gmra.mrb[92].mxu1 %vm1192_vm3, %v3895_v58 }
 0xf97   : > { %4448 = vmatpush1.bf16.msra.mxu1 %v6812_v34 }
 0xf98   : > { %4449 = vmatprep.subr.bf16.mxu1 %v6820_v39 }
 0xf99   : > { %v6963_v63 = vpop.eup %6962 }
 0xf9a   : > { %v3892_v60 = vmul.f32 %v6963_v63, %v6955_v32 }
 0xf9b   : > { %4450 = vmatpush1.bf16.msra.mxu1 %v6818_v42 }
 0xf9c   : > { %v3896_v61 = vpack.c.bf16 %v3892_v60, %v3892_v60 }
 0xf9e   : > { %6651 = vmatmul.mubr.msk.bf16.vlgmr.msra.gmra.mrb[80].mxu0 %vm1192_vm3, %v3896_v61 }
 0xf9f   : > { %6655 = vmatpush3.bf16.msra.mxu0 %v6810_v1 }
 0xfa0   : > { %6656 = vmatprep.subr.bf16.mxu0 %v6811_v2 }
 0xfa3   : > { %6657 = vmatpush3.bf16.msra.mxu0 %v6811_v2 }
 0xfa4   : > { %4500 = vmatprep.subr.bf16.mxu0 %v6817_v38 }
0x1059   : > { %v3937_v3 = vpop.f32.mrb[88].mxu1 }
0x105a   : > { %v6634_v9 = vpop.f32.mrb[89].mxu1 }
0x105b   : > { %v3940_v5 = vpop.f32.mrb[90].mxu1 }
0x105c   : > { %v6635_v21 = vpop.f32.mrb[91].mxu1  ;;  %v6826_v5 = vld [vmem:[%s7173_s5 + $0x44] ss:$16 sps:$4 sm:$0xff]  }
0x105d   : > { %v6829_v21 = vld [vmem:[%s7173_s5 + $0x4c] ss:$16 sps:$4 sm:$0xff]   ;;  %4451 = vmatprep.subr.bf16.mxu1 %v6826_v5 }
0x1061   : > { %v3983_v14 = vpop.f32.mrb[76].mxu0 }
0x1062   : > { %v4081_v6 = vpack.c.bf16 %v3983_v14, %v3937_v3  ;;  %v6640_v49 = vpop.f32.mrb[77].mxu0  ;;  %v6824_v14 = vld [vmem:[%s7173_s5 + $0x40] ss:$16 sps:$4 sm:$0xff]  }
0x1063   : > { %v3986_v52 = vpop.f32.mrb[78].mxu0  ;;  %4452 = vmatpush1.bf16.msra.mxu1 %v6824_v14  ;;  %v6832_v49 = vld [vmem:[%s7173_s5 + $0x64] ss:$16 sps:$4 sm:$0xff]  }
0x1064   : > { %v6641_v7 = vpop.f32.mrb[79].mxu0  ;;  %6658 = vmatprep.mubr.msk.bf16.mxu0 %vm1003_vm1, %v4081_v6  ;;  %v6827_v6 = vld [vmem:[%s7173_s5 + $0x48] ss:$16 sps:$4 sm:$0xff]   ;;  %v6835_v52 = vld [vmem:[%s7173_s5 + $0x6c] ss:$16 sps:$4 sm:$0xff]   ;;  %4453 = vmatprep.subr.bf16.mxu1 %v6832_v49 }
0x1065   : > { %v6830_v7 = vld [vmem:[%s7173_s5 + $0x60] ss:$16 sps:$4 sm:$0xff]  }
0x1067   : > { %4454 = vmatpush1.bf16.msra.mxu1 %v6830_v7  ;;  %v6862_v7 = vld [vmem:[%s7178_s17] sm:$0xff]  }
0x1069   : > { %v4029_v57 = vpop.f32.mrb[92].mxu1 }
0x106a   : > { %v6646_v0 = vpop.f32.mrb[93].mxu1 }
0x106b   : > { %v4032_v62 = vpop.f32.mrb[94].mxu1  ;;  %v6838_v0 = vld [vmem:[%s7173_s5 + $0x84] ss:$16 sps:$4 sm:$0xff]  }
0x106c   : > { %v6647_v4 = vpop.f32.mrb[95].mxu1  ;;  %v6841_v62 = vld [vmem:[%s7173_s5 + $0x8c] ss:$16 sps:$4 sm:$0xff]   ;;  %4455 = vmatprep.subr.bf16.mxu1 %v6838_v0 }
0x106d   : > { %v6836_v4 = vld [vmem:[%s7173_s5 + $0x80] ss:$16 sps:$4 sm:$0xff]   ;;  %v6864_v0 = vld [vmem:[%s7178_s17 + $0x48] sm:$0xff]  }
0x106e   : > { %4456 = vmatpush1.bf16.msra.mxu1 %v6836_v4  ;;  %v6866_v4 = vld [vmem:[%s7178_s17 + $0x8] sm:$0xff]  }
0x1071   : > { %v4075_v10 = vpop.f32.mrb[80].mxu0 }
0x1072   : > { %v4082_v13 = vpack.c.bf16 %v4075_v10, %v4029_v57  ;;  %v6652_v12 = vpop.f32.mrb[81].mxu0  ;;  %v6833_v57 = vld [vmem:[%s7173_s5 + $0x68] ss:$16 sps:$4 sm:$0xff]  }
0x1073   : > { %v4078_v40 = vpop.f32.mrb[82].mxu0  ;;  %v6839_v10 = vld [vmem:[%s7173_s5 + $0x88] ss:$16 sps:$4 sm:$0xff]   ;;  %v6847_v12 = vld [vmem:[%s7173_s5 + $0xac] ss:$16 sps:$4 sm:$0xff]  }
0x1074   : > { %v6653_v15 = vpop.f32.mrb[83].mxu0  ;;  %6659 = vmatmul.mubr.msk.bf16.vlgmr.msra.gmra.mrb[28].mxu0 %vm1003_vm1, %v4082_v13  ;;  %v6844_v13 = vld [vmem:[%s7173_s5 + $0xa4] ss:$16 sps:$4 sm:$0xff]   ;;  %v6842_v40 = vld [vmem:[%s7173_s5 + $0xa0] ss:$16 sps:$4 sm:$0xff]  }
0x1075   : > { %4501 = vmatpush1.bf16.msra.mxu0 %v6815_v37  ;;  %v6845_v15 = vld [vmem:[%s7173_s5 + $0xa8] ss:$16 sps:$4 sm:$0xff]   ;;  %4457 = vmatprep.subr.bf16.mxu1 %v6844_v13  ;;  %v6868_v13 = vld [vmem:[%s7178_s17 + $0x50] sm:$0xff]  }
0x1076   : > { %4502 = vmatprep.subr.bf16.mxu0 %v6823_v41  ;;  %4458 = vmatpush1.bf16.msra.mxu1 %v6842_v40  ;;  %v6870_v40 = vld [vmem:[%s7178_s17 + $0x10] sm:$0xff]  }
0x1079   : > { %4503 = vmatpush1.bf16.msra.mxu0 %v6821_v43 }
0x107a   : > { %4504 = vmatprep.subr.bf16.mxu0 %v6829_v21 }
0x107d   : > { %4505 = vmatpush1.bf16.msra.mxu0 %v6827_v6 }
0x107e   : > { %4506 = vmatprep.subr.bf16.mxu0 %v6835_v52 }
0x1081   : > { %4507 = vmatpush1.bf16.msra.mxu0 %v6833_v57  ;;  %v6863_v57 = vld [vmem:[%s7178_s17 + $0x80] sm:$0xff]  }
0x1082   : > { %4508 = vmatprep.subr.bf16.mxu0 %v6841_v62  ;;  %v6865_v62 = vld [vmem:[%s7178_s17 + $0xc8] sm:$0xff]  }
0x1085   : > { %4509 = vmatpush1.bf16.msra.mxu0 %v6839_v10  ;;  %v6867_v10 = vld [vmem:[%s7178_s17 + $0x88] sm:$0xff]  }
0x1086   : > { %4510 = vmatprep.subr.bf16.mxu0 %v6847_v12  ;;  %v6869_v12 = vld [vmem:[%s7178_s17 + $0xd0] sm:$0xff]  }
0x1089   : > { %4511 = vmatpush1.bf16.msra.mxu0 %v6845_v15  ;;  %v6871_v15 = vld [vmem:[%s7178_s17 + $0x90] sm:$0xff]  }
0x1147   : > { %v6660_v16 = vpop.f32.mrb[28].mxu0 }
0x1148   : > { %v4140_v20 = vpop.f32.mrb[29].mxu0  ;;  %v4161_v50 = vadd.f32 %v7040_v23, %v6660_v16  ;;  %v6850_v16 = vld [vmem:[%s7173_s5 + $0xc4] ss:$16 sps:$4 sm:$0xff]   ;;  %v6857_v23 = vld [vmem:[%s7173_s5 + $0xe8] ss:$16 sps:$4 sm:$0xff]  }
0x1149   : > { %v4159_v25 = vadd.f32 %v7039_v24, %v4140_v20  ;;  %v6661_v26 = vpop.f32.mrb[30].mxu0  ;;  %v6848_v20 = vld [vmem:[%s7173_s5 + $0xc0] ss:$16 sps:$4 sm:$0xff]   ;;  %v6851_v24 = vld [vmem:[%s7173_s5 + $0xc8] ss:$16 sps:$4 sm:$0xff]   ;;  %4459 = vmatprep.subr.bf16.mxu1 %v6850_v16 }
0x114a   : > { %v4143_v27 = vpop.f32.mrb[31].mxu0  ;;  %v4162_v19 = vadd.f32 %v7042_v31, %v6661_v26  ;;  %v7663_v32 = vadd.f32 %v4166_v18, %v4161_v50  ;;  %v6859_v26 = vld [vmem:[%s7173_s5 + $0xec] ss:$16 sps:$4 sm:$0xff]   ;;  %4460 = vmatpush1.bf16.msra.mxu1 %v6848_v20  ;;  %v7065_v50 = vmov 0  }
0x114b   : > { %v7658_v28 = vadd.f32 %v4166_v18, %v4159_v25  ;;  %v4160_v30 = vadd.f32 %v7041_v29, %v4143_v27  ;;  %v6856_v25 = vld [vmem:[%s7173_s5 + $0xe4] ss:$16 sps:$4 sm:$0xff]   ;;  %v6854_v27 = vld [vmem:[%s7173_s5 + $0xe0] ss:$16 sps:$4 sm:$0xff]   ;;  %4479 = vmatprep.mubr.bf16.mxu1 %v7065_v50  ;;  %4532 = vmatprep.mubr.bf16.mxu0 %v7065_v50  ;;  %v6872_v16 = vld [vmem:[%s7178_s17 + $0x58] sm:$0xff]  }
0x114c   : > { %v7666_v33 = vadd.f32 %v4166_v18, %v4162_v19  ;;  %4461 = vmatprep.subr.bf16.mxu1 %v6856_v25  ;;  %v6874_v20 = vld [vmem:[%s7178_s17 + $0x18] sm:$0xff]   ;;  %v6876_v25 = vld [vmem:[%s7178_s17 + $0x60] sm:$0xff]  }
0x114d   : > { %v7660_v22 = vadd.f32 %v4166_v18, %v4160_v30  ;;  %4171 = vadd.xlane.f32.xlu0 %v7658_v28  ;;  %v6853_v18 = vld [vmem:[%s7173_s5 + $0xcc] ss:$16 sps:$4 sm:$0xff]  }
0x114e   : > { %4512 = vmatprep.subr.bf16.mxu0 %v6853_v18  ;;  %4462 = vmatpush1.bf16.msra.mxu1 %v6854_v27  ;;  %v6873_v18 = vld [vmem:[%s7178_s17 + $0xd8] sm:$0xff]   ;;  %v6878_v27 = vld [vmem:[%s7178_s17 + $0x20] sm:$0xff]  }
0x114f   : > { %4173 = vadd.xlane.f32.xlu1 %v7660_v22  ;;  %4513 = vmatpush1.bf16.msra.mxu0 %v6851_v24  ;;  %v6875_v24 = vld [vmem:[%s7178_s17 + $0x98] sm:$0xff]  }
0x1150   : > { %4514 = vmatprep.subr.bf16.mxu0 %v6859_v26  ;;  %v6877_v26 = vld [vmem:[%s7178_s17 + $0xe0] sm:$0xff]  }
0x1151   : > { %4175 = vadd.xlane.f32.xlu0 %v7663_v32 }
0x1153   : > { %4177 = vadd.xlane.f32.xlu1 %v7666_v33  ;;  %4515 = vmatpush1.bf16.msra.mxu0 %v6857_v23  ;;  %v6879_v23 = vld [vmem:[%s7178_s17 + $0xa0] sm:$0xff]  }
0x11da   : > { %v4172_v44 = vpop.xlane.xlu0 %4171 }
0x11db   : > { %v4179_v46 = vmul.f32 0.0078125, %v4172_v44  ;;  %v4218_v44 = vrot.slane %v7653_v17, %v7487_v11 }
0x11dc   : > { %v4174_v47 = vpop.xlane.xlu1 %4173 }
0x11dd   : > { %v7679_v48 = vsub.f32 %v7658_v28, %v4179_v46  ;;  %v4180_v35 = vmul.f32 0.0078125, %v4174_v47 }
0x11de   : > { %v4176_v53 = vpop.xlane.xlu0 %4175 }
0x11df   : > { %v7682_v54 = vsub.f32 %v7660_v22, %v4180_v35  ;;  %v4181_v56 = vmul.f32 0.0078125, %v4176_v53  ;;  %v4187_v58 = vmul.f32 %v7679_v48, %v7679_v48 }
0x11e0   : > { %v4178_v63 = vpop.xlane.xlu1 %4177 }
0x11e1   : > { %v7687_v60 = vsub.f32 %v7663_v32, %v4181_v56  ;;  %v4182_v61 = vmul.f32 0.0078125, %v4178_v63  ;;  %4191 = vadd.xlane.f32.xlu0 %v4187_v58  ;;  %v4188_v1 = vmul.f32 %v7682_v54, %v7682_v54  ;;  %v4226_v58 = vrot.slane %v7653_v17, %v7590_v45 }
0x11e3   : > { %v7692_v2 = vsub.f32 %v7666_v33, %v4182_v61  ;;  %4193 = vadd.xlane.f32.xlu1 %v4188_v1  ;;  %v4189_v3 = vmul.f32 %v7687_v60, %v7687_v60 }
0x11e5   : > { %4195 = vadd.xlane.f32.xlu0 %v4189_v3  ;;  %v4190_v9 = vmul.f32 %v7692_v2, %v7692_v2 }
0x11e7   : > { %4197 = vadd.xlane.f32.xlu1 %v4190_v9 }
0x126e   : > { %v4192_v29 = vpop.xlane.xlu0 %4191 }
0x126f   : > { %v4199_v30 = vmul.f32 0.0078125, %v4192_v29  ;;  %v6881_v29 = vld [vmem:[%s7178_s17 + $0xe8] sm:$0xff]  }
0x1270   : > { %v4194_v31 = vpop.xlane.xlu1 %4193 }
0x1271   : > { %v4203_v19 = vadd.f32 1e-05, %v4199_v30  ;;  %v4200_v34 = vmul.f32 0.0078125, %v4194_v31  ;;  %v6882_v30 = vld [vmem:[%s7178_s17 + $0x28] sm:$0xff]  }
0x1272   : > { %v4196_v36 = vpop.xlane.xlu0 %4195  ;;  %v6883_v31 = vld [vmem:[%s7178_s17 + $0xa8] sm:$0xff]  }
0x1273   : > { %6964 = vrsqrt.f32 %v4203_v19  ;;  %v4204_v37 = vadd.f32 1e-05, %v4200_v34  ;;  %v4201_v38 = vmul.f32 0.0078125, %v4196_v36  ;;  %v6884_v19 = vld [vmem:[%s7178_s17 + $0x70] sm:$0xff]  }
0x1274   : > { %v4198_v39 = vpop.xlane.xlu1 %4197  ;;  %v6885_v34 = vld [vmem:[%s7178_s17 + $0xf0] sm:$0xff]  }
0x1275   : > { %6966 = vrsqrt.f32 %v4204_v37  ;;  %v4205_v41 = vadd.f32 1e-05, %v4201_v38  ;;  %v4202_v42 = vmul.f32 0.0078125, %v4198_v39  ;;  %v6886_v36 = vld [vmem:[%s7178_s17 + $0x30] sm:$0xff]   ;;  %v6888_v38 = vld [vmem:[%s7178_s17 + $0x78] sm:$0xff]  }
0x1276   : > { %v6887_v37 = vld [vmem:[%s7178_s17 + $0xb0] sm:$0xff]   ;;  %v6889_v39 = vld [vmem:[%s7178_s17 + $0xf8] sm:$0xff]  }
0x1277   : > { %6968 = vrsqrt.f32 %v4205_v41  ;;  %v4206_v43 = vadd.f32 1e-05, %v4202_v42  ;;  %v6890_v41 = vld [vmem:[%s7178_s17 + $0x38] sm:$0xff]  }
0x1278   : > { %v6891_v42 = vld [vmem:[%s7178_s17 + $0xb8] sm:$0xff]  }
0x1279   : > { %6970 = vrsqrt.f32 %v4206_v43  ;;  %v4265_v43 = vld [vmem:[%s7158_s18] sm:$0xf] }
0x127d   : > { %v6965_v46 = vpop.eup %6964 }
0x127e   : > { %v4211_v47 = vmul.f32 %v6965_v46, %v7679_v48  ;;  %v7765_v46 = vrot.slane %v4265_v43, %v7487_v11 }
0x127f   : > { %v6967_v35 = vpop.eup %6966 }
0x1280   : > { %v4212_v53 = vmul.f32 %v6967_v35, %v7682_v54  ;;  %v4219_v56 = vmul.f32 %v4218_v44, %v4211_v47  ;;  %v7768_v47 = vrot.slane %v4265_v43, %v7234_v59  ;;  %v7771_v35 = vrot.slane %v4265_v43, %v7590_v45 }
0x1281   : > { %v6969_v63 = vpop.eup %6968 }
0x1282   : > { %v4220_v61 = vmul.f32 %v4218_v44, %v4212_v53  ;;  %v4227_v3 = vadd.f32 %v4226_v58, %v4219_v56  ;;  %v4213_v5 = vmul.f32 %v6969_v63, %v7687_v60  ;;  %v6860_v60 = vld [vmem:[%s7178_s17 + $0x40] sm:$0xff]  }
0x1283   : > { %v6971_v1 = vpop.eup %6970  ;;  %6133 = vmatprep.subr.bf16.mxu1 %v6860_v60 }
0x1284   : > { %v4228_v9 = vadd.f32 %v4226_v58, %v4220_v61  ;;  %v4214_v21 = vmul.f32 %v6971_v1, %v7692_v2  ;;  %v4221_v54 = vmul.f32 %v4218_v44, %v4213_v5  ;;  %v6861_v2 = vld [vmem:[%s7178_s17 + $0xc0] sm:$0xff]  }
0x1285   : > { %6161 = vmatprep.subr.bf16.mxu0 %v6861_v2 }
0x1286   : > { %v4231_v48 = vpack.c.bf16 %v4228_v9, %v4227_v3  ;;  %v4222_v14 = vmul.f32 %v4218_v44, %v4214_v21  ;;  %v4229_v49 = vadd.f32 %v4226_v58, %v4221_v54  ;;  %v4270_v44 = vrot.slane %v4265_v43, %v7229_v55 }
0x1288   : > { %4480 = vmatmul.mubr.bf16.vlgmr.msra.gmra.mrb[96].mxu1 %v4231_v48  ;;  %4533 = vmatmul.mubr.bf16.vlgmr.msra.gmra.mrb[84].mxu0 %v4231_v48  ;;  %v4230_v6 = vadd.f32 %v4226_v58, %v4222_v14 }
0x1289   : > { %4489 = vmatprep.mubr.bf16.mxu1 %v7065_v50  ;;  %4542 = vmatprep.mubr.bf16.mxu0 %v7065_v50  ;;  %v6880_v50 = vld [vmem:[%s7178_s17 + $0x68] sm:$0xff]  }
0x128a   : > { %v4232_v52 = vpack.c.bf16 %v4230_v6, %v4229_v49  ;;  %6134 = vmatpush3.bf16.msra.mxu1 %v6862_v7  ;;  %6162 = vmatpush3.bf16.msra.mxu0 %v6863_v57 }
0x128b   : > { %6135 = vmatprep.subr.bf16.mxu1 %v6864_v0  ;;  %6163 = vmatprep.subr.bf16.mxu0 %v6865_v62 }
0x128e   : > { %6136 = vmatpush3.bf16.msra.mxu1 %v6866_v4  ;;  %6164 = vmatpush3.bf16.msra.mxu0 %v6867_v10 }
0x128f   : > { %6137 = vmatprep.subr.bf16.mxu1 %v6868_v13  ;;  %6165 = vmatprep.subr.bf16.mxu0 %v6869_v12 }
0x1290   : > { %4490 = vmatmul.mubr.bf16.gmra.mrb[100].mxu1 %v4232_v52  ;;  %4543 = vmatmul.mubr.bf16.gmra.mrb[88].mxu0 %v4232_v52 }
0x1292   : > { %6138 = vmatpush3.bf16.msra.mxu1 %v6870_v40  ;;  %6166 = vmatpush3.bf16.msra.mxu0 %v6871_v15 }
0x1293   : > { %6139 = vmatprep.subr.bf16.mxu1 %v6872_v16  ;;  %6167 = vmatprep.subr.bf16.mxu0 %v6873_v18 }
0x1296   : > { %6140 = vmatpush3.bf16.msra.mxu1 %v6874_v20  ;;  %6168 = vmatpush3.bf16.msra.mxu0 %v6875_v24 }
0x1297   : > { %6141 = vmatprep.subr.bf16.mxu1 %v6876_v25  ;;  %6169 = vmatprep.subr.bf16.mxu0 %v6877_v26 }
0x129a   : > { %6142 = vmatpush3.bf16.msra.mxu1 %v6878_v27  ;;  %6170 = vmatpush3.bf16.msra.mxu0 %v6879_v23 }
0x129b   : > { %6143 = vmatprep.subr.bf16.mxu1 %v6880_v50  ;;  %6171 = vmatprep.subr.bf16.mxu0 %v6881_v29 }
0x129e   : > { %6144 = vmatpush3.bf16.msra.mxu1 %v6882_v30  ;;  %6172 = vmatpush3.bf16.msra.mxu0 %v6883_v31 }
0x129f   : > { %6145 = vmatprep.subr.bf16.mxu1 %v6884_v19  ;;  %6173 = vmatprep.subr.bf16.mxu0 %v6885_v34 }
0x12a2   : > { %6146 = vmatpush3.bf16.msra.mxu1 %v6886_v36  ;;  %6174 = vmatpush3.bf16.msra.mxu0 %v6887_v37 }
0x12a3   : > { %6147 = vmatprep.subr.bf16.mxu1 %v6888_v38  ;;  %6175 = vmatprep.subr.bf16.mxu0 %v6889_v39 }
0x12a6   : > { %6148 = vmatpush3.bf16.msra.mxu1 %v6890_v41  ;;  %6176 = vmatpush3.bf16.msra.mxu0 %v6891_v42 }
0x135b   : > { %v4481_v53 = vpop.f32.mrb[96].mxu1  ;;  %v4534_v56 = vpop.f32.mrb[84].mxu0 }
0x135c   : > { %v7773_v58 = vadd.f32 %v4481_v53, %v4270_v44  ;;  %v7776_v63 = vadd.f32 %v4534_v56, %v7765_v46  ;;  %v4483_v61 = vpop.f32.mrb[97].mxu1  ;;  %v4536_v1 = vpop.f32.mrb[85].mxu0 }
0x135d   : > { %v7779_v55 = vadd.f32 %v4483_v61, %v7768_v47  ;;  %v7782_v11 = vadd.f32 %v4536_v1, %v7771_v35  ;;  %v4485_v59 = vpop.f32.mrb[98].mxu1  ;;  %v4538_v3 = vpop.f32.mrb[86].mxu0 }
0x135e   : > { %v5818_v45 = vmul.f32 -1.702, %v7773_v58  ;;  %v5820_v9 = vmul.f32 -1.702, %v7776_v63  ;;  %v7786_v5 = vadd.f32 %v4485_v59, %v4270_v44  ;;  %v7789_v21 = vadd.f32 %v4538_v3, %v7765_v46  ;;  %v4487_v48 = vpop.f32.mrb[99].mxu1  ;;  %v4540_v14 = vpop.f32.mrb[87].mxu0 }
0x135f   : > { %v5819_v54 = vmul.f32 -1.702, %v7779_v55  ;;  %v5821_v6 = vmul.f32 -1.702, %v7782_v11  ;;  %v7794_v49 = vadd.f32 %v4487_v48, %v7768_v47  ;;  %v7797_v52 = vadd.f32 %v4540_v14, %v7771_v35 }
0x1360   : > { %v4585_v60 = vmul.f32 1.442695, %v5818_v45  ;;  %v4589_v2 = vmul.f32 1.442695, %v5820_v9  ;;  %v5822_v7 = vmul.f32 -1.702, %v7786_v5 }
0x1361   : > { %v4587_v57 = vmul.f32 1.442695, %v5819_v54  ;;  %v4591_v0 = vmul.f32 1.442695, %v5821_v6  ;;  %v5824_v62 = vmul.f32 -1.702, %v7789_v21 }
0x1362   : > { %6972 = vpow2.f32 %v4585_v60  ;;  %v4593_v4 = vmul.f32 1.442695, %v5822_v7  ;;  %v5823_v10 = vmul.f32 -1.702, %v7794_v49  ;;  %v5825_v13 = vmul.f32 -1.702, %v7797_v52 }
0x1363   : > { %6974 = vpow2.f32 %v4589_v2  ;;  %v4597_v12 = vmul.f32 1.442695, %v5824_v62  ;;  %v4491_v40 = vpop.f32.mrb[100].mxu1  ;;  %v4544_v15 = vpop.f32.mrb[88].mxu0 }
0x1364   : > { %6976 = vpow2.f32 %v4587_v57  ;;  %v4595_v16 = vmul.f32 1.442695, %v5823_v10  ;;  %v7803_v18 = vadd.f32 %v4491_v40, %v4270_v44  ;;  %v4493_v20 = vpop.f32.mrb[101].mxu1  ;;  %v4546_v24 = vpop.f32.mrb[89].mxu0  ;;  %v4599_v25 = vmul.f32 1.442695, %v5825_v13 }
0x1365   : > { %6978 = vpow2.f32 %v4591_v0  ;;  %v7806_v26 = vadd.f32 %v4544_v15, %v7765_v46  ;;  %v7809_v27 = vadd.f32 %v4493_v20, %v7768_v47  ;;  %v4495_v23 = vpop.f32.mrb[102].mxu1  ;;  %v4548_v50 = vpop.f32.mrb[90].mxu0  ;;  %v7818_v43 = vadd.f32 %v4546_v24, %v7771_v35 }
0x1366   : > { %6980 = vpow2.f32 %v4593_v4  ;;  %v5826_v29 = vmul.f32 -1.702, %v7803_v18  ;;  %v7812_v30 = vadd.f32 %v4495_v23, %v4270_v44  ;;  %v4497_v31 = vpop.f32.mrb[103].mxu1  ;;  %v4550_v19 = vpop.f32.mrb[91].mxu0  ;;  %v7822_v14 = vadd.f32 %v4548_v50, %v7765_v46 }
0x1367   : > { %6982 = vpow2.f32 %v4597_v12  ;;  %v5828_v34 = vmul.f32 -1.702, %v7806_v26  ;;  %v5827_v36 = vmul.f32 -1.702, %v7809_v27  ;;  %v5829_v45 = vmul.f32 -1.702, %v7818_v43 }
0x1368   : > { %6984 = vpow2.f32 %v4595_v16  ;;  %v4601_v37 = vmul.f32 1.442695, %v5826_v29  ;;  %v5830_v38 = vmul.f32 -1.702, %v7812_v30  ;;  %v7825_v60 = vadd.f32 %v4497_v31, %v7768_v47 }
0x1369   : > { %6986 = vpow2.f32 %v4599_v25  ;;  %v4605_v39 = vmul.f32 1.442695, %v5828_v34  ;;  %v4603_v41 = vmul.f32 1.442695, %v5827_v36  ;;  %v7828_v57 = vadd.f32 %v4550_v19, %v7771_v35 }
0x136a   : > { %6988 = vpow2.f32 %v4601_v37  ;;  %v4609_v42 = vmul.f32 1.442695, %v5830_v38  ;;  %v4607_v4 = vmul.f32 1.442695, %v5829_v45  ;;  %v5832_v13 = vmul.f32 -1.702, %v7822_v14 }
0x136b   : > { %6990 = vpow2.f32 %v4605_v39  ;;  %v5831_v47 = vmul.f32 -1.702, %v7825_v60  ;;  %v5833_v15 = vmul.f32 -1.702, %v7828_v57 }
0x136c   : > { %v6973_v44 = vpop.eup %6972  ;;  %6992 = vpow2.f32 %v4603_v41  ;;  %v4613_v20 = vmul.f32 1.442695, %v5832_v13 }
0x136d   : > { %v6975_v53 = vpop.eup %6974  ;;  %v4617_v56 = vadd.f32 1.0, %v6973_v44  ;;  %6994 = vpow2.f32 %v4609_v42  ;;  %v4611_v23 = vmul.f32 1.442695, %v5831_v47  ;;  %v4615_v29 = vmul.f32 1.442695, %v5833_v15 }
0x136e   : > { %v6977_v61 = vpop.eup %6976  ;;  %v4619_v1 = vadd.f32 1.0, %v6975_v53 }
0x136f   : > { %v6979_v59 = vpop.eup %6978  ;;  %6996 = vrcp.f32 %v4617_v56  ;;  %v4618_v3 = vadd.f32 1.0, %v6977_v61 }
0x1370   : > { %v6981_v9 = vpop.eup %6980  ;;  %6998 = vrcp.f32 %v4619_v1  ;;  %v4620_v48 = vadd.f32 1.0, %v6979_v59 }
0x1371   : > { %v6983_v54 = vpop.eup %6982  ;;  %7000 = vrcp.f32 %v4618_v3  ;;  %v4621_v6 = vadd.f32 1.0, %v6981_v9 }
0x1372   : > { %v6985_v2 = vpop.eup %6984  ;;  %7002 = vrcp.f32 %v4620_v48  ;;  %v4623_v7 = vadd.f32 1.0, %v6983_v54 }
0x1373   : > { %v6987_v0 = vpop.eup %6986  ;;  %7004 = vrcp.f32 %v4621_v6  ;;  %v4622_v62 = vadd.f32 1.0, %v6985_v2 }
0x1374   : > { %v6989_v10 = vpop.eup %6988  ;;  %7006 = vrcp.f32 %v4623_v7  ;;  %v4624_v46 = vadd.f32 1.0, %v6987_v0 }
0x1375   : > { %7008 = vrcp.f32 %v4622_v62  ;;  %v4625_v12 = vadd.f32 1.0, %v6989_v10  ;;  %v6991_v40 = vpop.eup %6990 }
0x1376   : > { %7010 = vrcp.f32 %v4624_v46  ;;  %v6993_v16 = vpop.eup %6992  ;;  %v4627_v45 = vadd.f32 1.0, %v6991_v40 }
0x1377   : > { %7012 = vpow2.f32 %v4607_v4  ;;  %v6995_v35 = vpop.eup %6994  ;;  %v4626_v48 = vadd.f32 1.0, %v6993_v16 }
0x1378   : > { %7014 = vrcp.f32 %v4625_v12  ;;  %v4629_v25 = vadd.f32 1.0, %v6995_v35 }
0x1379   : > { %v6997_v24 = vpop.eup %6996 }
0x137a   : > { %v6999_v50 = vpop.eup %6998  ;;  %7016 = vrcp.f32 %v4629_v25  ;;  %v4665_v37 = vmul.f32 %v6997_v24, %v7773_v58 }
0x137b   : > { %v7001_v31 = vpop.eup %7000  ;;  %7018 = vpow2.f32 %v4613_v20  ;;  %v4667_v41 = vmul.f32 %v6999_v50, %v7776_v63 }
0x137c   : > { %v7003_v19 = vpop.eup %7002  ;;  %7020 = vpow2.f32 %v4611_v23  ;;  %v4666_v53 = vmul.f32 %v7001_v31, %v7779_v55 }
0x137d   : > { %v7005_v34 = vpop.eup %7004  ;;  %7022 = vpow2.f32 %v4615_v29  ;;  %v4668_v59 = vmul.f32 %v7003_v19, %v7782_v11 }
0x137e   : > { %v7007_v36 = vpop.eup %7006  ;;  %v4669_v38 = vmul.f32 %v7005_v34, %v7786_v5  ;;  %7024 = vrcp.f32 %v4627_v45 }
0x137f   : > { %v7009_v39 = vpop.eup %7008  ;;  %v4671_v42 = vmul.f32 %v7007_v36, %v7789_v21  ;;  %7026 = vrcp.f32 %v4626_v48 }
0x1380   : > { %v7011_v44 = vpop.eup %7010  ;;  %v4681_v56 = vpack.c.bf16 %v4669_v38, %v4665_v37  ;;  %v4670_v61 = vmul.f32 %v7009_v39, %v7794_v49 }
0x1381   : > { %v7013_v1 = vpop.eup %7012  ;;  %v4683_v3 = vpack.c.bf16 %v4671_v42, %v4667_v41  ;;  %v4672_v58 = vmul.f32 %v7011_v44, %v7797_v52 }
0x1382   : > { %v4682_v5 = vpack.c.bf16 %v4670_v61, %v4666_v53  ;;  %v7015_v9 = vpop.eup %7014  ;;  %v4628_v63 = vadd.f32 1.0, %v7013_v1 }
0x1383   : > { %v4684_v54 = vpack.c.bf16 %v4672_v58, %v4668_v59  ;;  %v4673_v6 = vmul.f32 %v7015_v9, %v7803_v18 }
0x1384   : > { %4981 = vmatprep.mubr.bf16.mxu1 %v4682_v5  ;;  %v7017_v21 = vpop.eup %7016  ;;  %7028 = vrcp.f32 %v4628_v63 }
0x1385   : > { %5030 = vmatprep.mubr.bf16.mxu0 %v4684_v54  ;;  %4982 = vmatmul.mubr.bf16.vlgmr.msra.gmra.mrb[104].mxu1 %v4681_v56  ;;  %v7019_v55 = vpop.eup %7018  ;;  %v4677_v49 = vmul.f32 %v7017_v21, %v7812_v30 }
0x1386   : > { %5031 = vmatmul.mubr.bf16.vlgmr.msra.gmra.mrb[92].mxu0 %v4683_v3  ;;  %v7021_v11 = vpop.eup %7020  ;;  %v4631_v52 = vadd.f32 1.0, %v7019_v55 }
0x1387   : > { %v7023_v2 = vpop.eup %7022  ;;  %v4630_v7 = vadd.f32 1.0, %v7021_v11  ;;  %v4685_v0 = vpack.c.bf16 %v4677_v49, %v4673_v6 }
0x1388   : > { %7030 = vrcp.f32 %v4631_v52  ;;  %v4632_v62 = vadd.f32 1.0, %v7023_v2  ;;  %v7025_v4 = vpop.eup %7024 }
0x1389   : > { %7032 = vrcp.f32 %v4630_v7  ;;  %v7027_v10 = vpop.eup %7026  ;;  %v4675_v12 = vmul.f32 %v7025_v4, %v7806_v26  ;;  %v4756_v26 = vrot.slane %v7653_v17, %v1581_v8 }
0x138a   : > { %7034 = vrcp.f32 %v4632_v62  ;;  %v4674_v40 = vmul.f32 %v7027_v10, %v7809_v27 }
0x138e   : > { %v7029_v46 = vpop.eup %7028 }
0x138f   : > { %v4676_v16 = vmul.f32 %v7029_v46, %v7818_v43 }
0x1392   : > { %v7031_v13 = vpop.eup %7030 }
0x1393   : > { %v7033_v18 = vpop.eup %7032  ;;  %v4679_v30 = vmul.f32 %v7031_v13, %v7822_v14 }
0x1394   : > { %v7035_v47 = vpop.eup %7034  ;;  %v4678_v15 = vmul.f32 %v7033_v18, %v7825_v60 }
0x1395   : > { %v4680_v35 = vmul.f32 %v7035_v47, %v7828_v57  ;;  %v4687_v20 = vpack.c.bf16 %v4679_v30, %v4675_v12 }
0x1396   : > { %v4686_v24 = vpack.c.bf16 %v4678_v15, %v4674_v40 }
0x1397   : > { %v4688_v25 = vpack.c.bf16 %v4680_v35, %v4676_v16 }
0x1398   : > { %4989 = vmatprep.mubr.bf16.mxu1 %v4686_v24 }
0x1399   : > { %5038 = vmatprep.mubr.bf16.mxu0 %v4688_v25  ;;  %4990 = vmatmul.mubr.bf16.gmra.mrb[108].mxu1 %v4685_v0 }
0x139a   : > { %5039 = vmatmul.mubr.bf16.gmra.mrb[96].mxu0 %v4687_v20 }
0x1458   : > { %v6149_v23 = vpop.f32.mrb[104].mxu1 }
0x1459   : > { %v6177_v14 = vpop.f32.mrb[92].mxu0  ;;  %v6150_v27 = vpop.f32.mrb[105].mxu1 }
0x145a   : > { %v6151_v50 = vadd.f32 %v6150_v27, %v6149_v23  ;;  %v6178_v60 = vpop.f32.mrb[93].mxu0  ;;  %v6152_v29 = vpop.f32.mrb[106].mxu1  ;;  %v7043_v23 = vld [vmem:[%s7908_s1] sm:$0xff] (!%p5866_p5)   ;;  %v7045_v27 = vld [vmem:[%s7908_s1 + $0x10] sm:$0xff] (!%p5866_p5)  }
0x145b   : > { %v6179_v43 = vadd.f32 %v6178_v60, %v6177_v14  ;;  %v6180_v31 = vpop.f32.mrb[94].mxu0  ;;  %v6153_v57 = vpop.f32.mrb[107].mxu1  ;;  %v7044_v14 = vld [vmem:[%s7908_s1 + $0x8] sm:$0xff] (!%p5866_p5)   ;;  %v7047_v60 = vld [vmem:[%s7908_s1 + $0x20] sm:$0xff] (!%p5866_p5)  }
0x145c   : > { %v4984_v19 = vadd.f32 %v6151_v50, %v4756_v26  ;;  %v6154_v34 = vadd.f32 %v6153_v57, %v6152_v29  ;;  %v6181_v36 = vpop.f32.mrb[95].mxu0  ;;  %v7046_v50 = vld [vmem:[%s7908_s1 + $0x18] sm:$0xff] (!%p5866_p5)   ;;  %v7048_v29 = vld [vmem:[%s7908_s1 + $0x28] sm:$0xff] (!%p5866_p5)  }
0x145d   : > { %v6182_v37 = vadd.f32 %v6181_v36, %v6180_v31  ;;  %v7050_v31 = vld [vmem:[%s7908_s1 + $0x38] sm:$0xff] (!%p5866_p5)  }
0x145e   : > { %v5033_v38 = vadd.f32 %v6179_v43, %v4984_v19  ;;  %v4987_v39 = vadd.f32 %v6154_v34, %v4756_v26  ;;  %v7049_v43 = vld [vmem:[%s7908_s1 + $0x30] sm:$0xff] (!%p5866_p5)  }
0x1460   : > { %v5047_v41 = vadd.f32 %v5033_v38, %v7658_v28  ;;  %v5036_v42 = vadd.f32 %v6182_v37, %v4987_v39  ;;  %v5867_v37 = vld [vmem:[%s7910_s3] ss:$0 sm:$0xff] (!%p5866_p5) }
0x1462   : > { %5051 = vst [vmem:[#allocation2] sm:$0xff] %v5047_v41  ;;  %v5048_v51 = vadd.f32 %v5036_v42, %v7660_v22 }
0x1464   : > { %5052 = vst [vmem:[#allocation2 + $0x8] sm:$0xff] %v5048_v51  ;;  %v5065_v21 = vrot.slane (!%p5866_p5), %v5048_v51, 7 }
0x1466   : > { %v5067_v49 = vsel (!%p5866_p5), %vm5066_vm4, %v5065_v21, %v5047_v41 }
0x146c   : > { %v6155_v8 = vpop.f32.mrb[108].mxu1 }
0x146d   : > { %v6183_v17 = vpop.f32.mrb[96].mxu0  ;;  %v6156_v44 = vpop.f32.mrb[109].mxu1 }
0x146e   : > { %v6157_v53 = vadd.f32 %v6156_v44, %v6155_v8  ;;  %v6184_v56 = vpop.f32.mrb[97].mxu0  ;;  %v6158_v61 = vpop.f32.mrb[110].mxu1 }
0x146f   : > { %v6185_v1 = vadd.f32 %v6184_v56, %v6183_v17  ;;  %v6186_v59 = vpop.f32.mrb[98].mxu0  ;;  %v6159_v3 = vpop.f32.mrb[111].mxu1 }
0x1470   : > { %v4992_v58 = vadd.f32 %v6157_v53, %v4756_v26  ;;  %v6160_v45 = vadd.f32 %v6159_v3, %v6158_v61  ;;  %v6187_v5 = vpop.f32.mrb[99].mxu0 }
0x1471   : > { %v6188_v9 = vadd.f32 %v6187_v5, %v6186_v59 }
0x1472   : > { %v5041_v48 = vadd.f32 %v6185_v1, %v4992_v58  ;;  %v4995_v28 = vadd.f32 %v6160_v45, %v4756_v26  ;;  %5058 = sbr.rel (%p5866_p5) target bundleno = 5791 (0x169f), region = 106  ;;  %v7066_v26 = vmov (!%p5866_p5), 0.0  }
0x1473   : > { %6662 = vmatprep.subr.bf16.mxu0 (!%p5866_p5), %v7066_v26  ;;  %6678 = vmatprep.mubr.msk.bf16.mxu0 (!%p5866_p5), %vm7067_vm7, %v7066_v26 }
0x1474   : > { %v5049_v54 = vadd.f32 %v5041_v48, %v7663_v32  ;;  %v5044_v63 = vadd.f32 %v6188_v9, %v4995_v28  ;;  %6663 = vmatpush3.bf16.msra.mxu0 (!%p5866_p5), %v7043_v23 }
0x1475   : > { %6664 = vmatprep.subr.bf16.mxu0 (!%p5866_p5), %v7066_v26 }
0x1476   : > { %5053 = vst [vmem:[#allocation2 + $0x10] sm:$0xff] %v5049_v54  ;;  %v5050_v22 = vadd.f32 %v5044_v63, %v7666_v33  ;;  %v5068_v55 = vrot.slane (!%p5866_p5), %v5049_v54, 6 }
0x1478   : > { %5054 = vst [vmem:[#allocation2 + $0x18] sm:$0xff] %v5050_v22  ;;  %v5071_v6 = vrot.slane (!%p5866_p5), %v5050_v22, 5  ;;  %v5070_v11 = vsel (!%p5866_p5), %vm5069_vm5, %v5068_v55, %v5067_v49  ;;  %6665 = vmatpush3.bf16.msra.mxu0 (!%p5866_p5), %v7044_v14 }
0x1479   : > { %6666 = vmatprep.subr.bf16.mxu0 %v7066_v26 }
0x147a   : > { %v5073_v32 = vsel %vm5072_vm6, %v5071_v6, %v5070_v11 }
0x147b   : > { %v5075_v52 = vsel %vm1244_vm2, %v5073_v32, 0.0 }
0x147c   : > { %5076 = vadd.xlane.f32.xlu0 %v5075_v52  ;;  %6667 = vmatpush3.bf16.msra.mxu0 %v7045_v27 }
0x147d   : > { %6668 = vmatprep.subr.bf16.mxu0 %v7066_v26 }
0x1480   : > { %6669 = vmatpush3.bf16.msra.mxu0 %v7046_v50 }
0x1481   : > { %6670 = vmatprep.subr.bf16.mxu0 %v7066_v26 }
0x1484   : > { %6671 = vmatpush3.bf16.msra.mxu0 %v7047_v60 }
0x1485   : > { %6672 = vmatprep.subr.bf16.mxu0 %v7066_v26 }
0x1488   : > { %6673 = vmatpush3.bf16.msra.mxu0 %v7048_v29 }
0x1489   : > { %6674 = vmatprep.subr.bf16.mxu0 %v7066_v26 }
0x148c   : > { %6675 = vmatpush3.bf16.msra.mxu0 %v7049_v43 }
0x148d   : > { %6676 = vmatprep.subr.bf16.mxu0 %v7066_v26 }
0x1490   : > { %6677 = vmatpush3.bf16.msra.mxu0 %v7050_v31 }
0x1509   : > { %v5077_v33 = vpop.xlane.xlu0 %5076 }
0x150a   : > { %v5078_v2 = vmul.f32 0.0078125, %v5077_v33 }
0x150c   : > { %v5080_v7 = vrot.slane %v5078_v2, 1  ;;  %v5081_v0 = vrot.slane %v5078_v2, 2  ;;  %v5082_v62 = vrot.slane %v5078_v2, 3  ;;  %v5087_v4 = vsub.f32 %v5047_v41, %v5078_v2  ;;  %v5869_v2 = vld [vmem:[%s7909_s2] ss:$0 sm:$0xff] }
0x150e   : > { %v5088_v10 = vsub.f32 %v5048_v51, %v5080_v7  ;;  %v5089_v46 = vsub.f32 %v5049_v54, %v5081_v0  ;;  %v5090_v13 = vsub.f32 %v5050_v22, %v5082_v62  ;;  %v5091_v47 = vmul.f32 %v5087_v4, %v5087_v4  ;;  %v5868_v51 = vld [vmem:[%s7911_s4] ss:$0 sm:$0xff] }
0x1510   : > { %v5092_v18 = vmul.f32 %v5088_v10, %v5088_v10  ;;  %v5093_v12 = vmul.f32 %v5089_v46, %v5089_v46  ;;  %v5094_v30 = vmul.f32 %v5090_v13, %v5090_v13 }
0x1512   : > { %v5099_v40 = vrot.slane %v5092_v18, 7  ;;  %v5101_v15 = vrot.slane %v5093_v12, 6  ;;  %v5103_v35 = vrot.slane %v5094_v30, 5 }
0x1514   : > { %v5100_v16 = vsel %vm5066_vm4, %v5099_v40, %v5091_v47 }
0x1515   : > { %v5102_v20 = vsel %vm5069_vm5, %v5101_v15, %v5100_v16 }
0x1516   : > { %v5104_v24 = vsel %vm5072_vm6, %v5103_v35, %v5102_v20 }
0x1517   : > { %v5106_v25 = vsel %vm1244_vm2, %v5104_v24, 0.0 }
0x1518   : > { %5107 = vadd.xlane.f32.xlu0 %v5106_v25 }
0x15a5   : > { %v5108_v57 = vpop.xlane.xlu0 %5107 }
0x15a6   : > { %v5109_v19 = vmul.f32 0.0078125, %v5108_v57 }
0x15a8   : > { %v5110_v34 = vadd.f32 1e-05, %v5109_v19 }
0x15aa   : > { %7051 = vrsqrt.f32 %v5110_v34 }
0x15b4   : > { %v7052_v36 = vpop.eup %7051 }
0x15b5   : > { %v5113_v38 = vrot.slane %v7052_v36, 1  ;;  %v5114_v39 = vrot.slane %v7052_v36, 2  ;;  %v5115_v41 = vrot.slane %v7052_v36, 3  ;;  %v5120_v42 = vmul.f32 %v7052_v36, %v5087_v4 }
0x15b7   : > { %v5121_v8 = vmul.f32 %v5113_v38, %v5088_v10  ;;  %v5122_v17 = vmul.f32 %v5114_v39, %v5089_v46  ;;  %v5123_v44 = vmul.f32 %v5115_v41, %v5090_v13  ;;  %v5130_v53 = vmul.f32 %v5867_v37, %v5120_v42 }
0x15b9   : > { %v5131_v56 = vmul.f32 %v5867_v37, %v5121_v8  ;;  %v5132_v61 = vmul.f32 %v5867_v37, %v5122_v17  ;;  %v5133_v1 = vmul.f32 %v5867_v37, %v5123_v44  ;;  %v5140_v59 = vadd.f32 %v5868_v51, %v5130_v53 }
0x15bb   : > { %v5141_v3 = vadd.f32 %v5868_v51, %v5131_v56  ;;  %v5142_v58 = vadd.f32 %v5868_v51, %v5132_v61  ;;  %v5143_v45 = vadd.f32 %v5868_v51, %v5133_v1  ;;  %v5144_v5 = vpack.c.bf16 %v5140_v59, %v5140_v59 }
0x15bd   : > { %v5145_v9 = vpack.c.bf16 %v5141_v3, %v5141_v3  ;;  %v5146_v48 = vpack.c.bf16 %v5142_v58, %v5142_v58  ;;  %v5147_v28 = vpack.c.bf16 %v5143_v45, %v5143_v45  ;;  %v5175_v21 = vunpack.c.l.b16 %v5144_v5 }
0x15bf   : > { %v5176_v54 = vunpack.c.l.b16 %v5145_v9  ;;  %v5177_v63 = vunpack.c.l.b16 %v5146_v48  ;;  %v5178_v22 = vunpack.c.l.b16 %v5147_v28 }
0x15c1   : > { %v5179_v55 = vrot.slane %v5176_v54, 7  ;;  %v5181_v6 = vrot.slane %v5177_v63, 6  ;;  %v5183_v11 = vrot.slane %v5178_v22, 5 }
0x15c3   : > { %v5180_v49 = vsel %vm5066_vm4, %v5179_v55, %v5175_v21 }
0x15c4   : > { %v5182_v32 = vsel %vm5069_vm5, %v5181_v6, %v5180_v49 }
0x15c5   : > { %v5184_v52 = vsel %vm5072_vm6, %v5183_v11, %v5182_v32 }
0x15c6   : > { %v5185_v33 = vpack.c.b16 %v5184_v52, %v5184_v52 }
0x15c8   : > { %6679 = vmatmul.mubr.bf16.vlgmr.msra.gmra.mrb[0].mxu0 %v5185_v33 }
0x169b   : > { %v5269_v7 = vpop.f32.mrb[0].mxu0 }
0x169c   : > { %v5270_v0 = vadd.f32 %v5869_v2, %v5269_v7  ;;  %v6680_v62 = vpop.f32.mrb[1].mxu0 }
0x169d   : > { %v5272_v4 = vpop.f32.mrb[2].mxu0 }
0x169e   : > { %5275 = vst [vmem:[%s7925_s13] sm:$0xf] %v5270_v0  ;;  %v6681_v10 = vpop.f32.mrb[3].mxu0 }
0x169f PF: > { %s7926_s18 = sld [smem:[#allocation6_spill]] }
0x16a5   : > { %s22_s21 = sadd.s32 1, %s7926_s18  }
0x16a6   : > { %p19_p6 = scmp.ge.s32.totalorder %s22_s21, 4  }
0x16a8   :  { %21 = sbr.rel (!%p19_p6) target bundleno = 3 (0x3), region = 172 }
0x16af   :  { %5287 = vsyncmov [#allocation3] }
0x16b2   :  { %s5288_s27 = vpop.sfrf %5287 }
0x16b3   :  { %p5880_p7 = scmp.ne.s32.totalorder %s5288_s27, 0 }
0x16b5   :  { %5292 = shalt.err (%p5880_p7)  }

</bundles_post_ra>
